<compile_context>
chip_gen: v7x
topology: tpu7x:2x2x1
jax: 0.10.0
libtpu: 0.0.40
codegen_flags: <defaults>
</compile_context>

<pallas_src>
import jax
import jax.numpy as jnp
from jax.experimental import pallas as pl
from jax.experimental.pallas import tpu as pltpu

CONST = 1e-6
FBASE = 8
BN_EPS = 1e-5
N_PAD = 128  # lane-dense output width (keep >= 128 -> unmasked vector stores)


def _round_up(x, m):
    return (x + m - 1) // m * m


# ----------------------------- Pallas kernels ------------------------------

def conv_bn_relu_kernel(p_ref, w_ref, b_ref, o_ref):
    """o = relu(patches @ (W * bn_scale) + bn_bias) for one M tile."""
    acc = jnp.dot(p_ref[...], w_ref[...], preferred_element_type=jnp.float32)
    o_ref[...] = jnp.maximum(acc + b_ref[...], 0.0).astype(o_ref.dtype)


def make_heads_kernel(latent_dim):
    def heads_kernel(p_ref, w_ref, o_ref):
        """Single matmul against [W_mu | W_logvar]; mu lanes get +const,
        logvar lanes get a numerically-stable softplus + const."""
        acc = jnp.dot(p_ref[...], w_ref[...], preferred_element_type=jnp.float32)
        col = jax.lax.broadcasted_iota(jnp.int32, acc.shape, 1)
        mu = acc + CONST
        sp = jnp.maximum(acc, 0.0) + jnp.log1p(jnp.exp(-jnp.abs(acc))) + CONST
        o_ref[...] = jnp.where(col < latent_dim, mu, sp)
    return heads_kernel


# ------------------------------- JAX glue ----------------------------------

def im2col(x, kh, kw, sh, sw, ph, pw):
    """x: (B, H, W, C) NHWC -> patches (B*OH*OW, kh*kw*C).  Pure indexing."""
    B, H, W, C = x.shape
    xp = jnp.pad(x, ((0, 0), (ph, ph), (pw, pw), (0, 0)))
    OH = (H + 2 * ph - kh) // sh + 1
    OW = (W + 2 * pw - kw) // sw + 1
    cols = []
    for i in range(kh):
        for j in range(kw):
            cols.append(xp[:, i:i + sh * OH:sh, j:j + sw * OW:sw, :])  # (B,OH,OW,C)
    patches = jnp.stack(cols, axis=3).reshape(B * OH * OW, kh * kw * C)
    return patches, OH, OW


def _choose_m_tile(M):
    """Biggest-possible M tiles: one grid step for small M, exactly two
    'parallel' steps for large M so both v7x TensorCores get work."""
    if M <= 2048:
        return M, M                      # single full-M tile (block == array dim)
    tm = _round_up((M + 1) // 2, 16)     # multiple of 16 for bf16 sublane packing
    return tm, 2 * tm


def pallas_matmul_bias_relu(patches, w_scaled, bias_row, out_dtype=jnp.bfloat16):
    """patches (M, K) bf16  @  w_scaled (K, N_PAD) bf16  (+ bias, ReLU)."""
    M, K = patches.shape
    Kw, N = w_scaled.shape
    assert Kw == K and N == N_PAD
    TM, M_pad = _choose_m_tile(M)
    if M_pad != M:
        patches = jnp.zeros((M_pad, K), patches.dtype).at[:M].set(patches)

    out = pl.pallas_call(
        conv_bn_relu_kernel,
        out_shape=jax.ShapeDtypeStruct((M_pad, N), out_dtype),
        grid=(M_pad // TM,),
        in_specs=[
            pl.BlockSpec((TM, K), lambda i: (i, 0)),   # full (unpadded) K dim
            pl.BlockSpec((K, N), lambda i: (0, 0)),
            pl.BlockSpec((1, N), lambda i: (0, 0)),
        ],
        out_specs=pl.BlockSpec((TM, N), lambda i: (i, 0)),
        compiler_params=pltpu.CompilerParams(dimension_semantics=("parallel",)),
    )(patches, w_scaled, bias_row)
    return out[:M]


def conv_bn_relu_layer(x_nhwc, w_oihw, gamma, beta, rmean, rvar, stride, pad):
    Cout, Cin, KH, KW = w_oihw.shape
    assert Cout <= N_PAD
    patches, OH, OW = im2col(x_nhwc, KH, KW, stride[0], stride[1], pad[0], pad[1])

    # Fold inference-mode BN: scale goes into the weight columns (done once in
    # XLA on the tiny weight), bias stays a (1, N_PAD) f32 row for the kernel.
    scale = gamma / jnp.sqrt(rvar + BN_EPS)
    bias = beta - rmean * scale
    # (Cout,Cin,KH,KW) -> (KH,KW,Cin,Cout) -> (KH*KW*Cin, Cout), matching patches.
    w_mat = jnp.transpose(w_oihw, (2, 3, 1, 0)).reshape(KH * KW * Cin, Cout)
    w_scaled = (jnp.zeros((KH * KW * Cin, N_PAD), jnp.float32)
                .at[:, :Cout].set(w_mat * scale[None, :])
                .astype(jnp.bfloat16))
    bias_row = jnp.zeros((1, N_PAD), jnp.float32).at[:, :Cout].set(bias[None, :])

    out = pallas_matmul_bias_relu(patches, w_scaled, bias_row)
    B = x_nhwc.shape[0]
    return out[:, :Cout].reshape(B, OH, OW, Cout)


def heads(x_nhwc, w1_oihw, w2_oihw):
    """mu = x@W1 + const ; logvar = softplus(x@W2) + const, in ONE matmul."""
    B = x_nhwc.shape[0]
    latent, Cin, KH, KW = w1_oihw.shape
    assert 2 * latent <= N_PAD
    patches, _, _ = im2col(x_nhwc, KH, KW, 1, 1, 0, 0)   # (B, KH*KW*Cin), bf16
    M, K = patches.shape

    w1 = jnp.transpose(w1_oihw, (2, 3, 1, 0)).reshape(K, latent)
    w2 = jnp.transpose(w2_oihw, (2, 3, 1, 0)).reshape(K, latent)
    w = (jnp.zeros((K, N_PAD), jnp.float32)
         .at[:, :latent].set(w1)
         .at[:, latent:2 * latent].set(w2)
         .astype(jnp.bfloat16))

    out = pl.pallas_call(
        make_heads_kernel(latent),
        out_shape=jax.ShapeDtypeStruct((M, N_PAD), jnp.float32),
        grid=(1,),
        in_specs=[
            pl.BlockSpec((M, K), lambda i: (0, 0)),
            pl.BlockSpec((K, N_PAD), lambda i: (0, 0)),
        ],
        out_specs=pl.BlockSpec((M, N_PAD), lambda i: (0, 0)),
        compiler_params=pltpu.CompilerParams(dimension_semantics=("arbitrary",)),
    )(patches, w)

    # torch: (B, latent, 1, 1).squeeze() -> (B, latent) for B > 1
    return out[:, :latent], out[:, latent:2 * latent]


# ---------------------------- parameter set-up ------------------------------

def init_params(key, latent_dim):
    conv_specs = [
        (FBASE, 1, 6, 3),
        (FBASE * 2, FBASE, 5, 4),
        (FBASE * 4, FBASE * 2, 6, 4),
        (FBASE * 8, FBASE * 4, 4, 4),
    ]
    params = {"conv": [], "bn": []}
    keys = iter(jax.random.split(key, 8 * len(conv_specs) + 4))
    for (co, ci, kh, kw) in conv_specs:
        params["conv"].append(0.05 * jax.random.normal(next(keys), (co, ci, kh, kw), jnp.float32))
        gamma = 1.0 + 0.1 * jax.random.normal(next(keys), (co,), jnp.float32)
        beta = 0.05 * jax.random.normal(next(keys), (co,), jnp.float32)
        rmean = 0.05 * jax.random.normal(next(keys), (co,), jnp.float32)
        rvar = 1.0 + 0.1 * jnp.abs(jax.random.normal(next(keys), (co,), jnp.float32))
        params["bn"].append((gamma, beta, rmean, rvar))
    params["c1"] = 0.05 * jax.random.normal(next(keys), (latent_dim, FBASE * 8, 4, 4), jnp.float32)
    params["c2"] = 0.05 * jax.random.normal(next(keys), (latent_dim, FBASE * 8, 4, 4), jnp.float32)
    return params


# ------------------------------- forward ------------------------------------

def encoder_tactile_forward(x_nchw, params):
    # NCHW in (PyTorch convention) -> NHWC internally; bf16 matmul operands.
    x = jnp.transpose(x_nchw, (0, 2, 3, 1)).astype(jnp.bfloat16)
    strides = [(4, 1), (3, 2), (3, 2), (2, 2)]
    pads = [(1, 1), (1, 1), (1, 1), (1, 1)]
    for w, bn, st, pd in zip(params["conv"], params["bn"], strides, pads):
        x = conv_bn_relu_layer(x, w, *bn, st, pd)
    mu, logvar = heads(x, params["c1"], params["c2"])
    return mu, logvar


if __name__ == "__main__":
    latent_dim = 16
    key = jax.random.PRNGKey(0)
    k_x, k_p = jax.random.split(key)
    # Input (B=2, C=1, H=300, W=32): the conv stack then yields a 4x4 feature
    # map so that the 4x4 c1/c2 head convs output 1x1 spatial, as in the
    # PyTorch module.
    x = jax.random.normal(k_x, (2, 1, 300, 32), jnp.float32)
    params = init_params(k_p, latent_dim)

    mu, logvar = jax.jit(encoder_tactile_forward)(x, params)
    jax.block_until_ready((mu, logvar))

    assert mu.shape == (2, latent_dim) and logvar.shape == (2, latent_dim)
    assert bool(jnp.all(jnp.isfinite(mu))) and bool(jnp.all(logvar > 0.0))
    print("KERNEL_OK")
</pallas_src>

<mosaic_0001>
module attributes {stable_mosaic.version = 11 : i64} {
  func.func @conv_bn_relu_kernel(%arg0: i32, %arg1: memref<2400x18xbf16, #tpu.memory_space<vmem>>, %arg2: memref<18x128xbf16, #tpu.memory_space<vmem>>, %arg3: memref<1x128xf32, #tpu.memory_space<vmem>>, %arg4: memref<2400x128xbf16, #tpu.memory_space<vmem>>) attributes {dimension_semantics = [#tpu.dimension_semantics<parallel>], iteration_bounds = array<i64: 2>, scalar_prefetch = 0 : i64, scratch_operands = 0 : i64, tpu.core_type = #tpu.core_type<tc>, window_params = [{transform_indices = @transform_0, window_bounds = array<i64: 2400, 18>}, {pipeline_mode = #tpu.pipeline_mode<synchronous>, transform_indices = @transform_1, window_bounds = array<i64: 18, 128>}, {pipeline_mode = #tpu.pipeline_mode<synchronous>, transform_indices = @transform_2, window_bounds = array<i64: 1, 128>}, {transform_indices = @transform_3, window_bounds = array<i64: 2400, 128>}]} {
    %c0 = arith.constant 0 : index
    %c0_0 = arith.constant 0 : index
    %0 = vector.load %arg1[%c0, %c0_0] : memref<2400x18xbf16, #tpu.memory_space<vmem>>, vector<2400x18xbf16>
    %c0_1 = arith.constant 0 : index
    %c0_2 = arith.constant 0 : index
    %1 = vector.load %arg2[%c0_1, %c0_2] : memref<18x128xbf16, #tpu.memory_space<vmem>>, vector<18x128xbf16>
    %cst = arith.constant dense<0.000000e+00> : vector<2400x128xf32>
    %2 = tpu.matmul %0, %1, %cst {dimension_numbers = #tpu.dot_dimension_numbers<[1], [0], [0], [1], [0, 0, 1, 1], [], []>} : vector<2400x18xbf16>, vector<18x128xbf16>, vector<2400x128xf32> -> vector<2400x128xf32>
    %c0_3 = arith.constant 0 : index
    %c0_4 = arith.constant 0 : index
    %3 = vector.load %arg3[%c0_3, %c0_4] : memref<1x128xf32, #tpu.memory_space<vmem>>, vector<1x128xf32>
    %4 = vector.broadcast %3 : vector<1x128xf32> to vector<2400x128xf32>
    %5 = arith.addf %2, %4 : vector<2400x128xf32>
    %cst_5 = arith.constant 0.000000e+00 : f32
    %6 = vector.broadcast %cst_5 : f32 to vector<2400x128xf32>
    %7 = arith.maximumf %5, %6 : vector<2400x128xf32>
    %8 = arith.truncf %7 : vector<2400x128xf32> to vector<2400x128xbf16>
    %c0_6 = arith.constant 0 : index
    %c0_7 = arith.constant 0 : index
    %9 = vector.load %arg4[%c0_6, %c0_7] : memref<2400x128xbf16, #tpu.memory_space<vmem>>, vector<2400x128xbf16>
    tpu.vector_store %arg4[%c0_6, %c0_7], %8 {strides = array<i32>} : memref<2400x128xbf16, #tpu.memory_space<vmem>>, vector<2400x128xbf16>,
    return
  }
  func.func @transform_0(%arg0: i32) -> (i32, i32) {
    %c0_i32 = arith.constant 0 : i32
    %c0_i32_0 = arith.constant 0 : i32
    return %arg0, %c0_i32 : i32, i32
  }
  func.func @transform_1(%arg0: i32) -> (i32, i32) {
    %c0_i32 = arith.constant 0 : i32
    %c0_i32_0 = arith.constant 0 : i32
    %c0_i32_1 = arith.constant 0 : i32
    return %c0_i32, %c0_i32_0 : i32, i32
  }
  func.func @transform_2(%arg0: i32) -> (i32, i32) {
    %c0_i32 = arith.constant 0 : i32
    %c0_i32_0 = arith.constant 0 : i32
    %c0_i32_1 = arith.constant 0 : i32
    return %c0_i32, %c0_i32_0 : i32, i32
  }
  func.func @transform_3(%arg0: i32) -> (i32, i32) {
    %c0_i32 = arith.constant 0 : i32
    %c0_i32_0 = arith.constant 0 : i32
    return %arg0, %c0_i32 : i32, i32
  }
}

module attributes {stable_mosaic.version = 11 : i64} {
  func.func @conv_bn_relu_kernel(%arg0: i32, %arg1: memref<800x160xbf16, #tpu.memory_space<vmem>>, %arg2: memref<160x128xbf16, #tpu.memory_space<vmem>>, %arg3: memref<1x128xf32, #tpu.memory_space<vmem>>, %arg4: memref<800x128xbf16, #tpu.memory_space<vmem>>) attributes {dimension_semantics = [#tpu.dimension_semantics<parallel>], iteration_bounds = array<i64: 1>, scalar_prefetch = 0 : i64, scratch_operands = 0 : i64, tpu.core_type = #tpu.core_type<tc>, window_params = [{transform_indices = @transform_0, window_bounds = array<i64: 800, 160>}, {pipeline_mode = #tpu.pipeline_mode<synchronous>, transform_indices = @transform_1, window_bounds = array<i64: 160, 128>}, {pipeline_mode = #tpu.pipeline_mode<synchronous>, transform_indices = @transform_2, window_bounds = array<i64: 1, 128>}, {transform_indices = @transform_3, window_bounds = array<i64: 800, 128>}]} {
    %c0 = arith.constant 0 : index
    %c0_0 = arith.constant 0 : index
    %0 = vector.load %arg1[%c0, %c0_0] : memref<800x160xbf16, #tpu.memory_space<vmem>>, vector<800x160xbf16>
    %c0_1 = arith.constant 0 : index
    %c0_2 = arith.constant 0 : index
    %1 = vector.load %arg2[%c0_1, %c0_2] : memref<160x128xbf16, #tpu.memory_space<vmem>>, vector<160x128xbf16>
    %cst = arith.constant dense<0.000000e+00> : vector<800x128xf32>
    %2 = tpu.matmul %0, %1, %cst {dimension_numbers = #tpu.dot_dimension_numbers<[1], [0], [0], [1], [0, 0, 1, 1], [], []>} : vector<800x160xbf16>, vector<160x128xbf16>, vector<800x128xf32> -> vector<800x128xf32>
    %c0_3 = arith.constant 0 : index
    %c0_4 = arith.constant 0 : index
    %3 = vector.load %arg3[%c0_3, %c0_4] : memref<1x128xf32, #tpu.memory_space<vmem>>, vector<1x128xf32>
    %4 = vector.broadcast %3 : vector<1x128xf32> to vector<800x128xf32>
    %5 = arith.addf %2, %4 : vector<800x128xf32>
    %cst_5 = arith.constant 0.000000e+00 : f32
    %6 = vector.broadcast %cst_5 : f32 to vector<800x128xf32>
    %7 = arith.maximumf %5, %6 : vector<800x128xf32>
    %8 = arith.truncf %7 : vector<800x128xf32> to vector<800x128xbf16>
    %c0_6 = arith.constant 0 : index
    %c0_7 = arith.constant 0 : index
    %9 = vector.load %arg4[%c0_6, %c0_7] : memref<800x128xbf16, #tpu.memory_space<vmem>>, vector<800x128xbf16>
    tpu.vector_store %arg4[%c0_6, %c0_7], %8 {strides = array<i32>} : memref<800x128xbf16, #tpu.memory_space<vmem>>, vector<800x128xbf16>,
    return
  }
  func.func @transform_0(%arg0: i32) -> (i32, i32) {
    %c0_i32 = arith.constant 0 : i32
    %c0_i32_0 = arith.constant 0 : i32
    return %arg0, %c0_i32 : i32, i32
  }
  func.func @transform_1(%arg0: i32) -> (i32, i32) {
    %c0_i32 = arith.constant 0 : i32
    %c0_i32_0 = arith.constant 0 : i32
    %c0_i32_1 = arith.constant 0 : i32
    return %c0_i32, %c0_i32_0 : i32, i32
  }
  func.func @transform_2(%arg0: i32) -> (i32, i32) {
    %c0_i32 = arith.constant 0 : i32
    %c0_i32_0 = arith.constant 0 : i32
    %c0_i32_1 = arith.constant 0 : i32
    return %c0_i32, %c0_i32_0 : i32, i32
  }
  func.func @transform_3(%arg0: i32) -> (i32, i32) {
    %c0_i32 = arith.constant 0 : i32
    %c0_i32_0 = arith.constant 0 : i32
    return %arg0, %c0_i32 : i32, i32
  }
}

module attributes {stable_mosaic.version = 11 : i64} {
  func.func @conv_bn_relu_kernel(%arg0: i32, %arg1: memref<128x384xbf16, #tpu.memory_space<vmem>>, %arg2: memref<384x128xbf16, #tpu.memory_space<vmem>>, %arg3: memref<1x128xf32, #tpu.memory_space<vmem>>, %arg4: memref<128x128xbf16, #tpu.memory_space<vmem>>) attributes {dimension_semantics = [#tpu.dimension_semantics<parallel>], iteration_bounds = array<i64: 1>, scalar_prefetch = 0 : i64, scratch_operands = 0 : i64, tpu.core_type = #tpu.core_type<tc>, window_params = [{transform_indices = @transform_0, window_bounds = array<i64: 128, 384>}, {pipeline_mode = #tpu.pipeline_mode<synchronous>, transform_indices = @transform_1, window_bounds = array<i64: 384, 128>}, {pipeline_mode = #tpu.pipeline_mode<synchronous>, transform_indices = @transform_2, window_bounds = array<i64: 1, 128>}, {transform_indices = @transform_3, window_bounds = array<i64: 128, 128>}]} {
    %c0 = arith.constant 0 : index
    %c0_0 = arith.constant 0 : index
    %0 = vector.load %arg1[%c0, %c0_0] : memref<128x384xbf16, #tpu.memory_space<vmem>>, vector<128x384xbf16>
    %c0_1 = arith.constant 0 : index
    %c0_2 = arith.constant 0 : index
    %1 = vector.load %arg2[%c0_1, %c0_2] : memref<384x128xbf16, #tpu.memory_space<vmem>>, vector<384x128xbf16>
    %cst = arith.constant dense<0.000000e+00> : vector<128x128xf32>
    %2 = tpu.matmul %0, %1, %cst {dimension_numbers = #tpu.dot_dimension_numbers<[1], [0], [0], [1], [0, 0, 1, 1], [], []>} : vector<128x384xbf16>, vector<384x128xbf16>, vector<128x128xf32> -> vector<128x128xf32>
    %c0_3 = arith.constant 0 : index
    %c0_4 = arith.constant 0 : index
    %3 = vector.load %arg3[%c0_3, %c0_4] : memref<1x128xf32, #tpu.memory_space<vmem>>, vector<1x128xf32>
    %4 = vector.broadcast %3 : vector<1x128xf32> to vector<128x128xf32>
    %5 = arith.addf %2, %4 : vector<128x128xf32>
    %cst_5 = arith.constant 0.000000e+00 : f32
    %6 = vector.broadcast %cst_5 : f32 to vector<128x128xf32>
    %7 = arith.maximumf %5, %6 : vector<128x128xf32>
    %8 = arith.truncf %7 : vector<128x128xf32> to vector<128x128xbf16>
    %c0_6 = arith.constant 0 : index
    %c0_7 = arith.constant 0 : index
    %9 = vector.load %arg4[%c0_6, %c0_7] : memref<128x128xbf16, #tpu.memory_space<vmem>>, vector<128x128xbf16>
    tpu.vector_store %arg4[%c0_6, %c0_7], %8 {strides = array<i32>} : memref<128x128xbf16, #tpu.memory_space<vmem>>, vector<128x128xbf16>,
    return
  }
  func.func @transform_0(%arg0: i32) -> (i32, i32) {
    %c0_i32 = arith.constant 0 : i32
    %c0_i32_0 = arith.constant 0 : i32
    return %arg0, %c0_i32 : i32, i32
  }
  func.func @transform_1(%arg0: i32) -> (i32, i32) {
    %c0_i32 = arith.constant 0 : i32
    %c0_i32_0 = arith.constant 0 : i32
    %c0_i32_1 = arith.constant 0 : i32
    return %c0_i32, %c0_i32_0 : i32, i32
  }
  func.func @transform_2(%arg0: i32) -> (i32, i32) {
    %c0_i32 = arith.constant 0 : i32
    %c0_i32_0 = arith.constant 0 : i32
    %c0_i32_1 = arith.constant 0 : i32
    return %c0_i32, %c0_i32_0 : i32, i32
  }
  func.func @transform_3(%arg0: i32) -> (i32, i32) {
    %c0_i32 = arith.constant 0 : i32
    %c0_i32_0 = arith.constant 0 : i32
    return %arg0, %c0_i32 : i32, i32
  }
}

module attributes {stable_mosaic.version = 11 : i64} {
  func.func @conv_bn_relu_kernel(%arg0: i32, %arg1: memref<32x512xbf16, #tpu.memory_space<vmem>>, %arg2: memref<512x128xbf16, #tpu.memory_space<vmem>>, %arg3: memref<1x128xf32, #tpu.memory_space<vmem>>, %arg4: memref<32x128xbf16, #tpu.memory_space<vmem>>) attributes {dimension_semantics = [#tpu.dimension_semantics<parallel>], iteration_bounds = array<i64: 1>, scalar_prefetch = 0 : i64, scratch_operands = 0 : i64, tpu.core_type = #tpu.core_type<tc>, window_params = [{transform_indices = @transform_0, window_bounds = array<i64: 32, 512>}, {pipeline_mode = #tpu.pipeline_mode<synchronous>, transform_indices = @transform_1, window_bounds = array<i64: 512, 128>}, {pipeline_mode = #tpu.pipeline_mode<synchronous>, transform_indices = @transform_2, window_bounds = array<i64: 1, 128>}, {transform_indices = @transform_3, window_bounds = array<i64: 32, 128>}]} {
    %c0 = arith.constant 0 : index
    %c0_0 = arith.constant 0 : index
    %0 = vector.load %arg1[%c0, %c0_0] : memref<32x512xbf16, #tpu.memory_space<vmem>>, vector<32x512xbf16>
    %c0_1 = arith.constant 0 : index
    %c0_2 = arith.constant 0 : index
    %1 = vector.load %arg2[%c0_1, %c0_2] : memref<512x128xbf16, #tpu.memory_space<vmem>>, vector<512x128xbf16>
    %cst = arith.constant dense<0.000000e+00> : vector<32x128xf32>
    %2 = tpu.matmul %0, %1, %cst {dimension_numbers = #tpu.dot_dimension_numbers<[1], [0], [0], [1], [0, 0, 1, 1], [], []>} : vector<32x512xbf16>, vector<512x128xbf16>, vector<32x128xf32> -> vector<32x128xf32>
    %c0_3 = arith.constant 0 : index
    %c0_4 = arith.constant 0 : index
    %3 = vector.load %arg3[%c0_3, %c0_4] : memref<1x128xf32, #tpu.memory_space<vmem>>, vector<1x128xf32>
    %4 = vector.broadcast %3 : vector<1x128xf32> to vector<32x128xf32>
    %5 = arith.addf %2, %4 : vector<32x128xf32>
    %cst_5 = arith.constant 0.000000e+00 : f32
    %6 = vector.broadcast %cst_5 : f32 to vector<32x128xf32>
    %7 = arith.maximumf %5, %6 : vector<32x128xf32>
    %8 = arith.truncf %7 : vector<32x128xf32> to vector<32x128xbf16>
    %c0_6 = arith.constant 0 : index
    %c0_7 = arith.constant 0 : index
    %9 = vector.load %arg4[%c0_6, %c0_7] : memref<32x128xbf16, #tpu.memory_space<vmem>>, vector<32x128xbf16>
    tpu.vector_store %arg4[%c0_6, %c0_7], %8 {strides = array<i32>} : memref<32x128xbf16, #tpu.memory_space<vmem>>, vector<32x128xbf16>,
    return
  }
  func.func @transform_0(%arg0: i32) -> (i32, i32) {
    %c0_i32 = arith.constant 0 : i32
    %c0_i32_0 = arith.constant 0 : i32
    return %arg0, %c0_i32 : i32, i32
  }
  func.func @transform_1(%arg0: i32) -> (i32, i32) {
    %c0_i32 = arith.constant 0 : i32
    %c0_i32_0 = arith.constant 0 : i32
    %c0_i32_1 = arith.constant 0 : i32
    return %c0_i32, %c0_i32_0 : i32, i32
  }
  func.func @transform_2(%arg0: i32) -> (i32, i32) {
    %c0_i32 = arith.constant 0 : i32
    %c0_i32_0 = arith.constant 0 : i32
    %c0_i32_1 = arith.constant 0 : i32
    return %c0_i32, %c0_i32_0 : i32, i32
  }
  func.func @transform_3(%arg0: i32) -> (i32, i32) {
    %c0_i32 = arith.constant 0 : i32
    %c0_i32_0 = arith.constant 0 : i32
    return %arg0, %c0_i32 : i32, i32
  }
}

module attributes {stable_mosaic.version = 11 : i64} {
  func.func @heads_kernel(%arg0: i32, %arg1: memref<2x1024xbf16, #tpu.memory_space<vmem>>, %arg2: memref<1024x128xbf16, #tpu.memory_space<vmem>>, %arg3: memref<2x128xf32, #tpu.memory_space<vmem>>) attributes {dimension_semantics = [#tpu.dimension_semantics<arbitrary>], iteration_bounds = array<i64: 1>, scalar_prefetch = 0 : i64, scratch_operands = 0 : i64, tpu.core_type = #tpu.core_type<tc>, window_params = [{pipeline_mode = #tpu.pipeline_mode<synchronous>, transform_indices = @transform_0, window_bounds = array<i64: 2, 1024>}, {pipeline_mode = #tpu.pipeline_mode<synchronous>, transform_indices = @transform_1, window_bounds = array<i64: 1024, 128>}, {pipeline_mode = #tpu.pipeline_mode<synchronous>, transform_indices = @transform_2, window_bounds = array<i64: 2, 128>}]} {
    %c0 = arith.constant 0 : index
    %c0_0 = arith.constant 0 : index
    %0 = vector.load %arg1[%c0, %c0_0] : memref<2x1024xbf16, #tpu.memory_space<vmem>>, vector<2x1024xbf16>
    %c0_1 = arith.constant 0 : index
    %c0_2 = arith.constant 0 : index
    %1 = vector.load %arg2[%c0_1, %c0_2] : memref<1024x128xbf16, #tpu.memory_space<vmem>>, vector<1024x128xbf16>
    %cst = arith.constant dense<0.000000e+00> : vector<2x128xf32>
    %2 = tpu.matmul %0, %1, %cst {dimension_numbers = #tpu.dot_dimension_numbers<[1], [0], [0], [1], [0, 0, 1, 1], [], []>} : vector<2x1024xbf16>, vector<1024x128xbf16>, vector<2x128xf32> -> vector<2x128xf32>
    %3 = tpu.iota {dimensions = array<i32: 1>} : vector<2x128xi32>
    %cst_3 = arith.constant 9.99999997E-7 : f32
    %4 = vector.broadcast %cst_3 : f32 to vector<2x128xf32>
    %5 = arith.addf %2, %4 : vector<2x128xf32>
    %cst_4 = arith.constant 0.000000e+00 : f32
    %6 = vector.broadcast %cst_4 : f32 to vector<2x128xf32>
    %7 = arith.maximumf %2, %6 : vector<2x128xf32>
    %8 = math.absf %2 : vector<2x128xf32>
    %cst_5 = arith.constant 0.000000e+00 : f32
    %9 = vector.broadcast %cst_5 : f32 to vector<2x128xf32>
    %10 = arith.subf %9, %8 : vector<2x128xf32>
    %11 = math.exp %10 : vector<2x128xf32>
    %12 = math.log1p %11 : vector<2x128xf32>
    %13 = arith.addf %7, %12 : vector<2x128xf32>
    %cst_6 = arith.constant 9.99999997E-7 : f32
    %14 = vector.broadcast %cst_6 : f32 to vector<2x128xf32>
    %15 = arith.addf %13, %14 : vector<2x128xf32>
    %c16_i32 = arith.constant 16 : i32
    %16 = vector.broadcast %c16_i32 : i32 to vector<2x128xi32>
    %17 = arith.cmpi slt, %3, %16 : vector<2x128xi32>
    %18 = arith.select %17, %5, %15 : vector<2x128xi1>, vector<2x128xf32>
    %c0_7 = arith.constant 0 : index
    %c0_8 = arith.constant 0 : index
    %19 = vector.load %arg3[%c0_7, %c0_8] : memref<2x128xf32, #tpu.memory_space<vmem>>, vector<2x128xf32>
    tpu.vector_store %arg3[%c0_7, %c0_8], %18 {strides = array<i32>} : memref<2x128xf32, #tpu.memory_space<vmem>>, vector<2x128xf32>,
    return
  }
  func.func @transform_0(%arg0: i32) -> (i32, i32) {
    %c0_i32 = arith.constant 0 : i32
    %c0_i32_0 = arith.constant 0 : i32
    %c0_i32_1 = arith.constant 0 : i32
    return %c0_i32, %c0_i32_0 : i32, i32
  }
  func.func @transform_1(%arg0: i32) -> (i32, i32) {
    %c0_i32 = arith.constant 0 : i32
    %c0_i32_0 = arith.constant 0 : i32
    %c0_i32_1 = arith.constant 0 : i32
    return %c0_i32, %c0_i32_0 : i32, i32
  }
  func.func @transform_2(%arg0: i32) -> (i32, i32) {
    %c0_i32 = arith.constant 0 : i32
    %c0_i32_0 = arith.constant 0 : i32
    %c0_i32_1 = arith.constant 0 : i32
    return %c0_i32, %c0_i32_0 : i32, i32
  }
}

</mosaic_0001>

<bundles_post_ra>
// kernel: encoder_tactile_forward.5
= control target key start
LH: loop header
LB: loop body
LE: loop exit
PB: predicated region body
PF: predicated region fallthrough
CT: control target
= control target key end

     0   :  { %s7251_s12 = smov 0   ;;  %s8050_s0 = inlined_call_operand.vmem [shape: bf16[4800,18], index: 0, kind: input, shape index: {}]   ;;  %s8051_s1 = inlined_call_operand.vmem [shape: bf16[18,128], index: 1, kind: input, shape index: {}]   ;;  %s8052_s2 = inlined_call_operand.vmem [shape: f32[1,128], index: 2, kind: input, shape index: {}]   ;;  %s8053_s3 = inlined_call_operand.vmem [shape: bf16[4800,128], index: 3, kind: output, shape index: {}]  }
   0x1 LB: > { %s4788_s13 = sadd.s32 4294967295, %s7229_s12   ;;  %p4792_p0 = scmp.ge.s32.totalorder %s7229_s12, 1  ;;  %s7229_s12 = sphi %s7251_s12, %s13_s12  }
   0x2   : > { %p138_p1 = scmp.lt.s32.totalorder %s7229_s12, 3 }
   0x4   : > { %p139_p2 = pnand %p4792_p0, %p138_p1 }
   0x5   : > { %v7069_v0 = vld [vmem:[%s8051_s1] sm:$0xff] (!%p139_p2)   ;;  %vm1695_vm0 = vcmask (!%p139_p2), 1040384   ;;  %v7070_v1 = vld [vmem:[%s8051_s1 + $0x8] ss:$0 sps:$4 sm:$0x11] (!%p139_p2)   ;;  %s162_s18 = smul.u32 (!%p139_p2), 300, %s4788_s13 }
   0x6   : > { %142 = sbr.rel (%p139_p2) target bundleno = 536 (0x218), region = 32  ;;  %6751 = vmatprep.subr.bf16.mxu0 (!%p139_p2), %v7069_v0  ;;  %7055 = vmatprep.subr.bf16.mxu1 (!%p139_p2), %v7069_v0  ;;  %v1697_v2 = vsel (!%p139_p2), %vm1695_vm0, %v7070_v1, 0  ;;  %vm1244_vm1 = vcmask (!%p139_p2), 146432  }
   0x7   : > { %6752 = vmatpush3.bf16.msra.mxu0 (!%p139_p2), %v7069_v0  ;;  %7057 = vmatpush3.bf16.msra.mxu1 (!%p139_p2), %v7069_v0  ;;  %p163_p3 = scmp.lt.s32.totalorder (!%p139_p2), %s162_s18, 599 }
   0x8   : > { %7059 = vmatprep.subr.msk.bf16.mxu0 (!%p139_p2), %vm1695_vm0, %v7070_v1  ;;  %7060 = vmatprep.subr.msk.bf16.mxu1 (!%p139_p2), %vm1695_vm0, %v7070_v1 }
   0xb   : > { %6754 = vmatpush3.bf16.msra.mxu0 (!%p139_p2), %v1697_v2  ;;  %7058 = vmatpush3.bf16.msra.mxu1 (!%p139_p2), %v1697_v2 }
   0xd   : > { %s8055_s18 = smov (!%p163_p3, %s162_s18), 599 }
   0xe   : > { %s4793_s19 = sshll.u32 %s8055_s18, 2 }
   0xf   : > { %s7273_s22 = scalar_lea.vmem %s8050_s0, %s4793_s19  ;;  %s7517_s27 = scalar_lea.vmem %s8053_s3, %s4793_s19 }
  0x10   : > { %v7071_v3 = vld [vmem:[%s7273_s22] sm:$0xff]   ;;  %v7072_v4 = vld [vmem:[%s7273_s22 + $0x8] sm:$0xff]   ;;  %v7075_v7 = vld [vmem:[%s7273_s22 + $0x10] sm:$0xff]  }
  0x11   : > { %6755 = vmatprep.mubr.msk.bf16.mxu0 %vm1244_vm1, %v7071_v3  ;;  %v7073_v5 = vld [vmem:[%s7273_s22 + $0x260] sm:$0xff]   ;;  %v7074_v6 = vld [vmem:[%s7273_s22 + $0x268] sm:$0xff]   ;;  %v7077_v8 = vld [vmem:[%s7273_s22 + $0x270] sm:$0xff]  }
  0x12   : > { %6756 = vmatmul.mubr.msk.bf16.vlgmr.msra.gmra.mrb[0].mxu0 %vm1244_vm1, %v7072_v4  ;;  %6907 = vmatprep.mubr.msk.bf16.mxu1 %vm1244_vm1, %v7073_v5  ;;  %v7076_v9 = vld [vmem:[%s7273_s22 + $0x18] sm:$0xff]   ;;  %v7079_v10 = vld [vmem:[%s7273_s22 + $0x20] sm:$0xff]   ;;  %v7080_v13 = vld [vmem:[%s7273_s22 + $0x28] sm:$0xff]  }
  0x13   : > { %6908 = vmatmul.mubr.msk.bf16.vlgmr.msra.gmra.mrb[0].mxu1 %vm1244_vm1, %v7074_v6  ;;  %6759 = vmatprep.mubr.msk.bf16.mxu0 %vm1244_vm1, %v7075_v7  ;;  %v7078_v11 = vld [vmem:[%s7273_s22 + $0x278] sm:$0xff]   ;;  %v7081_v12 = vld [vmem:[%s7273_s22 + $0x280] sm:$0xff]   ;;  %v7083_v14 = vld [vmem:[%s7273_s22 + $0x30] sm:$0xff]  }
  0x14   : > { %6911 = vmatprep.mubr.msk.bf16.mxu1 %vm1244_vm1, %v7077_v8  ;;  %v7082_v15 = vld [vmem:[%s7273_s22 + $0x288] sm:$0xff]   ;;  %v7085_v16 = vld [vmem:[%s7273_s22 + $0x290] sm:$0xff]   ;;  %v7084_v17 = vld [vmem:[%s7273_s22 + $0x38] sm:$0xff]  }
  0x15   : > { %v7087_v18 = vld [vmem:[%s7273_s22 + $0x40] sm:$0xff]   ;;  %v7086_v19 = vld [vmem:[%s7273_s22 + $0x298] sm:$0xff]   ;;  %v7088_v21 = vld [vmem:[%s7273_s22 + $0x48] sm:$0xff]  }
  0x16   : > { %v7089_v20 = vld [vmem:[%s7273_s22 + $0x2a0] sm:$0xff]   ;;  %v7091_v22 = vld [vmem:[%s7273_s22 + $0x50] sm:$0xff]   ;;  %v7090_v23 = vld [vmem:[%s7273_s22 + $0x2a8] sm:$0xff]  }
  0x17   : > { %v7093_v24 = vld [vmem:[%s7273_s22 + $0x2b0] sm:$0xff]   ;;  %v7092_v25 = vld [vmem:[%s7273_s22 + $0x58] sm:$0xff]   ;;  %v7095_v26 = vld [vmem:[%s7273_s22 + $0x60] sm:$0xff]  }
  0x18   : > { %v7094_v27 = vld [vmem:[%s7273_s22 + $0x2b8] sm:$0xff]   ;;  %v7097_v28 = vld [vmem:[%s7273_s22 + $0x2c0] sm:$0xff]   ;;  %v7096_v29 = vld [vmem:[%s7273_s22 + $0x68] sm:$0xff]  }
  0x19   : > { %v7099_v30 = vld [vmem:[%s7273_s22 + $0x70] sm:$0xff]   ;;  %v7098_v31 = vld [vmem:[%s7273_s22 + $0x2c8] sm:$0xff]   ;;  %v7100_v33 = vld [vmem:[%s7273_s22 + $0x78] sm:$0xff]  }
  0x1a   : > { %6760 = vmatmul.mubr.msk.bf16.gmra.mrb[4].mxu0 %vm1244_vm1, %v7076_v9  ;;  %v7101_v32 = vld [vmem:[%s7273_s22 + $0x2d0] sm:$0xff]   ;;  %v7103_v34 = vld [vmem:[%s7273_s22 + $0x80] sm:$0xff]   ;;  %v7102_v35 = vld [vmem:[%s7273_s22 + $0x2d8] sm:$0xff]  }
  0x1b   : > { %6763 = vmatprep.mubr.msk.bf16.mxu0 %vm1244_vm1, %v7079_v10  ;;  %6912 = vmatmul.mubr.msk.bf16.gmra.mrb[4].mxu1 %vm1244_vm1, %v7078_v11  ;;  %v7105_v36 = vld [vmem:[%s7273_s22 + $0x2e0] sm:$0xff]   ;;  %v7104_v37 = vld [vmem:[%s7273_s22 + $0x88] sm:$0xff]   ;;  %v7107_v38 = vld [vmem:[%s7273_s22 + $0x90] sm:$0xff]  }
  0x1c   : > { %6915 = vmatprep.mubr.msk.bf16.mxu1 %vm1244_vm1, %v7081_v12  ;;  %v7106_v39 = vld [vmem:[%s7273_s22 + $0x2e8] sm:$0xff]   ;;  %v7109_v40 = vld [vmem:[%s7273_s22 + $0x2f0] sm:$0xff]   ;;  %v7108_v41 = vld [vmem:[%s7273_s22 + $0x98] sm:$0xff]  }
  0x1d   : > { %v7111_v42 = vld [vmem:[%s7273_s22 + $0xa0] sm:$0xff]   ;;  %v7110_v43 = vld [vmem:[%s7273_s22 + $0x2f8] sm:$0xff]   ;;  %v7112_v45 = vld [vmem:[%s7273_s22 + $0xa8] sm:$0xff]  }
  0x1e   : > { %v7113_v44 = vld [vmem:[%s7273_s22 + $0x300] sm:$0xff]   ;;  %v7115_v46 = vld [vmem:[%s7273_s22 + $0xb0] sm:$0xff]   ;;  %v7114_v47 = vld [vmem:[%s7273_s22 + $0x308] sm:$0xff]  }
  0x1f   : > { %v7117_v48 = vld [vmem:[%s7273_s22 + $0x310] sm:$0xff]   ;;  %v7116_v49 = vld [vmem:[%s7273_s22 + $0xb8] sm:$0xff]   ;;  %v7119_v50 = vld [vmem:[%s7273_s22 + $0xc0] sm:$0xff]  }
  0x20   : > { %v7118_v51 = vld [vmem:[%s7273_s22 + $0x318] sm:$0xff]   ;;  %v7121_v52 = vld [vmem:[%s7273_s22 + $0x320] sm:$0xff]   ;;  %v7120_v53 = vld [vmem:[%s7273_s22 + $0xc8] sm:$0xff]  }
  0x21   : > { %v7123_v54 = vld [vmem:[%s7273_s22 + $0xd0] sm:$0xff]   ;;  %v7122_v55 = vld [vmem:[%s7273_s22 + $0x328] sm:$0xff]   ;;  %v7124_v57 = vld [vmem:[%s7273_s22 + $0xd8] sm:$0xff]  }
  0x22   : > { %6764 = vmatmul.mubr.msk.bf16.gmra.mrb[8].mxu0 %vm1244_vm1, %v7080_v13  ;;  %v7125_v56 = vld [vmem:[%s7273_s22 + $0x330] sm:$0xff]   ;;  %v7127_v58 = vld [vmem:[%s7273_s22 + $0xe0] sm:$0xff]   ;;  %v7126_v59 = vld [vmem:[%s7273_s22 + $0x338] sm:$0xff]  }
  0x23   : > { %6767 = vmatprep.mubr.msk.bf16.mxu0 %vm1244_vm1, %v7083_v14  ;;  %6916 = vmatmul.mubr.msk.bf16.gmra.mrb[8].mxu1 %vm1244_vm1, %v7082_v15  ;;  %v7129_v60 = vld [vmem:[%s7273_s22 + $0x340] sm:$0xff]   ;;  %v7128_v61 = vld [vmem:[%s7273_s22 + $0xe8] sm:$0xff]   ;;  %v7131_v62 = vld [vmem:[%s7273_s22 + $0xf0] sm:$0xff]  }
  0x24   : > { %6919 = vmatprep.mubr.msk.bf16.mxu1 %vm1244_vm1, %v7085_v16  ;;  %v7130_v63 = vld [vmem:[%s7273_s22 + $0x348] sm:$0xff]   ;;  %v7133_v0 = vld [vmem:[%s7273_s22 + $0x350] sm:$0xff]   ;;  %v7132_v1 = vld [vmem:[%s7273_s22 + $0xf8] sm:$0xff]  }
  0x25   : > { %v7135_v2 = vld [vmem:[%s7273_s22 + $0x100] sm:$0xff]   ;;  %v7134_v3 = vld [vmem:[%s7273_s22 + $0x358] sm:$0xff]   ;;  %v7136_v5 = vld [vmem:[%s7273_s22 + $0x108] sm:$0xff]  }
  0x26   : > { %v7137_v4 = vld [vmem:[%s7273_s22 + $0x360] sm:$0xff]   ;;  %v7139_v6 = vld [vmem:[%s7273_s22 + $0x110] sm:$0xff]   ;;  %v7138_v7 = vld [vmem:[%s7273_s22 + $0x368] sm:$0xff]  }
  0x27   : > { %v7141_v8 = vld [vmem:[%s7273_s22 + $0x370] sm:$0xff]   ;;  %v7140_v9 = vld [vmem:[%s7273_s22 + $0x118] sm:$0xff]   ;;  %v7143_v11 = vld [vmem:[%s7273_s22 + $0x120] sm:$0xff]  }
  0x28   : > { %v7142_v10 = vld [vmem:[%s7273_s22 + $0x378] sm:$0xff]   ;;  %v7145_v12 = vld [vmem:[%s7273_s22 + $0x380] sm:$0xff]   ;;  %v7144_v13 = vld [vmem:[%s7273_s22 + $0x128] sm:$0xff]  }
  0x29   : > { %v7147_v14 = vld [vmem:[%s7273_s22 + $0x130] sm:$0xff]   ;;  %v7146_v15 = vld [vmem:[%s7273_s22 + $0x388] sm:$0xff]  }
  0x2a   : > { %6768 = vmatmul.mubr.msk.bf16.gmra.mrb[12].mxu0 %vm1244_vm1, %v7084_v17  ;;  %v7149_v16 = vld [vmem:[%s7273_s22 + $0x390] sm:$0xff]   ;;  %v7148_v17 = vld [vmem:[%s7273_s22 + $0x138] sm:$0xff]  }
  0x2b   : > { %6771 = vmatprep.mubr.msk.bf16.mxu0 %vm1244_vm1, %v7087_v18  ;;  %6920 = vmatmul.mubr.msk.bf16.gmra.mrb[12].mxu1 %vm1244_vm1, %v7086_v19  ;;  %v7151_v18 = vld [vmem:[%s7273_s22 + $0x140] sm:$0xff]   ;;  %v7150_v19 = vld [vmem:[%s7273_s22 + $0x398] sm:$0xff]  }
  0x2c   : > { %6923 = vmatprep.mubr.msk.bf16.mxu1 %vm1244_vm1, %v7089_v20  ;;  %v7153_v20 = vld [vmem:[%s7273_s22 + $0x3a0] sm:$0xff]  }
  0x32   : > { %6772 = vmatmul.mubr.msk.bf16.gmra.mrb[16].mxu0 %vm1244_vm1, %v7088_v21  ;;  %v7152_v21 = vld [vmem:[%s7273_s22 + $0x148] sm:$0xff]  }
  0x33   : > { %6775 = vmatprep.mubr.msk.bf16.mxu0 %vm1244_vm1, %v7091_v22  ;;  %6924 = vmatmul.mubr.msk.bf16.gmra.mrb[16].mxu1 %vm1244_vm1, %v7090_v23  ;;  %v7155_v22 = vld [vmem:[%s7273_s22 + $0x150] sm:$0xff]   ;;  %v7154_v23 = vld [vmem:[%s7273_s22 + $0x3a8] sm:$0xff]  }
  0x34   : > { %6927 = vmatprep.mubr.msk.bf16.mxu1 %vm1244_vm1, %v7093_v24  ;;  %v7157_v24 = vld [vmem:[%s7273_s22 + $0x3b0] sm:$0xff]  }
  0x3a   : > { %6776 = vmatmul.mubr.msk.bf16.gmra.mrb[20].mxu0 %vm1244_vm1, %v7092_v25  ;;  %v7156_v25 = vld [vmem:[%s7273_s22 + $0x158] sm:$0xff]  }
  0x3b   : > { %6779 = vmatprep.mubr.msk.bf16.mxu0 %vm1244_vm1, %v7095_v26  ;;  %6928 = vmatmul.mubr.msk.bf16.gmra.mrb[20].mxu1 %vm1244_vm1, %v7094_v27  ;;  %v7159_v26 = vld [vmem:[%s7273_s22 + $0x160] sm:$0xff]   ;;  %v7158_v27 = vld [vmem:[%s7273_s22 + $0x3b8] sm:$0xff]  }
  0x3c   : > { %6931 = vmatprep.mubr.msk.bf16.mxu1 %vm1244_vm1, %v7097_v28  ;;  %v7161_v28 = vld [vmem:[%s7273_s22 + $0x3c0] sm:$0xff]  }
  0x42   : > { %6780 = vmatmul.mubr.msk.bf16.gmra.mrb[24].mxu0 %vm1244_vm1, %v7096_v29  ;;  %v7160_v29 = vld [vmem:[%s7273_s22 + $0x168] sm:$0xff]  }
  0x43   : > { %6783 = vmatprep.mubr.msk.bf16.mxu0 %vm1244_vm1, %v7099_v30  ;;  %6932 = vmatmul.mubr.msk.bf16.gmra.mrb[24].mxu1 %vm1244_vm1, %v7098_v31  ;;  %v7163_v30 = vld [vmem:[%s7273_s22 + $0x170] sm:$0xff]   ;;  %v7162_v31 = vld [vmem:[%s7273_s22 + $0x3c8] sm:$0xff]  }
  0x44   : > { %6935 = vmatprep.mubr.msk.bf16.mxu1 %vm1244_vm1, %v7101_v32  ;;  %v7165_v32 = vld [vmem:[%s7273_s22 + $0x3d0] sm:$0xff]  }
  0x4a   : > { %6784 = vmatmul.mubr.msk.bf16.gmra.mrb[28].mxu0 %vm1244_vm1, %v7100_v33  ;;  %v7164_v33 = vld [vmem:[%s7273_s22 + $0x178] sm:$0xff]  }
  0x4b   : > { %6787 = vmatprep.mubr.msk.bf16.mxu0 %vm1244_vm1, %v7103_v34  ;;  %6936 = vmatmul.mubr.msk.bf16.gmra.mrb[28].mxu1 %vm1244_vm1, %v7102_v35  ;;  %v7167_v34 = vld [vmem:[%s7273_s22 + $0x180] sm:$0xff]   ;;  %v7166_v35 = vld [vmem:[%s7273_s22 + $0x3d8] sm:$0xff]  }
  0x4c   : > { %6939 = vmatprep.mubr.msk.bf16.mxu1 %vm1244_vm1, %v7105_v36  ;;  %v7169_v36 = vld [vmem:[%s7273_s22 + $0x3e0] sm:$0xff]  }
  0x52   : > { %6788 = vmatmul.mubr.msk.bf16.gmra.mrb[32].mxu0 %vm1244_vm1, %v7104_v37  ;;  %v7168_v37 = vld [vmem:[%s7273_s22 + $0x188] sm:$0xff]  }
  0x53   : > { %6791 = vmatprep.mubr.msk.bf16.mxu0 %vm1244_vm1, %v7107_v38  ;;  %6940 = vmatmul.mubr.msk.bf16.gmra.mrb[32].mxu1 %vm1244_vm1, %v7106_v39  ;;  %v7171_v38 = vld [vmem:[%s7273_s22 + $0x190] sm:$0xff]   ;;  %v7170_v39 = vld [vmem:[%s7273_s22 + $0x3e8] sm:$0xff]  }
  0x54   : > { %6943 = vmatprep.mubr.msk.bf16.mxu1 %vm1244_vm1, %v7109_v40  ;;  %v7173_v40 = vld [vmem:[%s7273_s22 + $0x3f0] sm:$0xff]  }
  0x5a   : > { %6792 = vmatmul.mubr.msk.bf16.gmra.mrb[36].mxu0 %vm1244_vm1, %v7108_v41  ;;  %v7172_v41 = vld [vmem:[%s7273_s22 + $0x198] sm:$0xff]  }
  0x5b   : > { %6795 = vmatprep.mubr.msk.bf16.mxu0 %vm1244_vm1, %v7111_v42  ;;  %6944 = vmatmul.mubr.msk.bf16.gmra.mrb[36].mxu1 %vm1244_vm1, %v7110_v43  ;;  %v7175_v42 = vld [vmem:[%s7273_s22 + $0x1a0] sm:$0xff]   ;;  %v7174_v43 = vld [vmem:[%s7273_s22 + $0x3f8] sm:$0xff]  }
  0x5c   : > { %6947 = vmatprep.mubr.msk.bf16.mxu1 %vm1244_vm1, %v7113_v44  ;;  %v7177_v44 = vld [vmem:[%s7273_s22 + $0x400] sm:$0xff]  }
  0x62   : > { %6796 = vmatmul.mubr.msk.bf16.gmra.mrb[40].mxu0 %vm1244_vm1, %v7112_v45  ;;  %v7176_v45 = vld [vmem:[%s7273_s22 + $0x1a8] sm:$0xff]  }
  0x63   : > { %6799 = vmatprep.mubr.msk.bf16.mxu0 %vm1244_vm1, %v7115_v46  ;;  %6948 = vmatmul.mubr.msk.bf16.gmra.mrb[40].mxu1 %vm1244_vm1, %v7114_v47  ;;  %v7179_v46 = vld [vmem:[%s7273_s22 + $0x1b0] sm:$0xff]   ;;  %v7178_v47 = vld [vmem:[%s7273_s22 + $0x408] sm:$0xff]  }
  0x64   : > { %6951 = vmatprep.mubr.msk.bf16.mxu1 %vm1244_vm1, %v7117_v48  ;;  %v7181_v48 = vld [vmem:[%s7273_s22 + $0x410] sm:$0xff]  }
  0x6a   : > { %6800 = vmatmul.mubr.msk.bf16.gmra.mrb[44].mxu0 %vm1244_vm1, %v7116_v49  ;;  %v7495_v49 = vld [vmem:[%s8052_s2] ss:$0 sm:$0xff] }
  0x6b   : > { %6803 = vmatprep.mubr.msk.bf16.mxu0 %vm1244_vm1, %v7119_v50  ;;  %6952 = vmatmul.mubr.msk.bf16.gmra.mrb[44].mxu1 %vm1244_vm1, %v7118_v51 }
  0x6c   : > { %6955 = vmatprep.mubr.msk.bf16.mxu1 %vm1244_vm1, %v7121_v52 }
  0x72   : > { %6804 = vmatmul.mubr.msk.bf16.gmra.mrb[48].mxu0 %vm1244_vm1, %v7120_v53  ;;  %v7180_v53 = vld [vmem:[%s7273_s22 + $0x1b8] sm:$0xff]  }
  0x73   : > { %6807 = vmatprep.mubr.msk.bf16.mxu0 %vm1244_vm1, %v7123_v54  ;;  %6956 = vmatmul.mubr.msk.bf16.gmra.mrb[48].mxu1 %vm1244_vm1, %v7122_v55 }
  0x74   : > { %6959 = vmatprep.mubr.msk.bf16.mxu1 %vm1244_vm1, %v7125_v56 }
  0x7a   : > { %6808 = vmatmul.mubr.msk.bf16.gmra.mrb[52].mxu0 %vm1244_vm1, %v7124_v57  ;;  %v7183_v57 = vld [vmem:[%s7273_s22 + $0x1c0] sm:$0xff]  }
  0x7b   : > { %6811 = vmatprep.mubr.msk.bf16.mxu0 %vm1244_vm1, %v7127_v58  ;;  %6960 = vmatmul.mubr.msk.bf16.gmra.mrb[52].mxu1 %vm1244_vm1, %v7126_v59 }
  0x7c   : > { %6963 = vmatprep.mubr.msk.bf16.mxu1 %vm1244_vm1, %v7129_v60 }
  0x82   : > { %6812 = vmatmul.mubr.msk.bf16.gmra.mrb[56].mxu0 %vm1244_vm1, %v7128_v61 }
  0x83   : > { %6815 = vmatprep.mubr.msk.bf16.mxu0 %vm1244_vm1, %v7131_v62  ;;  %6964 = vmatmul.mubr.msk.bf16.gmra.mrb[56].mxu1 %vm1244_vm1, %v7130_v63  ;;  %v7182_v62 = vld [vmem:[%s7273_s22 + $0x418] sm:$0xff]  }
  0x84   : > { %6967 = vmatprep.mubr.msk.bf16.mxu1 %vm1244_vm1, %v7133_v0 }
  0x8a   : > { %6816 = vmatmul.mubr.msk.bf16.gmra.mrb[60].mxu0 %vm1244_vm1, %v7132_v1 }
  0x8b   : > { %6819 = vmatprep.mubr.msk.bf16.mxu0 %vm1244_vm1, %v7135_v2  ;;  %6968 = vmatmul.mubr.msk.bf16.gmra.mrb[60].mxu1 %vm1244_vm1, %v7134_v3  ;;  %v7185_v2 = vld [vmem:[%s7273_s22 + $0x420] sm:$0xff]  }
  0x8c   : > { %6971 = vmatprep.mubr.msk.bf16.mxu1 %vm1244_vm1, %v7137_v4 }
  0x92   : > { %6820 = vmatmul.mubr.msk.bf16.gmra.mrb[64].mxu0 %vm1244_vm1, %v7136_v5 }
  0x93   : > { %6823 = vmatprep.mubr.msk.bf16.mxu0 %vm1244_vm1, %v7139_v6  ;;  %6972 = vmatmul.mubr.msk.bf16.gmra.mrb[64].mxu1 %vm1244_vm1, %v7138_v7 }
  0x94   : > { %6975 = vmatprep.mubr.msk.bf16.mxu1 %vm1244_vm1, %v7141_v8 }
  0x9a   : > { %6824 = vmatmul.mubr.msk.bf16.gmra.mrb[68].mxu0 %vm1244_vm1, %v7140_v9 }
  0x9b   : > { %6827 = vmatprep.mubr.msk.bf16.mxu0 %vm1244_vm1, %v7143_v11  ;;  %6976 = vmatmul.mubr.msk.bf16.gmra.mrb[68].mxu1 %vm1244_vm1, %v7142_v10 }
  0x9c   : > { %6979 = vmatprep.mubr.msk.bf16.mxu1 %vm1244_vm1, %v7145_v12 }
  0xa2   : > { %6828 = vmatmul.mubr.msk.bf16.gmra.mrb[72].mxu0 %vm1244_vm1, %v7144_v13 }
  0xa3   : > { %6831 = vmatprep.mubr.msk.bf16.mxu0 %vm1244_vm1, %v7147_v14  ;;  %6980 = vmatmul.mubr.msk.bf16.gmra.mrb[72].mxu1 %vm1244_vm1, %v7146_v15 }
  0xa4   : > { %6983 = vmatprep.mubr.msk.bf16.mxu1 %vm1244_vm1, %v7149_v16 }
  0xaa   : > { %6832 = vmatmul.mubr.msk.bf16.gmra.mrb[76].mxu0 %vm1244_vm1, %v7148_v17 }
  0xab   : > { %6835 = vmatprep.mubr.msk.bf16.mxu0 %vm1244_vm1, %v7151_v18  ;;  %6984 = vmatmul.mubr.msk.bf16.gmra.mrb[76].mxu1 %vm1244_vm1, %v7150_v19 }
  0xac   : > { %6987 = vmatprep.mubr.msk.bf16.mxu1 %vm1244_vm1, %v7153_v20  ;;  %v7184_v20 = vld [vmem:[%s7273_s22 + $0x1c8] sm:$0xff]  }
  0xb2   : > { %6836 = vmatmul.mubr.msk.bf16.gmra.mrb[80].mxu0 %vm1244_vm1, %v7152_v21 }
  0xb3   : > { %6839 = vmatprep.mubr.msk.bf16.mxu0 %vm1244_vm1, %v7155_v22  ;;  %6988 = vmatmul.mubr.msk.bf16.gmra.mrb[80].mxu1 %vm1244_vm1, %v7154_v23 }
  0xb4   : > { %6991 = vmatprep.mubr.msk.bf16.mxu1 %vm1244_vm1, %v7157_v24 }
  0xba   : > { %6840 = vmatmul.mubr.msk.bf16.gmra.mrb[84].mxu0 %vm1244_vm1, %v7156_v25  ;;  %v7187_v25 = vld [vmem:[%s7273_s22 + $0x1d0] sm:$0xff]  }
  0xbb   : > { %6843 = vmatprep.mubr.msk.bf16.mxu0 %vm1244_vm1, %v7159_v26  ;;  %6992 = vmatmul.mubr.msk.bf16.gmra.mrb[84].mxu1 %vm1244_vm1, %v7158_v27 }
  0xbc   : > { %6995 = vmatprep.mubr.msk.bf16.mxu1 %vm1244_vm1, %v7161_v28 }
  0xc2   : > { %6844 = vmatmul.mubr.msk.bf16.gmra.mrb[88].mxu0 %vm1244_vm1, %v7160_v29 }
  0xc3   : > { %6847 = vmatprep.mubr.msk.bf16.mxu0 %vm1244_vm1, %v7163_v30  ;;  %6996 = vmatmul.mubr.msk.bf16.gmra.mrb[88].mxu1 %vm1244_vm1, %v7162_v31  ;;  %v7186_v30 = vld [vmem:[%s7273_s22 + $0x428] sm:$0xff]  }
  0xc4   : > { %6999 = vmatprep.mubr.msk.bf16.mxu1 %vm1244_vm1, %v7165_v32 }
  0xca   : > { %6848 = vmatmul.mubr.msk.bf16.gmra.mrb[92].mxu0 %vm1244_vm1, %v7164_v33 }
  0xcb   : > { %6851 = vmatprep.mubr.msk.bf16.mxu0 %vm1244_vm1, %v7167_v34  ;;  %7000 = vmatmul.mubr.msk.bf16.gmra.mrb[92].mxu1 %vm1244_vm1, %v7166_v35  ;;  %v7189_v34 = vld [vmem:[%s7273_s22 + $0x430] sm:$0xff]  }
  0xcc   : > { %7003 = vmatprep.mubr.msk.bf16.mxu1 %vm1244_vm1, %v7169_v36 }
  0xd2   : > { %6852 = vmatmul.mubr.msk.bf16.gmra.mrb[96].mxu0 %vm1244_vm1, %v7168_v37 }
  0xd3   : > { %6855 = vmatprep.mubr.msk.bf16.mxu0 %vm1244_vm1, %v7171_v38  ;;  %7004 = vmatmul.mubr.msk.bf16.gmra.mrb[96].mxu1 %vm1244_vm1, %v7170_v39 }
  0xd4   : > { %7007 = vmatprep.mubr.msk.bf16.mxu1 %vm1244_vm1, %v7173_v40 }
  0xda   : > { %6856 = vmatmul.mubr.msk.bf16.gmra.mrb[100].mxu0 %vm1244_vm1, %v7172_v41 }
  0xdb   : > { %6859 = vmatprep.mubr.msk.bf16.mxu0 %vm1244_vm1, %v7175_v42  ;;  %7008 = vmatmul.mubr.msk.bf16.gmra.mrb[100].mxu1 %vm1244_vm1, %v7174_v43 }
  0xdc   : > { %7011 = vmatprep.mubr.msk.bf16.mxu1 %vm1244_vm1, %v7177_v44 }
  0xe2   : > { %6860 = vmatmul.mubr.msk.bf16.gmra.mrb[104].mxu0 %vm1244_vm1, %v7176_v45 }
  0xe3   : > { %6863 = vmatprep.mubr.msk.bf16.mxu0 %vm1244_vm1, %v7179_v46  ;;  %7012 = vmatmul.mubr.msk.bf16.gmra.mrb[104].mxu1 %vm1244_vm1, %v7178_v47 }
  0xe4   : > { %7015 = vmatprep.mubr.msk.bf16.mxu1 %vm1244_vm1, %v7181_v48 }
  0xe5   : > { %v6757_v50 = vpop.f32.mrb[0].mxu0 }
  0xe6   : > { %v1742_v51 = vadd.f32 %v6757_v50, %v7495_v49  ;;  %v1733_v52 = vpop.f32.mrb[1].mxu0  ;;  %v6909_v56 = vpop.f32.mrb[0].mxu1 }
  0xe7   : > { %v1734_v54 = vadd.f32 %v7495_v49, %v1733_v52  ;;  %v6758_v55 = vpop.f32.mrb[2].mxu0  ;;  %v2350_v60 = vadd.f32 %v6909_v56, %v7495_v49  ;;  %v2341_v61 = vpop.f32.mrb[1].mxu1 }
  0xe8   : > { %v1745_v58 = vadd.f32 %v6758_v55, %v7495_v49  ;;  %v1736_v59 = vpop.f32.mrb[3].mxu0  ;;  %v2342_v0 = vadd.f32 %v7495_v49, %v2341_v61  ;;  %v6910_v1 = vpop.f32.mrb[2].mxu1  ;;  %v2934_v3 = vmax.f32 %v1742_v51, 0.0 }
  0xe9   : > { %v1737_v63 = vadd.f32 %v7495_v49, %v1736_v59  ;;  %v3086_v5 = vmax.f32 %v2350_v60, 0.0  ;;  %v2353_v6 = vadd.f32 %v6910_v1, %v7495_v49  ;;  %v2344_v7 = vpop.f32.mrb[3].mxu1  ;;  %v2932_v8 = vmax.f32 %v1734_v54, 0.0 }
  0xea   : > { %v2935_v4 = vmax.f32 %v1745_v58, 0.0  ;;  %6864 = vmatmul.mubr.msk.bf16.gmra.mrb[108].mxu0 %vm1244_vm1, %v7180_v53  ;;  %v3084_v10 = vmax.f32 %v2342_v0, 0.0  ;;  %v2345_v11 = vadd.f32 %v7495_v49, %v2344_v7  ;;  %v7188_v53 = vld [vmem:[%s7273_s22 + $0x1d8] sm:$0xff]   ;;  %v7191_v58 = vld [vmem:[%s7273_s22 + $0x1e0] sm:$0xff]  }
  0xeb   : > { %v2933_v9 = vmax.f32 %v1737_v63, 0.0  ;;  %6867 = vmatprep.mubr.msk.bf16.mxu0 %vm1244_vm1, %v7183_v57  ;;  %v3087_v13 = vmax.f32 %v2353_v6, 0.0  ;;  %7016 = vmatmul.mubr.msk.bf16.gmra.mrb[108].mxu1 %vm1244_vm1, %v7182_v62  ;;  %v7190_v63 = vld [vmem:[%s7273_s22 + $0x438] sm:$0xff]  }
  0xec   : > { %v5708_v12 = vpack.c.bf16 %v2935_v4, %v2934_v3  ;;  %v3085_v16 = vmax.f32 %v2345_v11, 0.0  ;;  %7019 = vmatprep.mubr.msk.bf16.mxu1 %vm1244_vm1, %v7185_v2  ;;  %v7193_v3 = vld [vmem:[%s7273_s22 + $0x440] sm:$0xff]  }
  0xed   : > { %v5703_v14 = vpack.c.bf16 %v2933_v9, %v2932_v8  ;;  %v6761_v15 = vpop.f32.mrb[4].mxu0  ;;  %v6088_v17 = vpack.c.bf16 %v3087_v13, %v3086_v5 }
  0xee   : > { %6450 = vst [vmem:[%s7517_s27 + $0x8] sm:$0xff] %v5708_v12   ;;  %v1758_v18 = vadd.f32 %v6761_v15, %v7495_v49  ;;  %v1749_v19 = vpop.f32.mrb[5].mxu0  ;;  %v6083_v21 = vpack.c.bf16 %v3085_v16, %v3084_v10  ;;  %v6913_v24 = vpop.f32.mrb[4].mxu1 }
  0xef   : > { %5704 = vst [vmem:[%s7517_s27] sm:$0xff] %v5703_v14   ;;  %v1750_v22 = vadd.f32 %v7495_v49, %v1749_v19  ;;  %v6762_v23 = vpop.f32.mrb[6].mxu0  ;;  %6526 = vst [vmem:[%s7517_s27 + $0x268] sm:$0xff] %v6088_v17   ;;  %v2366_v28 = vadd.f32 %v6913_v24, %v7495_v49  ;;  %v2357_v29 = vpop.f32.mrb[5].mxu1 }
  0xf0   : > { %v1761_v26 = vadd.f32 %v6762_v23, %v7495_v49  ;;  %v1752_v27 = vpop.f32.mrb[7].mxu0  ;;  %6525 = vst [vmem:[%s7517_s27 + $0x260] sm:$0xff] %v6083_v21   ;;  %v2358_v32 = vadd.f32 %v7495_v49, %v2357_v29  ;;  %v6914_v33 = vpop.f32.mrb[6].mxu1  ;;  %v2938_v35 = vmax.f32 %v1758_v18, 0.0  ;;  %v7192_v21 = vld [vmem:[%s7273_s22 + $0x1e8] sm:$0xff]  }
  0xf1   : > { %v1753_v31 = vadd.f32 %v7495_v49, %v1752_v27  ;;  %v3090_v37 = vmax.f32 %v2366_v28, 0.0  ;;  %v2369_v38 = vadd.f32 %v6914_v33, %v7495_v49  ;;  %v2360_v39 = vpop.f32.mrb[7].mxu1  ;;  %v2936_v40 = vmax.f32 %v1750_v22, 0.0 }
  0xf2   : > { %v2939_v36 = vmax.f32 %v1761_v26, 0.0  ;;  %6868 = vmatmul.mubr.msk.bf16.gmra.mrb[112].mxu0 %vm1244_vm1, %v7184_v20  ;;  %v3088_v42 = vmax.f32 %v2358_v32, 0.0  ;;  %v2361_v43 = vadd.f32 %v7495_v49, %v2360_v39  ;;  %v7195_v26 = vld [vmem:[%s7273_s22 + $0x1f0] sm:$0xff]  }
  0xf3   : > { %v2937_v41 = vmax.f32 %v1753_v31, 0.0  ;;  %6871 = vmatprep.mubr.msk.bf16.mxu0 %vm1244_vm1, %v7187_v25  ;;  %v3091_v45 = vmax.f32 %v2369_v38, 0.0  ;;  %7020 = vmatmul.mubr.msk.bf16.gmra.mrb[112].mxu1 %vm1244_vm1, %v7186_v30  ;;  %v7194_v31 = vld [vmem:[%s7273_s22 + $0x448] sm:$0xff]  }
  0xf4   : > { %v5718_v44 = vpack.c.bf16 %v2939_v36, %v2938_v35  ;;  %v3089_v48 = vmax.f32 %v2361_v43, 0.0  ;;  %7023 = vmatprep.mubr.msk.bf16.mxu1 %vm1244_vm1, %v7189_v34  ;;  %v7197_v35 = vld [vmem:[%s7273_s22 + $0x450] sm:$0xff]  }
  0xf5   : > { %v5713_v46 = vpack.c.bf16 %v2937_v41, %v2936_v40  ;;  %v6765_v47 = vpop.f32.mrb[8].mxu0  ;;  %v6098_v50 = vpack.c.bf16 %v3091_v45, %v3090_v37 }
  0xf6   : > { %6452 = vst [vmem:[%s7517_s27 + $0x18] sm:$0xff] %v5718_v44   ;;  %v1774_v51 = vadd.f32 %v6765_v47, %v7495_v49  ;;  %v1765_v52 = vpop.f32.mrb[9].mxu0  ;;  %v6093_v54 = vpack.c.bf16 %v3089_v48, %v3088_v42  ;;  %v6917_v57 = vpop.f32.mrb[8].mxu1 }
  0xf7   : > { %6451 = vst [vmem:[%s7517_s27 + $0x10] sm:$0xff] %v5713_v46   ;;  %v1766_v55 = vadd.f32 %v7495_v49, %v1765_v52  ;;  %v6766_v56 = vpop.f32.mrb[10].mxu0  ;;  %6528 = vst [vmem:[%s7517_s27 + $0x278] sm:$0xff] %v6098_v50   ;;  %v2382_v61 = vadd.f32 %v6917_v57, %v7495_v49  ;;  %v2373_v62 = vpop.f32.mrb[9].mxu1 }
  0xf8   : > { %v1777_v59 = vadd.f32 %v6766_v56, %v7495_v49  ;;  %v1768_v60 = vpop.f32.mrb[11].mxu0  ;;  %6527 = vst [vmem:[%s7517_s27 + $0x270] sm:$0xff] %v6093_v54   ;;  %v2374_v1 = vadd.f32 %v7495_v49, %v2373_v62  ;;  %v6918_v2 = vpop.f32.mrb[10].mxu1  ;;  %v2942_v4 = vmax.f32 %v1774_v51, 0.0  ;;  %v7196_v54 = vld [vmem:[%s7273_s22 + $0x1f8] sm:$0xff]  }
  0xf9   : > { %v1769_v0 = vadd.f32 %v7495_v49, %v1768_v60  ;;  %v3094_v6 = vmax.f32 %v2382_v61, 0.0  ;;  %v2385_v7 = vadd.f32 %v6918_v2, %v7495_v49  ;;  %v2376_v8 = vpop.f32.mrb[11].mxu1  ;;  %v2940_v9 = vmax.f32 %v1766_v55, 0.0 }
  0xfa   : > { %v2943_v5 = vmax.f32 %v1777_v59, 0.0  ;;  %6872 = vmatmul.mubr.msk.bf16.gmra.mrb[116].mxu0 %vm1244_vm1, %v7188_v53  ;;  %v3092_v11 = vmax.f32 %v2374_v1, 0.0  ;;  %v2377_v12 = vadd.f32 %v7495_v49, %v2376_v8  ;;  %v7199_v59 = vld [vmem:[%s7273_s22 + $0x200] sm:$0xff]  }
  0xfb   : > { %v2941_v10 = vmax.f32 %v1769_v0, 0.0  ;;  %6875 = vmatprep.mubr.msk.bf16.mxu0 %vm1244_vm1, %v7191_v58  ;;  %v3095_v14 = vmax.f32 %v2385_v7, 0.0  ;;  %7024 = vmatmul.mubr.msk.bf16.gmra.mrb[116].mxu1 %vm1244_vm1, %v7190_v63  ;;  %v7198_v0 = vld [vmem:[%s7273_s22 + $0x458] sm:$0xff]  }
  0xfc   : > { %v5728_v13 = vpack.c.bf16 %v2943_v5, %v2942_v4  ;;  %v3093_v17 = vmax.f32 %v2377_v12, 0.0  ;;  %7027 = vmatprep.mubr.msk.bf16.mxu1 %vm1244_vm1, %v7193_v3  ;;  %v7201_v4 = vld [vmem:[%s7273_s22 + $0x460] sm:$0xff]  }
  0xfd   : > { %v5723_v15 = vpack.c.bf16 %v2941_v10, %v2940_v9  ;;  %v6769_v16 = vpop.f32.mrb[12].mxu0  ;;  %v6108_v18 = vpack.c.bf16 %v3095_v14, %v3094_v6 }
  0xfe   : > { %6454 = vst [vmem:[%s7517_s27 + $0x28] sm:$0xff] %v5728_v13   ;;  %v1790_v19 = vadd.f32 %v6769_v16, %v7495_v49  ;;  %v1781_v20 = vpop.f32.mrb[13].mxu0  ;;  %v6103_v22 = vpack.c.bf16 %v3093_v17, %v3092_v11  ;;  %v6921_v25 = vpop.f32.mrb[12].mxu1 }
  0xff   : > { %6453 = vst [vmem:[%s7517_s27 + $0x20] sm:$0xff] %v5723_v15   ;;  %v1782_v23 = vadd.f32 %v7495_v49, %v1781_v20  ;;  %v6770_v24 = vpop.f32.mrb[14].mxu0  ;;  %6530 = vst [vmem:[%s7517_s27 + $0x288] sm:$0xff] %v6108_v18   ;;  %v2398_v29 = vadd.f32 %v6921_v25, %v7495_v49  ;;  %v2389_v30 = vpop.f32.mrb[13].mxu1 }
 0x100   : > { %v1793_v27 = vadd.f32 %v6770_v24, %v7495_v49  ;;  %v1784_v28 = vpop.f32.mrb[15].mxu0  ;;  %6529 = vst [vmem:[%s7517_s27 + $0x280] sm:$0xff] %v6103_v22   ;;  %v2390_v33 = vadd.f32 %v7495_v49, %v2389_v30  ;;  %v6922_v34 = vpop.f32.mrb[14].mxu1  ;;  %v2946_v36 = vmax.f32 %v1790_v19, 0.0  ;;  %v7200_v22 = vld [vmem:[%s7273_s22 + $0x208] sm:$0xff]  }
 0x101   : > { %v1785_v32 = vadd.f32 %v7495_v49, %v1784_v28  ;;  %v3098_v38 = vmax.f32 %v2398_v29, 0.0  ;;  %v2401_v39 = vadd.f32 %v6922_v34, %v7495_v49  ;;  %v2392_v40 = vpop.f32.mrb[15].mxu1  ;;  %v2944_v41 = vmax.f32 %v1782_v23, 0.0 }
 0x102   : > { %v2947_v37 = vmax.f32 %v1793_v27, 0.0  ;;  %6876 = vmatmul.mubr.msk.bf16.gmra.mrb[120].mxu0 %vm1244_vm1, %v7192_v21  ;;  %v3096_v43 = vmax.f32 %v2390_v33, 0.0  ;;  %v2393_v44 = vadd.f32 %v7495_v49, %v2392_v40  ;;  %v7203_v27 = vld [vmem:[%s7273_s22 + $0x210] sm:$0xff]  }
 0x103   : > { %v2945_v42 = vmax.f32 %v1785_v32, 0.0  ;;  %6879 = vmatprep.mubr.msk.bf16.mxu0 %vm1244_vm1, %v7195_v26  ;;  %v3099_v46 = vmax.f32 %v2401_v39, 0.0  ;;  %7028 = vmatmul.mubr.msk.bf16.gmra.mrb[120].mxu1 %vm1244_vm1, %v7194_v31  ;;  %v7202_v32 = vld [vmem:[%s7273_s22 + $0x468] sm:$0xff]  }
 0x104   : > { %v5738_v45 = vpack.c.bf16 %v2947_v37, %v2946_v36  ;;  %v3097_v50 = vmax.f32 %v2393_v44, 0.0  ;;  %7031 = vmatprep.mubr.msk.bf16.mxu1 %vm1244_vm1, %v7197_v35  ;;  %v7205_v36 = vld [vmem:[%s7273_s22 + $0x470] sm:$0xff]  }
 0x105   : > { %v5733_v47 = vpack.c.bf16 %v2945_v42, %v2944_v41  ;;  %v6773_v48 = vpop.f32.mrb[16].mxu0  ;;  %v6118_v51 = vpack.c.bf16 %v3099_v46, %v3098_v38 }
 0x106   : > { %6456 = vst [vmem:[%s7517_s27 + $0x38] sm:$0xff] %v5738_v45   ;;  %v1806_v52 = vadd.f32 %v6773_v48, %v7495_v49  ;;  %v1797_v53 = vpop.f32.mrb[17].mxu0  ;;  %v6113_v55 = vpack.c.bf16 %v3097_v50, %v3096_v43  ;;  %v6925_v58 = vpop.f32.mrb[16].mxu1 }
 0x107   : > { %6455 = vst [vmem:[%s7517_s27 + $0x30] sm:$0xff] %v5733_v47   ;;  %v1798_v56 = vadd.f32 %v7495_v49, %v1797_v53  ;;  %v6774_v57 = vpop.f32.mrb[18].mxu0  ;;  %6532 = vst [vmem:[%s7517_s27 + $0x298] sm:$0xff] %v6118_v51   ;;  %v2414_v62 = vadd.f32 %v6925_v58, %v7495_v49  ;;  %v2405_v63 = vpop.f32.mrb[17].mxu1 }
 0x108   : > { %v1809_v60 = vadd.f32 %v6774_v57, %v7495_v49  ;;  %v1800_v61 = vpop.f32.mrb[19].mxu0  ;;  %6531 = vst [vmem:[%s7517_s27 + $0x290] sm:$0xff] %v6113_v55   ;;  %v2406_v2 = vadd.f32 %v7495_v49, %v2405_v63  ;;  %v6926_v3 = vpop.f32.mrb[18].mxu1  ;;  %v2950_v5 = vmax.f32 %v1806_v52, 0.0  ;;  %v7204_v55 = vld [vmem:[%s7273_s22 + $0x218] sm:$0xff]  }
 0x109   : > { %v1801_v1 = vadd.f32 %v7495_v49, %v1800_v61  ;;  %v3102_v7 = vmax.f32 %v2414_v62, 0.0  ;;  %v2417_v8 = vadd.f32 %v6926_v3, %v7495_v49  ;;  %v2408_v9 = vpop.f32.mrb[19].mxu1  ;;  %v2948_v10 = vmax.f32 %v1798_v56, 0.0 }
 0x10a   : > { %v2951_v6 = vmax.f32 %v1809_v60, 0.0  ;;  %6880 = vmatmul.mubr.msk.bf16.gmra.mrb[124].mxu0 %vm1244_vm1, %v7196_v54  ;;  %v3100_v12 = vmax.f32 %v2406_v2, 0.0  ;;  %v2409_v13 = vadd.f32 %v7495_v49, %v2408_v9  ;;  %v7207_v60 = vld [vmem:[%s7273_s22 + $0x220] sm:$0xff]  }
 0x10b   : > { %v2949_v11 = vmax.f32 %v1801_v1, 0.0  ;;  %6883 = vmatprep.mubr.msk.bf16.mxu0 %vm1244_vm1, %v7199_v59  ;;  %v3103_v15 = vmax.f32 %v2417_v8, 0.0  ;;  %7032 = vmatmul.mubr.msk.bf16.gmra.mrb[124].mxu1 %vm1244_vm1, %v7198_v0  ;;  %v7206_v1 = vld [vmem:[%s7273_s22 + $0x478] sm:$0xff]  }
 0x10c   : > { %v5748_v14 = vpack.c.bf16 %v2951_v6, %v2950_v5  ;;  %v3101_v18 = vmax.f32 %v2409_v13, 0.0  ;;  %7035 = vmatprep.mubr.msk.bf16.mxu1 %vm1244_vm1, %v7201_v4  ;;  %v7209_v5 = vld [vmem:[%s7273_s22 + $0x480] sm:$0xff]  }
 0x10d   : > { %v5743_v16 = vpack.c.bf16 %v2949_v11, %v2948_v10  ;;  %v6777_v17 = vpop.f32.mrb[20].mxu0  ;;  %v6128_v19 = vpack.c.bf16 %v3103_v15, %v3102_v7 }
 0x10e   : > { %6458 = vst [vmem:[%s7517_s27 + $0x48] sm:$0xff] %v5748_v14   ;;  %v1822_v20 = vadd.f32 %v6777_v17, %v7495_v49  ;;  %v1813_v21 = vpop.f32.mrb[21].mxu0  ;;  %v6123_v23 = vpack.c.bf16 %v3101_v18, %v3100_v12  ;;  %v6929_v26 = vpop.f32.mrb[20].mxu1 }
 0x10f   : > { %6457 = vst [vmem:[%s7517_s27 + $0x40] sm:$0xff] %v5743_v16   ;;  %v1814_v24 = vadd.f32 %v7495_v49, %v1813_v21  ;;  %v6778_v25 = vpop.f32.mrb[22].mxu0  ;;  %6534 = vst [vmem:[%s7517_s27 + $0x2a8] sm:$0xff] %v6128_v19   ;;  %v2430_v30 = vadd.f32 %v6929_v26, %v7495_v49  ;;  %v2421_v31 = vpop.f32.mrb[21].mxu1 }
 0x110   : > { %v1825_v28 = vadd.f32 %v6778_v25, %v7495_v49  ;;  %v1816_v29 = vpop.f32.mrb[23].mxu0  ;;  %6533 = vst [vmem:[%s7517_s27 + $0x2a0] sm:$0xff] %v6123_v23   ;;  %v2422_v34 = vadd.f32 %v7495_v49, %v2421_v31  ;;  %v6930_v35 = vpop.f32.mrb[22].mxu1  ;;  %v2954_v37 = vmax.f32 %v1822_v20, 0.0  ;;  %v7208_v23 = vld [vmem:[%s7273_s22 + $0x228] sm:$0xff]  }
 0x111   : > { %v1817_v33 = vadd.f32 %v7495_v49, %v1816_v29  ;;  %v3106_v39 = vmax.f32 %v2430_v30, 0.0  ;;  %v2433_v40 = vadd.f32 %v6930_v35, %v7495_v49  ;;  %v2424_v41 = vpop.f32.mrb[23].mxu1  ;;  %v2952_v42 = vmax.f32 %v1814_v24, 0.0 }
 0x112   : > { %v2955_v38 = vmax.f32 %v1825_v28, 0.0  ;;  %6884 = vmatmul.mubr.msk.bf16.gmra.mrb[128].mxu0 %vm1244_vm1, %v7200_v22  ;;  %v3104_v44 = vmax.f32 %v2422_v34, 0.0  ;;  %v2425_v45 = vadd.f32 %v7495_v49, %v2424_v41  ;;  %v7211_v28 = vld [vmem:[%s7273_s22 + $0x230] sm:$0xff]  }
 0x113   : > { %v2953_v43 = vmax.f32 %v1817_v33, 0.0  ;;  %6887 = vmatprep.mubr.msk.bf16.mxu0 %vm1244_vm1, %v7203_v27  ;;  %v3107_v47 = vmax.f32 %v2433_v40, 0.0  ;;  %7036 = vmatmul.mubr.msk.bf16.gmra.mrb[128].mxu1 %vm1244_vm1, %v7202_v32  ;;  %v7210_v33 = vld [vmem:[%s7273_s22 + $0x488] sm:$0xff]  }
 0x114   : > { %v5758_v46 = vpack.c.bf16 %v2955_v38, %v2954_v37  ;;  %v3105_v51 = vmax.f32 %v2425_v45, 0.0  ;;  %7039 = vmatprep.mubr.msk.bf16.mxu1 %vm1244_vm1, %v7205_v36  ;;  %v7213_v37 = vld [vmem:[%s7273_s22 + $0x490] sm:$0xff]  }
 0x115   : > { %v5753_v48 = vpack.c.bf16 %v2953_v43, %v2952_v42  ;;  %v6781_v50 = vpop.f32.mrb[24].mxu0  ;;  %v6138_v52 = vpack.c.bf16 %v3107_v47, %v3106_v39 }
 0x116   : > { %6460 = vst [vmem:[%s7517_s27 + $0x58] sm:$0xff] %v5758_v46   ;;  %v1838_v53 = vadd.f32 %v6781_v50, %v7495_v49  ;;  %v1829_v54 = vpop.f32.mrb[25].mxu0  ;;  %v6133_v56 = vpack.c.bf16 %v3105_v51, %v3104_v44  ;;  %v6933_v59 = vpop.f32.mrb[24].mxu1 }
 0x117   : > { %6459 = vst [vmem:[%s7517_s27 + $0x50] sm:$0xff] %v5753_v48   ;;  %v1830_v57 = vadd.f32 %v7495_v49, %v1829_v54  ;;  %v6782_v58 = vpop.f32.mrb[26].mxu0  ;;  %6536 = vst [vmem:[%s7517_s27 + $0x2b8] sm:$0xff] %v6138_v52   ;;  %v2446_v63 = vadd.f32 %v6933_v59, %v7495_v49  ;;  %v2437_v0 = vpop.f32.mrb[25].mxu1 }
 0x118   : > { %v1841_v61 = vadd.f32 %v6782_v58, %v7495_v49  ;;  %v1832_v62 = vpop.f32.mrb[27].mxu0  ;;  %6535 = vst [vmem:[%s7517_s27 + $0x2b0] sm:$0xff] %v6133_v56   ;;  %v2438_v3 = vadd.f32 %v7495_v49, %v2437_v0  ;;  %v6934_v4 = vpop.f32.mrb[26].mxu1  ;;  %v2958_v6 = vmax.f32 %v1838_v53, 0.0  ;;  %v7212_v56 = vld [vmem:[%s7273_s22 + $0x238] sm:$0xff]  }
 0x119   : > { %v1833_v2 = vadd.f32 %v7495_v49, %v1832_v62  ;;  %v3110_v8 = vmax.f32 %v2446_v63, 0.0  ;;  %v2449_v9 = vadd.f32 %v6934_v4, %v7495_v49  ;;  %v2440_v10 = vpop.f32.mrb[27].mxu1  ;;  %v2956_v11 = vmax.f32 %v1830_v57, 0.0 }
 0x11a   : > { %v2959_v7 = vmax.f32 %v1841_v61, 0.0  ;;  %6888 = vmatmul.mubr.msk.bf16.gmra.mrb[132].mxu0 %vm1244_vm1, %v7204_v55  ;;  %v3108_v13 = vmax.f32 %v2438_v3, 0.0  ;;  %v2441_v14 = vadd.f32 %v7495_v49, %v2440_v10  ;;  %v7215_v61 = vld [vmem:[%s7273_s22 + $0x240] sm:$0xff]  }
 0x11b   : > { %v2957_v12 = vmax.f32 %v1833_v2, 0.0  ;;  %6891 = vmatprep.mubr.msk.bf16.mxu0 %vm1244_vm1, %v7207_v60  ;;  %v3111_v16 = vmax.f32 %v2449_v9, 0.0  ;;  %7040 = vmatmul.mubr.msk.bf16.gmra.mrb[132].mxu1 %vm1244_vm1, %v7206_v1  ;;  %v7214_v2 = vld [vmem:[%s7273_s22 + $0x498] sm:$0xff]  }
 0x11c   : > { %v5768_v15 = vpack.c.bf16 %v2959_v7, %v2958_v6  ;;  %v3109_v19 = vmax.f32 %v2441_v14, 0.0  ;;  %7043 = vmatprep.mubr.msk.bf16.mxu1 %vm1244_vm1, %v7209_v5  ;;  %v7217_v6 = vld [vmem:[%s7273_s22 + $0x4a0] sm:$0xff]  }
 0x11d   : > { %v5763_v17 = vpack.c.bf16 %v2957_v12, %v2956_v11  ;;  %v6785_v18 = vpop.f32.mrb[28].mxu0  ;;  %v6148_v20 = vpack.c.bf16 %v3111_v16, %v3110_v8 }
 0x11e   : > { %6462 = vst [vmem:[%s7517_s27 + $0x68] sm:$0xff] %v5768_v15   ;;  %v1854_v21 = vadd.f32 %v6785_v18, %v7495_v49  ;;  %v1845_v22 = vpop.f32.mrb[29].mxu0  ;;  %v6143_v24 = vpack.c.bf16 %v3109_v19, %v3108_v13  ;;  %v6937_v27 = vpop.f32.mrb[28].mxu1 }
 0x11f   : > { %6461 = vst [vmem:[%s7517_s27 + $0x60] sm:$0xff] %v5763_v17   ;;  %v1846_v25 = vadd.f32 %v7495_v49, %v1845_v22  ;;  %v6786_v26 = vpop.f32.mrb[30].mxu0  ;;  %6538 = vst [vmem:[%s7517_s27 + $0x2c8] sm:$0xff] %v6148_v20   ;;  %v2462_v31 = vadd.f32 %v6937_v27, %v7495_v49  ;;  %v2453_v32 = vpop.f32.mrb[29].mxu1 }
 0x120   : > { %v1857_v29 = vadd.f32 %v6786_v26, %v7495_v49  ;;  %v1848_v30 = vpop.f32.mrb[31].mxu0  ;;  %6537 = vst [vmem:[%s7517_s27 + $0x2c0] sm:$0xff] %v6143_v24   ;;  %v2454_v35 = vadd.f32 %v7495_v49, %v2453_v32  ;;  %v6938_v36 = vpop.f32.mrb[30].mxu1  ;;  %v2962_v38 = vmax.f32 %v1854_v21, 0.0  ;;  %v7216_v24 = vld [vmem:[%s7273_s22 + $0x248] sm:$0xff]  }
 0x121   : > { %v1849_v34 = vadd.f32 %v7495_v49, %v1848_v30  ;;  %v3114_v40 = vmax.f32 %v2462_v31, 0.0  ;;  %v2465_v41 = vadd.f32 %v6938_v36, %v7495_v49  ;;  %v2456_v42 = vpop.f32.mrb[31].mxu1  ;;  %v2960_v43 = vmax.f32 %v1846_v25, 0.0 }
 0x122   : > { %v2963_v39 = vmax.f32 %v1857_v29, 0.0  ;;  %6892 = vmatmul.mubr.msk.bf16.gmra.mrb[136].mxu0 %vm1244_vm1, %v7208_v23  ;;  %v3112_v45 = vmax.f32 %v2454_v35, 0.0  ;;  %v2457_v46 = vadd.f32 %v7495_v49, %v2456_v42  ;;  %v7219_v29 = vld [vmem:[%s7273_s22 + $0x250] sm:$0xff]  }
 0x123   : > { %v2961_v44 = vmax.f32 %v1849_v34, 0.0  ;;  %6895 = vmatprep.mubr.msk.bf16.mxu0 %vm1244_vm1, %v7211_v28  ;;  %v3115_v48 = vmax.f32 %v2465_v41, 0.0  ;;  %7044 = vmatmul.mubr.msk.bf16.gmra.mrb[136].mxu1 %vm1244_vm1, %v7210_v33  ;;  %v7218_v34 = vld [vmem:[%s7273_s22 + $0x4a8] sm:$0xff]  }
 0x124   : > { %v5778_v47 = vpack.c.bf16 %v2963_v39, %v2962_v38  ;;  %v3113_v52 = vmax.f32 %v2457_v46, 0.0  ;;  %7047 = vmatprep.mubr.msk.bf16.mxu1 %vm1244_vm1, %v7213_v37 }
 0x125   : > { %v5773_v50 = vpack.c.bf16 %v2961_v44, %v2960_v43  ;;  %v6789_v51 = vpop.f32.mrb[32].mxu0  ;;  %v6158_v53 = vpack.c.bf16 %v3115_v48, %v3114_v40 }
 0x126   : > { %6464 = vst [vmem:[%s7517_s27 + $0x78] sm:$0xff] %v5778_v47   ;;  %v1870_v54 = vadd.f32 %v6789_v51, %v7495_v49  ;;  %v1861_v55 = vpop.f32.mrb[33].mxu0  ;;  %v6153_v57 = vpack.c.bf16 %v3113_v52, %v3112_v45  ;;  %v6941_v60 = vpop.f32.mrb[32].mxu1 }
 0x127   : > { %6463 = vst [vmem:[%s7517_s27 + $0x70] sm:$0xff] %v5773_v50   ;;  %v1862_v58 = vadd.f32 %v7495_v49, %v1861_v55  ;;  %v6790_v59 = vpop.f32.mrb[34].mxu0  ;;  %6540 = vst [vmem:[%s7517_s27 + $0x2d8] sm:$0xff] %v6158_v53   ;;  %v2478_v0 = vadd.f32 %v6941_v60, %v7495_v49  ;;  %v2469_v1 = vpop.f32.mrb[33].mxu1 }
 0x128   : > { %v1873_v62 = vadd.f32 %v6790_v59, %v7495_v49  ;;  %v1864_v63 = vpop.f32.mrb[35].mxu0  ;;  %6539 = vst [vmem:[%s7517_s27 + $0x2d0] sm:$0xff] %v6153_v57   ;;  %v2470_v4 = vadd.f32 %v7495_v49, %v2469_v1  ;;  %v6942_v5 = vpop.f32.mrb[34].mxu1  ;;  %v2966_v7 = vmax.f32 %v1870_v54, 0.0 }
 0x129   : > { %v1865_v3 = vadd.f32 %v7495_v49, %v1864_v63  ;;  %v3118_v9 = vmax.f32 %v2478_v0, 0.0  ;;  %v2481_v10 = vadd.f32 %v6942_v5, %v7495_v49  ;;  %v2472_v11 = vpop.f32.mrb[35].mxu1  ;;  %v2964_v12 = vmax.f32 %v1862_v58, 0.0 }
 0x12a   : > { %v2967_v8 = vmax.f32 %v1873_v62, 0.0  ;;  %6896 = vmatmul.mubr.msk.bf16.gmra.mrb[140].mxu0 %vm1244_vm1, %v7212_v56  ;;  %v3116_v14 = vmax.f32 %v2470_v4, 0.0  ;;  %v2473_v15 = vadd.f32 %v7495_v49, %v2472_v11  ;;  %v7220_v56 = vld [vmem:[%s7273_s22 + $0x258] sm:$0xff]  }
 0x12b   : > { %v2965_v13 = vmax.f32 %v1865_v3, 0.0  ;;  %6899 = vmatprep.mubr.msk.bf16.mxu0 %vm1244_vm1, %v7215_v61  ;;  %v3119_v17 = vmax.f32 %v2481_v10, 0.0  ;;  %7048 = vmatmul.mubr.msk.bf16.gmra.mrb[140].mxu1 %vm1244_vm1, %v7214_v2 }
 0x12c   : > { %v5788_v16 = vpack.c.bf16 %v2967_v8, %v2966_v7  ;;  %v3117_v20 = vmax.f32 %v2473_v15, 0.0  ;;  %7051 = vmatprep.mubr.msk.bf16.mxu1 %vm1244_vm1, %v7217_v6 }
 0x12d   : > { %v5783_v18 = vpack.c.bf16 %v2965_v13, %v2964_v12  ;;  %v6793_v19 = vpop.f32.mrb[36].mxu0  ;;  %v6168_v21 = vpack.c.bf16 %v3119_v17, %v3118_v9 }
 0x12e   : > { %6466 = vst [vmem:[%s7517_s27 + $0x88] sm:$0xff] %v5788_v16   ;;  %v1886_v22 = vadd.f32 %v6793_v19, %v7495_v49  ;;  %v1877_v23 = vpop.f32.mrb[37].mxu0  ;;  %v6163_v25 = vpack.c.bf16 %v3117_v20, %v3116_v14  ;;  %v6945_v28 = vpop.f32.mrb[36].mxu1 }
 0x12f   : > { %6465 = vst [vmem:[%s7517_s27 + $0x80] sm:$0xff] %v5783_v18   ;;  %v1878_v26 = vadd.f32 %v7495_v49, %v1877_v23  ;;  %v6794_v27 = vpop.f32.mrb[38].mxu0  ;;  %6542 = vst [vmem:[%s7517_s27 + $0x2e8] sm:$0xff] %v6168_v21   ;;  %v2494_v32 = vadd.f32 %v6945_v28, %v7495_v49  ;;  %v2485_v33 = vpop.f32.mrb[37].mxu1 }
 0x130   : > { %v1889_v30 = vadd.f32 %v6794_v27, %v7495_v49  ;;  %v1880_v31 = vpop.f32.mrb[39].mxu0  ;;  %6541 = vst [vmem:[%s7517_s27 + $0x2e0] sm:$0xff] %v6163_v25   ;;  %v2486_v36 = vadd.f32 %v7495_v49, %v2485_v33  ;;  %v6946_v37 = vpop.f32.mrb[38].mxu1  ;;  %v2970_v38 = vmax.f32 %v1886_v22, 0.0 }
 0x131   : > { %v1881_v35 = vadd.f32 %v7495_v49, %v1880_v31  ;;  %v3122_v40 = vmax.f32 %v2494_v32, 0.0  ;;  %v2497_v41 = vadd.f32 %v6946_v37, %v7495_v49  ;;  %v2488_v42 = vpop.f32.mrb[39].mxu1  ;;  %v2968_v43 = vmax.f32 %v1878_v26, 0.0 }
 0x132   : > { %v2971_v39 = vmax.f32 %v1889_v30, 0.0  ;;  %6900 = vmatmul.mubr.msk.bf16.gmra.mrb[144].mxu0 %vm1244_vm1, %v7216_v24  ;;  %v3120_v45 = vmax.f32 %v2486_v36, 0.0  ;;  %v2489_v46 = vadd.f32 %v7495_v49, %v2488_v42 }
 0x133   : > { %v2969_v44 = vmax.f32 %v1881_v35, 0.0  ;;  %6903 = vmatprep.mubr.msk.bf16.mxu0 %vm1244_vm1, %v7219_v29  ;;  %v3123_v48 = vmax.f32 %v2497_v41, 0.0  ;;  %7052 = vmatmul.mubr.msk.bf16.gmra.mrb[144].mxu1 %vm1244_vm1, %v7218_v34 }
 0x134   : > { %v5798_v47 = vpack.c.bf16 %v2971_v39, %v2970_v38  ;;  %v3121_v52 = vmax.f32 %v2489_v46, 0.0 }
 0x135   : > { %v5793_v50 = vpack.c.bf16 %v2969_v44, %v2968_v43  ;;  %v6797_v51 = vpop.f32.mrb[40].mxu0  ;;  %v6178_v53 = vpack.c.bf16 %v3123_v48, %v3122_v40 }
 0x136   : > { %6468 = vst [vmem:[%s7517_s27 + $0x98] sm:$0xff] %v5798_v47   ;;  %v1902_v54 = vadd.f32 %v6797_v51, %v7495_v49  ;;  %v1893_v55 = vpop.f32.mrb[41].mxu0  ;;  %v6173_v57 = vpack.c.bf16 %v3121_v52, %v3120_v45  ;;  %v6949_v60 = vpop.f32.mrb[40].mxu1 }
 0x137   : > { %6467 = vst [vmem:[%s7517_s27 + $0x90] sm:$0xff] %v5793_v50   ;;  %v1894_v58 = vadd.f32 %v7495_v49, %v1893_v55  ;;  %v6798_v59 = vpop.f32.mrb[42].mxu0  ;;  %6544 = vst [vmem:[%s7517_s27 + $0x2f8] sm:$0xff] %v6178_v53   ;;  %v2510_v63 = vadd.f32 %v6949_v60, %v7495_v49  ;;  %v2501_v0 = vpop.f32.mrb[41].mxu1 }
 0x138   : > { %v1905_v61 = vadd.f32 %v6798_v59, %v7495_v49  ;;  %v1896_v62 = vpop.f32.mrb[43].mxu0  ;;  %6543 = vst [vmem:[%s7517_s27 + $0x2f0] sm:$0xff] %v6173_v57   ;;  %v2502_v2 = vadd.f32 %v7495_v49, %v2501_v0  ;;  %v6950_v3 = vpop.f32.mrb[42].mxu1  ;;  %v2974_v4 = vmax.f32 %v1902_v54, 0.0 }
 0x139   : > { %v1897_v1 = vadd.f32 %v7495_v49, %v1896_v62  ;;  %v3126_v6 = vmax.f32 %v2510_v63, 0.0  ;;  %v2513_v7 = vadd.f32 %v6950_v3, %v7495_v49  ;;  %v2504_v8 = vpop.f32.mrb[43].mxu1  ;;  %v2972_v9 = vmax.f32 %v1894_v58, 0.0 }
 0x13a   : > { %v2975_v5 = vmax.f32 %v1905_v61, 0.0  ;;  %6904 = vmatmul.mubr.msk.bf16.gmra.mrb[148].mxu0 %vm1244_vm1, %v7220_v56  ;;  %v3124_v11 = vmax.f32 %v2502_v2, 0.0  ;;  %v2505_v12 = vadd.f32 %v7495_v49, %v2504_v8 }
 0x13b   : > { %v2973_v10 = vmax.f32 %v1897_v1, 0.0  ;;  %v3127_v14 = vmax.f32 %v2513_v7, 0.0 }
 0x13c   : > { %v5808_v13 = vpack.c.bf16 %v2975_v5, %v2974_v4  ;;  %v3125_v17 = vmax.f32 %v2505_v12, 0.0 }
 0x13d   : > { %v5803_v15 = vpack.c.bf16 %v2973_v10, %v2972_v9  ;;  %v6801_v16 = vpop.f32.mrb[44].mxu0  ;;  %v6188_v18 = vpack.c.bf16 %v3127_v14, %v3126_v6 }
 0x13e   : > { %6470 = vst [vmem:[%s7517_s27 + $0xa8] sm:$0xff] %v5808_v13   ;;  %v1918_v19 = vadd.f32 %v6801_v16, %v7495_v49  ;;  %v1909_v20 = vpop.f32.mrb[45].mxu0  ;;  %v6183_v21 = vpack.c.bf16 %v3125_v17, %v3124_v11  ;;  %v6953_v24 = vpop.f32.mrb[44].mxu1 }
 0x13f   : > { %6469 = vst [vmem:[%s7517_s27 + $0xa0] sm:$0xff] %v5803_v15   ;;  %v1910_v22 = vadd.f32 %v7495_v49, %v1909_v20  ;;  %v6802_v23 = vpop.f32.mrb[46].mxu0  ;;  %6546 = vst [vmem:[%s7517_s27 + $0x308] sm:$0xff] %v6188_v18   ;;  %v2526_v27 = vadd.f32 %v6953_v24, %v7495_v49  ;;  %v2517_v28 = vpop.f32.mrb[45].mxu1 }
 0x140   : > { %v1921_v25 = vadd.f32 %v6802_v23, %v7495_v49  ;;  %v1912_v26 = vpop.f32.mrb[47].mxu0  ;;  %6545 = vst [vmem:[%s7517_s27 + $0x300] sm:$0xff] %v6183_v21   ;;  %v2518_v30 = vadd.f32 %v7495_v49, %v2517_v28  ;;  %v6954_v31 = vpop.f32.mrb[46].mxu1  ;;  %v2978_v32 = vmax.f32 %v1918_v19, 0.0  ;;  %v7751_v23 = vld [vmem:[%s8052_s2] ss:$0 sm:$0xff] }
 0x141   : > { %v1913_v29 = vadd.f32 %v7495_v49, %v1912_v26  ;;  %v3130_v34 = vmax.f32 %v2526_v27, 0.0  ;;  %v2529_v35 = vadd.f32 %v6954_v31, %v7495_v49  ;;  %v2520_v36 = vpop.f32.mrb[47].mxu1  ;;  %v2976_v37 = vmax.f32 %v1910_v22, 0.0 }
 0x142   : > { %v2979_v33 = vmax.f32 %v1921_v25, 0.0  ;;  %v3128_v39 = vmax.f32 %v2518_v30, 0.0  ;;  %v2521_v40 = vadd.f32 %v7495_v49, %v2520_v36 }
 0x143   : > { %v2977_v38 = vmax.f32 %v1913_v29, 0.0  ;;  %v3131_v42 = vmax.f32 %v2529_v35, 0.0 }
 0x144   : > { %v5818_v41 = vpack.c.bf16 %v2979_v33, %v2978_v32  ;;  %v3129_v45 = vmax.f32 %v2521_v40, 0.0 }
 0x145   : > { %v5813_v43 = vpack.c.bf16 %v2977_v38, %v2976_v37  ;;  %v6805_v44 = vpop.f32.mrb[48].mxu0  ;;  %v6198_v46 = vpack.c.bf16 %v3131_v42, %v3130_v34 }
 0x146   : > { %6472 = vst [vmem:[%s7517_s27 + $0xb8] sm:$0xff] %v5818_v41   ;;  %v1934_v47 = vadd.f32 %v6805_v44, %v7495_v49  ;;  %v1925_v48 = vpop.f32.mrb[49].mxu0  ;;  %v6193_v50 = vpack.c.bf16 %v3129_v45, %v3128_v39  ;;  %v6957_v53 = vpop.f32.mrb[48].mxu1 }
 0x147   : > { %6471 = vst [vmem:[%s7517_s27 + $0xb0] sm:$0xff] %v5813_v43   ;;  %v1926_v51 = vadd.f32 %v7495_v49, %v1925_v48  ;;  %v6806_v52 = vpop.f32.mrb[50].mxu0  ;;  %6548 = vst [vmem:[%s7517_s27 + $0x318] sm:$0xff] %v6198_v46   ;;  %v2542_v56 = vadd.f32 %v6957_v53, %v7495_v49  ;;  %v2533_v57 = vpop.f32.mrb[49].mxu1 }
 0x148   : > { %v1937_v54 = vadd.f32 %v6806_v52, %v7495_v49  ;;  %v1928_v55 = vpop.f32.mrb[51].mxu0  ;;  %6547 = vst [vmem:[%s7517_s27 + $0x310] sm:$0xff] %v6193_v50   ;;  %v2534_v59 = vadd.f32 %v7495_v49, %v2533_v57  ;;  %v6958_v60 = vpop.f32.mrb[50].mxu1  ;;  %v2982_v61 = vmax.f32 %v1934_v47, 0.0 }
 0x149   : > { %v1929_v58 = vadd.f32 %v7495_v49, %v1928_v55  ;;  %v3134_v63 = vmax.f32 %v2542_v56, 0.0  ;;  %v2545_v0 = vadd.f32 %v6958_v60, %v7495_v49  ;;  %v2536_v1 = vpop.f32.mrb[51].mxu1  ;;  %v2980_v2 = vmax.f32 %v1926_v51, 0.0 }
 0x14a   : > { %v2983_v62 = vmax.f32 %v1937_v54, 0.0  ;;  %v3132_v4 = vmax.f32 %v2534_v59, 0.0  ;;  %v2537_v5 = vadd.f32 %v7495_v49, %v2536_v1 }
 0x14b   : > { %v2981_v3 = vmax.f32 %v1929_v58, 0.0  ;;  %v3135_v7 = vmax.f32 %v2545_v0, 0.0 }
 0x14c   : > { %v5828_v6 = vpack.c.bf16 %v2983_v62, %v2982_v61  ;;  %v3133_v10 = vmax.f32 %v2537_v5, 0.0 }
 0x14d   : > { %v5823_v8 = vpack.c.bf16 %v2981_v3, %v2980_v2  ;;  %v6809_v9 = vpop.f32.mrb[52].mxu0  ;;  %v6208_v11 = vpack.c.bf16 %v3135_v7, %v3134_v63 }
 0x14e   : > { %6474 = vst [vmem:[%s7517_s27 + $0xc8] sm:$0xff] %v5828_v6   ;;  %v1950_v12 = vadd.f32 %v6809_v9, %v7495_v49  ;;  %v1941_v13 = vpop.f32.mrb[53].mxu0  ;;  %v6203_v14 = vpack.c.bf16 %v3133_v10, %v3132_v4  ;;  %v6961_v17 = vpop.f32.mrb[52].mxu1 }
 0x14f   : > { %6473 = vst [vmem:[%s7517_s27 + $0xc0] sm:$0xff] %v5823_v8   ;;  %v1942_v15 = vadd.f32 %v7495_v49, %v1941_v13  ;;  %v6810_v16 = vpop.f32.mrb[54].mxu0  ;;  %6550 = vst [vmem:[%s7517_s27 + $0x328] sm:$0xff] %v6208_v11   ;;  %v2558_v20 = vadd.f32 %v6961_v17, %v7495_v49  ;;  %v2549_v21 = vpop.f32.mrb[53].mxu1 }
 0x150   : > { %v1953_v18 = vadd.f32 %v6810_v16, %v7495_v49  ;;  %v1944_v19 = vpop.f32.mrb[55].mxu0  ;;  %6549 = vst [vmem:[%s7517_s27 + $0x320] sm:$0xff] %v6203_v14   ;;  %v2550_v24 = vadd.f32 %v7751_v23, %v2549_v21  ;;  %v6962_v25 = vpop.f32.mrb[54].mxu1  ;;  %v2986_v26 = vmax.f32 %v1950_v12, 0.0 }
 0x151   : > { %v1945_v22 = vadd.f32 %v7495_v49, %v1944_v19  ;;  %v3138_v28 = vmax.f32 %v2558_v20, 0.0  ;;  %v2561_v29 = vadd.f32 %v7751_v23, %v6962_v25  ;;  %v2552_v30 = vpop.f32.mrb[55].mxu1  ;;  %v2984_v31 = vmax.f32 %v1942_v15, 0.0 }
 0x152   : > { %v2987_v27 = vmax.f32 %v1953_v18, 0.0  ;;  %v3136_v33 = vmax.f32 %v2550_v24, 0.0  ;;  %v2553_v49 = vadd.f32 %v7751_v23, %v2552_v30 }
 0x153   : > { %v2985_v32 = vmax.f32 %v1945_v22, 0.0  ;;  %v3139_v35 = vmax.f32 %v2561_v29, 0.0 }
 0x154   : > { %v5838_v34 = vpack.c.bf16 %v2987_v27, %v2986_v26  ;;  %v3137_v38 = vmax.f32 %v2553_v49, 0.0 }
 0x155   : > { %v5833_v36 = vpack.c.bf16 %v2985_v32, %v2984_v31  ;;  %v6813_v37 = vpop.f32.mrb[56].mxu0  ;;  %v6218_v39 = vpack.c.bf16 %v3139_v35, %v3138_v28 }
 0x156   : > { %6476 = vst [vmem:[%s7517_s27 + $0xd8] sm:$0xff] %v5838_v34   ;;  %v1966_v40 = vadd.f32 %v7751_v23, %v6813_v37  ;;  %v1957_v41 = vpop.f32.mrb[57].mxu0  ;;  %v6213_v42 = vpack.c.bf16 %v3137_v38, %v3136_v33  ;;  %v6965_v45 = vpop.f32.mrb[56].mxu1 }
 0x157   : > { %6475 = vst [vmem:[%s7517_s27 + $0xd0] sm:$0xff] %v5833_v36   ;;  %v1958_v43 = vadd.f32 %v7751_v23, %v1957_v41  ;;  %v6814_v44 = vpop.f32.mrb[58].mxu0  ;;  %6552 = vst [vmem:[%s7517_s27 + $0x338] sm:$0xff] %v6218_v39   ;;  %v2574_v48 = vadd.f32 %v7751_v23, %v6965_v45  ;;  %v2565_v50 = vpop.f32.mrb[57].mxu1 }
 0x158   : > { %v1969_v46 = vadd.f32 %v7751_v23, %v6814_v44  ;;  %v1960_v47 = vpop.f32.mrb[59].mxu0  ;;  %6551 = vst [vmem:[%s7517_s27 + $0x330] sm:$0xff] %v6213_v42   ;;  %v2566_v52 = vadd.f32 %v7751_v23, %v2565_v50  ;;  %v6966_v53 = vpop.f32.mrb[58].mxu1  ;;  %v2990_v54 = vmax.f32 %v1966_v40, 0.0 }
 0x159   : > { %v1961_v51 = vadd.f32 %v7751_v23, %v1960_v47  ;;  %v3142_v56 = vmax.f32 %v2574_v48, 0.0  ;;  %v2577_v57 = vadd.f32 %v7751_v23, %v6966_v53  ;;  %v2568_v58 = vpop.f32.mrb[59].mxu1  ;;  %v2988_v59 = vmax.f32 %v1958_v43, 0.0 }
 0x15a   : > { %v2991_v55 = vmax.f32 %v1969_v46, 0.0  ;;  %v3140_v61 = vmax.f32 %v2566_v52, 0.0  ;;  %v2569_v62 = vadd.f32 %v7751_v23, %v2568_v58 }
 0x15b   : > { %v2989_v60 = vmax.f32 %v1961_v51, 0.0  ;;  %v3143_v0 = vmax.f32 %v2577_v57, 0.0 }
 0x15c   : > { %v5848_v63 = vpack.c.bf16 %v2991_v55, %v2990_v54  ;;  %v3141_v3 = vmax.f32 %v2569_v62, 0.0 }
 0x15d   : > { %v5843_v1 = vpack.c.bf16 %v2989_v60, %v2988_v59  ;;  %v6817_v2 = vpop.f32.mrb[60].mxu0  ;;  %v6228_v4 = vpack.c.bf16 %v3143_v0, %v3142_v56 }
 0x15e   : > { %6478 = vst [vmem:[%s7517_s27 + $0xe8] sm:$0xff] %v5848_v63   ;;  %v1982_v5 = vadd.f32 %v7751_v23, %v6817_v2  ;;  %v1973_v6 = vpop.f32.mrb[61].mxu0  ;;  %v6223_v7 = vpack.c.bf16 %v3141_v3, %v3140_v61  ;;  %v6969_v10 = vpop.f32.mrb[60].mxu1 }
 0x15f   : > { %6477 = vst [vmem:[%s7517_s27 + $0xe0] sm:$0xff] %v5843_v1   ;;  %v1974_v8 = vadd.f32 %v7751_v23, %v1973_v6  ;;  %v6818_v9 = vpop.f32.mrb[62].mxu0  ;;  %6554 = vst [vmem:[%s7517_s27 + $0x348] sm:$0xff] %v6228_v4   ;;  %v2590_v13 = vadd.f32 %v7751_v23, %v6969_v10  ;;  %v2581_v14 = vpop.f32.mrb[61].mxu1 }
 0x160   : > { %v1985_v11 = vadd.f32 %v7751_v23, %v6818_v9  ;;  %v1976_v12 = vpop.f32.mrb[63].mxu0  ;;  %6553 = vst [vmem:[%s7517_s27 + $0x340] sm:$0xff] %v6223_v7   ;;  %v2582_v16 = vadd.f32 %v7751_v23, %v2581_v14  ;;  %v6970_v17 = vpop.f32.mrb[62].mxu1  ;;  %v2994_v18 = vmax.f32 %v1982_v5, 0.0 }
 0x161   : > { %v1977_v15 = vadd.f32 %v7751_v23, %v1976_v12  ;;  %v3146_v20 = vmax.f32 %v2590_v13, 0.0  ;;  %v2593_v21 = vadd.f32 %v7751_v23, %v6970_v17  ;;  %v2584_v22 = vpop.f32.mrb[63].mxu1  ;;  %v2992_v24 = vmax.f32 %v1974_v8, 0.0 }
 0x162   : > { %v2995_v19 = vmax.f32 %v1985_v11, 0.0  ;;  %v3144_v26 = vmax.f32 %v2582_v16, 0.0  ;;  %v2585_v27 = vadd.f32 %v7751_v23, %v2584_v22 }
 0x163   : > { %v2993_v25 = vmax.f32 %v1977_v15, 0.0  ;;  %v3147_v29 = vmax.f32 %v2593_v21, 0.0 }
 0x164   : > { %v5858_v28 = vpack.c.bf16 %v2995_v19, %v2994_v18  ;;  %v3145_v32 = vmax.f32 %v2585_v27, 0.0 }
 0x165   : > { %v5853_v30 = vpack.c.bf16 %v2993_v25, %v2992_v24  ;;  %v6821_v31 = vpop.f32.mrb[64].mxu0  ;;  %v6238_v33 = vpack.c.bf16 %v3147_v29, %v3146_v20 }
 0x166   : > { %6480 = vst [vmem:[%s7517_s27 + $0xf8] sm:$0xff] %v5858_v28   ;;  %v1998_v49 = vadd.f32 %v7751_v23, %v6821_v31  ;;  %v1989_v34 = vpop.f32.mrb[65].mxu0  ;;  %v6233_v35 = vpack.c.bf16 %v3145_v32, %v3144_v26  ;;  %v6973_v38 = vpop.f32.mrb[64].mxu1 }
 0x167   : > { %6479 = vst [vmem:[%s7517_s27 + $0xf0] sm:$0xff] %v5853_v30   ;;  %v1990_v36 = vadd.f32 %v7751_v23, %v1989_v34  ;;  %v6822_v37 = vpop.f32.mrb[66].mxu0  ;;  %6556 = vst [vmem:[%s7517_s27 + $0x358] sm:$0xff] %v6238_v33   ;;  %v2606_v41 = vadd.f32 %v7751_v23, %v6973_v38  ;;  %v2597_v42 = vpop.f32.mrb[65].mxu1 }
 0x168   : > { %v2001_v39 = vadd.f32 %v7751_v23, %v6822_v37  ;;  %v1992_v40 = vpop.f32.mrb[67].mxu0  ;;  %6555 = vst [vmem:[%s7517_s27 + $0x350] sm:$0xff] %v6233_v35   ;;  %v2598_v44 = vadd.f32 %v7751_v23, %v2597_v42  ;;  %v6974_v45 = vpop.f32.mrb[66].mxu1  ;;  %v2998_v46 = vmax.f32 %v1998_v49, 0.0 }
 0x169   : > { %v1993_v43 = vadd.f32 %v7751_v23, %v1992_v40  ;;  %v3150_v48 = vmax.f32 %v2606_v41, 0.0  ;;  %v2609_v50 = vadd.f32 %v7751_v23, %v6974_v45  ;;  %v2600_v51 = vpop.f32.mrb[67].mxu1  ;;  %v2996_v52 = vmax.f32 %v1990_v36, 0.0 }
 0x16a   : > { %v2999_v47 = vmax.f32 %v2001_v39, 0.0  ;;  %v3148_v54 = vmax.f32 %v2598_v44, 0.0  ;;  %v2601_v55 = vadd.f32 %v7751_v23, %v2600_v51 }
 0x16b   : > { %v2997_v53 = vmax.f32 %v1993_v43, 0.0  ;;  %v3151_v57 = vmax.f32 %v2609_v50, 0.0 }
 0x16c   : > { %v5868_v56 = vpack.c.bf16 %v2999_v47, %v2998_v46  ;;  %v3149_v60 = vmax.f32 %v2601_v55, 0.0 }
 0x16d   : > { %v5863_v58 = vpack.c.bf16 %v2997_v53, %v2996_v52  ;;  %v6825_v59 = vpop.f32.mrb[68].mxu0  ;;  %v6248_v61 = vpack.c.bf16 %v3151_v57, %v3150_v48 }
 0x16e   : > { %6482 = vst [vmem:[%s7517_s27 + $0x108] sm:$0xff] %v5868_v56   ;;  %v2014_v62 = vadd.f32 %v7751_v23, %v6825_v59  ;;  %v2005_v63 = vpop.f32.mrb[69].mxu0  ;;  %v6243_v0 = vpack.c.bf16 %v3149_v60, %v3148_v54  ;;  %v6977_v3 = vpop.f32.mrb[68].mxu1 }
 0x16f   : > { %6481 = vst [vmem:[%s7517_s27 + $0x100] sm:$0xff] %v5863_v58   ;;  %v2006_v1 = vadd.f32 %v7751_v23, %v2005_v63  ;;  %v6826_v2 = vpop.f32.mrb[70].mxu0  ;;  %6558 = vst [vmem:[%s7517_s27 + $0x368] sm:$0xff] %v6248_v61   ;;  %v2622_v6 = vadd.f32 %v7751_v23, %v6977_v3  ;;  %v2613_v7 = vpop.f32.mrb[69].mxu1 }
 0x170   : > { %v2017_v4 = vadd.f32 %v7751_v23, %v6826_v2  ;;  %v2008_v5 = vpop.f32.mrb[71].mxu0  ;;  %6557 = vst [vmem:[%s7517_s27 + $0x360] sm:$0xff] %v6243_v0   ;;  %v2614_v9 = vadd.f32 %v7751_v23, %v2613_v7  ;;  %v6978_v10 = vpop.f32.mrb[70].mxu1  ;;  %v3002_v11 = vmax.f32 %v2014_v62, 0.0 }
 0x171   : > { %v2009_v8 = vadd.f32 %v7751_v23, %v2008_v5  ;;  %v3154_v13 = vmax.f32 %v2622_v6, 0.0  ;;  %v2625_v14 = vadd.f32 %v7751_v23, %v6978_v10  ;;  %v2616_v15 = vpop.f32.mrb[71].mxu1  ;;  %v3000_v16 = vmax.f32 %v2006_v1, 0.0 }
 0x172   : > { %v3003_v12 = vmax.f32 %v2017_v4, 0.0  ;;  %v3152_v18 = vmax.f32 %v2614_v9, 0.0  ;;  %v2617_v19 = vadd.f32 %v7751_v23, %v2616_v15 }
 0x173   : > { %v3001_v17 = vmax.f32 %v2009_v8, 0.0  ;;  %v3155_v21 = vmax.f32 %v2625_v14, 0.0 }
 0x174   : > { %v5878_v20 = vpack.c.bf16 %v3003_v12, %v3002_v11  ;;  %v3153_v25 = vmax.f32 %v2617_v19, 0.0 }
 0x175   : > { %v5873_v22 = vpack.c.bf16 %v3001_v17, %v3000_v16  ;;  %v6829_v24 = vpop.f32.mrb[72].mxu0  ;;  %v6258_v26 = vpack.c.bf16 %v3155_v21, %v3154_v13 }
 0x176   : > { %6484 = vst [vmem:[%s7517_s27 + $0x118] sm:$0xff] %v5878_v20   ;;  %v2030_v27 = vadd.f32 %v7751_v23, %v6829_v24  ;;  %v2021_v28 = vpop.f32.mrb[73].mxu0  ;;  %v6253_v29 = vpack.c.bf16 %v3153_v25, %v3152_v18  ;;  %v6981_v32 = vpop.f32.mrb[72].mxu1 }
 0x177   : > { %6483 = vst [vmem:[%s7517_s27 + $0x110] sm:$0xff] %v5873_v22   ;;  %v2022_v30 = vadd.f32 %v7751_v23, %v2021_v28  ;;  %v6830_v31 = vpop.f32.mrb[74].mxu0  ;;  %6560 = vst [vmem:[%s7517_s27 + $0x378] sm:$0xff] %v6258_v26   ;;  %v2638_v34 = vadd.f32 %v7751_v23, %v6981_v32  ;;  %v2629_v35 = vpop.f32.mrb[73].mxu1 }
 0x178   : > { %v2033_v33 = vadd.f32 %v7751_v23, %v6830_v31  ;;  %v2024_v49 = vpop.f32.mrb[75].mxu0  ;;  %6559 = vst [vmem:[%s7517_s27 + $0x370] sm:$0xff] %v6253_v29   ;;  %v2630_v37 = vadd.f32 %v7751_v23, %v2629_v35  ;;  %v6982_v38 = vpop.f32.mrb[74].mxu1  ;;  %v3006_v39 = vmax.f32 %v2030_v27, 0.0 }
 0x179   : > { %v2025_v36 = vadd.f32 %v7751_v23, %v2024_v49  ;;  %v3158_v41 = vmax.f32 %v2638_v34, 0.0  ;;  %v2641_v42 = vadd.f32 %v7751_v23, %v6982_v38  ;;  %v2632_v43 = vpop.f32.mrb[75].mxu1  ;;  %v3004_v44 = vmax.f32 %v2022_v30, 0.0 }
 0x17a   : > { %v3007_v40 = vmax.f32 %v2033_v33, 0.0  ;;  %v3156_v46 = vmax.f32 %v2630_v37, 0.0  ;;  %v2633_v47 = vadd.f32 %v7751_v23, %v2632_v43 }
 0x17b   : > { %v3005_v45 = vmax.f32 %v2025_v36, 0.0  ;;  %v3159_v50 = vmax.f32 %v2641_v42, 0.0 }
 0x17c   : > { %v5888_v48 = vpack.c.bf16 %v3007_v40, %v3006_v39  ;;  %v3157_v53 = vmax.f32 %v2633_v47, 0.0 }
 0x17d   : > { %v5883_v51 = vpack.c.bf16 %v3005_v45, %v3004_v44  ;;  %v6833_v52 = vpop.f32.mrb[76].mxu0  ;;  %v6268_v54 = vpack.c.bf16 %v3159_v50, %v3158_v41 }
 0x17e   : > { %6486 = vst [vmem:[%s7517_s27 + $0x128] sm:$0xff] %v5888_v48   ;;  %v2046_v55 = vadd.f32 %v7751_v23, %v6833_v52  ;;  %v2037_v56 = vpop.f32.mrb[77].mxu0  ;;  %v6263_v57 = vpack.c.bf16 %v3157_v53, %v3156_v46  ;;  %v6985_v60 = vpop.f32.mrb[76].mxu1 }
 0x17f   : > { %6485 = vst [vmem:[%s7517_s27 + $0x120] sm:$0xff] %v5883_v51   ;;  %v2038_v58 = vadd.f32 %v7751_v23, %v2037_v56  ;;  %v6834_v59 = vpop.f32.mrb[78].mxu0  ;;  %6562 = vst [vmem:[%s7517_s27 + $0x388] sm:$0xff] %v6268_v54   ;;  %v2654_v63 = vadd.f32 %v7751_v23, %v6985_v60  ;;  %v2645_v0 = vpop.f32.mrb[77].mxu1 }
 0x180   : > { %v2049_v61 = vadd.f32 %v7751_v23, %v6834_v59  ;;  %v2040_v62 = vpop.f32.mrb[79].mxu0  ;;  %6561 = vst [vmem:[%s7517_s27 + $0x380] sm:$0xff] %v6263_v57   ;;  %v2646_v2 = vadd.f32 %v7751_v23, %v2645_v0  ;;  %v6986_v3 = vpop.f32.mrb[78].mxu1  ;;  %v3010_v4 = vmax.f32 %v2046_v55, 0.0 }
 0x181   : > { %v2041_v1 = vadd.f32 %v7751_v23, %v2040_v62  ;;  %v3162_v6 = vmax.f32 %v2654_v63, 0.0  ;;  %v2657_v7 = vadd.f32 %v7751_v23, %v6986_v3  ;;  %v2648_v8 = vpop.f32.mrb[79].mxu1  ;;  %v3008_v9 = vmax.f32 %v2038_v58, 0.0 }
 0x182   : > { %v3011_v5 = vmax.f32 %v2049_v61, 0.0  ;;  %v3160_v11 = vmax.f32 %v2646_v2, 0.0  ;;  %v2649_v12 = vadd.f32 %v7751_v23, %v2648_v8 }
 0x183   : > { %v3009_v10 = vmax.f32 %v2041_v1, 0.0  ;;  %v3163_v14 = vmax.f32 %v2657_v7, 0.0 }
 0x184   : > { %v5898_v13 = vpack.c.bf16 %v3011_v5, %v3010_v4  ;;  %v3161_v17 = vmax.f32 %v2649_v12, 0.0 }
 0x185   : > { %v5893_v15 = vpack.c.bf16 %v3009_v10, %v3008_v9  ;;  %v6837_v16 = vpop.f32.mrb[80].mxu0  ;;  %v6278_v18 = vpack.c.bf16 %v3163_v14, %v3162_v6 }
 0x186   : > { %6488 = vst [vmem:[%s7517_s27 + $0x138] sm:$0xff] %v5898_v13   ;;  %v2062_v19 = vadd.f32 %v7751_v23, %v6837_v16  ;;  %v2053_v20 = vpop.f32.mrb[81].mxu0  ;;  %v6273_v21 = vpack.c.bf16 %v3161_v17, %v3160_v11  ;;  %v6989_v25 = vpop.f32.mrb[80].mxu1 }
 0x187   : > { %6487 = vst [vmem:[%s7517_s27 + $0x130] sm:$0xff] %v5893_v15   ;;  %v2054_v22 = vadd.f32 %v7751_v23, %v2053_v20  ;;  %v6838_v24 = vpop.f32.mrb[82].mxu0  ;;  %6564 = vst [vmem:[%s7517_s27 + $0x398] sm:$0xff] %v6278_v18   ;;  %v2670_v28 = vadd.f32 %v7751_v23, %v6989_v25  ;;  %v2661_v29 = vpop.f32.mrb[81].mxu1 }
 0x188   : > { %v2065_v26 = vadd.f32 %v7751_v23, %v6838_v24  ;;  %v2056_v27 = vpop.f32.mrb[83].mxu0  ;;  %6563 = vst [vmem:[%s7517_s27 + $0x390] sm:$0xff] %v6273_v21   ;;  %v2662_v31 = vadd.f32 %v7751_v23, %v2661_v29  ;;  %v6990_v32 = vpop.f32.mrb[82].mxu1  ;;  %v3014_v33 = vmax.f32 %v2062_v19, 0.0 }
 0x189   : > { %v2057_v30 = vadd.f32 %v7751_v23, %v2056_v27  ;;  %v3166_v34 = vmax.f32 %v2670_v28, 0.0  ;;  %v2673_v35 = vadd.f32 %v7751_v23, %v6990_v32  ;;  %v2664_v36 = vpop.f32.mrb[83].mxu1  ;;  %v3012_v37 = vmax.f32 %v2054_v22, 0.0 }
 0x18a   : > { %v3015_v49 = vmax.f32 %v2065_v26, 0.0  ;;  %v3164_v39 = vmax.f32 %v2662_v31, 0.0  ;;  %v2665_v40 = vadd.f32 %v7751_v23, %v2664_v36 }
 0x18b   : > { %v3013_v38 = vmax.f32 %v2057_v30, 0.0  ;;  %v3167_v42 = vmax.f32 %v2673_v35, 0.0 }
 0x18c   : > { %v5908_v41 = vpack.c.bf16 %v3015_v49, %v3014_v33  ;;  %v3165_v45 = vmax.f32 %v2665_v40, 0.0 }
 0x18d   : > { %v5903_v43 = vpack.c.bf16 %v3013_v38, %v3012_v37  ;;  %v6841_v44 = vpop.f32.mrb[84].mxu0  ;;  %v6288_v46 = vpack.c.bf16 %v3167_v42, %v3166_v34 }
 0x18e   : > { %6490 = vst [vmem:[%s7517_s27 + $0x148] sm:$0xff] %v5908_v41   ;;  %v2078_v47 = vadd.f32 %v7751_v23, %v6841_v44  ;;  %v2069_v48 = vpop.f32.mrb[85].mxu0  ;;  %v6283_v50 = vpack.c.bf16 %v3165_v45, %v3164_v39  ;;  %v6993_v53 = vpop.f32.mrb[84].mxu1 }
 0x18f   : > { %6489 = vst [vmem:[%s7517_s27 + $0x140] sm:$0xff] %v5903_v43   ;;  %v2070_v51 = vadd.f32 %v7751_v23, %v2069_v48  ;;  %v6842_v52 = vpop.f32.mrb[86].mxu0  ;;  %6566 = vst [vmem:[%s7517_s27 + $0x3a8] sm:$0xff] %v6288_v46   ;;  %v2686_v56 = vadd.f32 %v7751_v23, %v6993_v53  ;;  %v2677_v57 = vpop.f32.mrb[85].mxu1 }
 0x190   : > { %v2081_v54 = vadd.f32 %v7751_v23, %v6842_v52  ;;  %v2072_v55 = vpop.f32.mrb[87].mxu0  ;;  %6565 = vst [vmem:[%s7517_s27 + $0x3a0] sm:$0xff] %v6283_v50   ;;  %v2678_v59 = vadd.f32 %v7751_v23, %v2677_v57  ;;  %v6994_v60 = vpop.f32.mrb[86].mxu1  ;;  %v3018_v61 = vmax.f32 %v2078_v47, 0.0 }
 0x191   : > { %v2073_v58 = vadd.f32 %v7751_v23, %v2072_v55  ;;  %v3170_v63 = vmax.f32 %v2686_v56, 0.0  ;;  %v2689_v0 = vadd.f32 %v7751_v23, %v6994_v60  ;;  %v2680_v1 = vpop.f32.mrb[87].mxu1  ;;  %v3016_v2 = vmax.f32 %v2070_v51, 0.0 }
 0x192   : > { %v3019_v62 = vmax.f32 %v2081_v54, 0.0  ;;  %v3168_v4 = vmax.f32 %v2678_v59, 0.0  ;;  %v2681_v5 = vadd.f32 %v7751_v23, %v2680_v1 }
 0x193   : > { %v3017_v3 = vmax.f32 %v2073_v58, 0.0  ;;  %v3171_v7 = vmax.f32 %v2689_v0, 0.0 }
 0x194   : > { %v5918_v6 = vpack.c.bf16 %v3019_v62, %v3018_v61  ;;  %v3169_v10 = vmax.f32 %v2681_v5, 0.0 }
 0x195   : > { %v5913_v8 = vpack.c.bf16 %v3017_v3, %v3016_v2  ;;  %v6845_v9 = vpop.f32.mrb[88].mxu0  ;;  %v6298_v11 = vpack.c.bf16 %v3171_v7, %v3170_v63 }
 0x196   : > { %6492 = vst [vmem:[%s7517_s27 + $0x158] sm:$0xff] %v5918_v6   ;;  %v2094_v12 = vadd.f32 %v7751_v23, %v6845_v9  ;;  %v2085_v13 = vpop.f32.mrb[89].mxu0  ;;  %v6293_v14 = vpack.c.bf16 %v3169_v10, %v3168_v4  ;;  %v6997_v17 = vpop.f32.mrb[88].mxu1 }
 0x197   : > { %6491 = vst [vmem:[%s7517_s27 + $0x150] sm:$0xff] %v5913_v8   ;;  %v2086_v15 = vadd.f32 %v7751_v23, %v2085_v13  ;;  %v6846_v16 = vpop.f32.mrb[90].mxu0  ;;  %6568 = vst [vmem:[%s7517_s27 + $0x3b8] sm:$0xff] %v6298_v11   ;;  %v2702_v20 = vadd.f32 %v7751_v23, %v6997_v17  ;;  %v2693_v21 = vpop.f32.mrb[89].mxu1 }
 0x198   : > { %v2097_v18 = vadd.f32 %v7751_v23, %v6846_v16  ;;  %v2088_v19 = vpop.f32.mrb[91].mxu0  ;;  %6567 = vst [vmem:[%s7517_s27 + $0x3b0] sm:$0xff] %v6293_v14   ;;  %v2694_v24 = vadd.f32 %v7751_v23, %v2693_v21  ;;  %v6998_v25 = vpop.f32.mrb[90].mxu1  ;;  %v3022_v26 = vmax.f32 %v2094_v12, 0.0 }
 0x199   : > { %v2089_v22 = vadd.f32 %v7751_v23, %v2088_v19  ;;  %v3174_v28 = vmax.f32 %v2702_v20, 0.0  ;;  %v2705_v29 = vadd.f32 %v7751_v23, %v6998_v25  ;;  %v2696_v30 = vpop.f32.mrb[91].mxu1  ;;  %v3020_v31 = vmax.f32 %v2086_v15, 0.0 }
 0x19a   : > { %v3023_v27 = vmax.f32 %v2097_v18, 0.0  ;;  %v3172_v33 = vmax.f32 %v2694_v24, 0.0  ;;  %v2697_v49 = vadd.f32 %v7751_v23, %v2696_v30 }
 0x19b   : > { %v3021_v32 = vmax.f32 %v2089_v22, 0.0  ;;  %v3175_v35 = vmax.f32 %v2705_v29, 0.0 }
 0x19c   : > { %v5928_v34 = vpack.c.bf16 %v3023_v27, %v3022_v26  ;;  %v3173_v38 = vmax.f32 %v2697_v49, 0.0 }
 0x19d   : > { %v5923_v36 = vpack.c.bf16 %v3021_v32, %v3020_v31  ;;  %v6849_v37 = vpop.f32.mrb[92].mxu0  ;;  %v6308_v39 = vpack.c.bf16 %v3175_v35, %v3174_v28 }
 0x19e   : > { %6494 = vst [vmem:[%s7517_s27 + $0x168] sm:$0xff] %v5928_v34   ;;  %v2110_v40 = vadd.f32 %v7751_v23, %v6849_v37  ;;  %v2101_v41 = vpop.f32.mrb[93].mxu0  ;;  %v6303_v42 = vpack.c.bf16 %v3173_v38, %v3172_v33  ;;  %v7001_v45 = vpop.f32.mrb[92].mxu1 }
 0x19f   : > { %6493 = vst [vmem:[%s7517_s27 + $0x160] sm:$0xff] %v5923_v36   ;;  %v2102_v43 = vadd.f32 %v7751_v23, %v2101_v41  ;;  %v6850_v44 = vpop.f32.mrb[94].mxu0  ;;  %6570 = vst [vmem:[%s7517_s27 + $0x3c8] sm:$0xff] %v6308_v39   ;;  %v2718_v48 = vadd.f32 %v7751_v23, %v7001_v45  ;;  %v2709_v50 = vpop.f32.mrb[93].mxu1 }
 0x1a0   : > { %v2113_v46 = vadd.f32 %v7751_v23, %v6850_v44  ;;  %v2104_v47 = vpop.f32.mrb[95].mxu0  ;;  %6569 = vst [vmem:[%s7517_s27 + $0x3c0] sm:$0xff] %v6303_v42   ;;  %v2710_v52 = vadd.f32 %v7751_v23, %v2709_v50  ;;  %v7002_v53 = vpop.f32.mrb[94].mxu1  ;;  %v3026_v54 = vmax.f32 %v2110_v40, 0.0 }
 0x1a1   : > { %v2105_v51 = vadd.f32 %v7751_v23, %v2104_v47  ;;  %v3178_v56 = vmax.f32 %v2718_v48, 0.0  ;;  %v2721_v57 = vadd.f32 %v7751_v23, %v7002_v53  ;;  %v2712_v58 = vpop.f32.mrb[95].mxu1  ;;  %v3024_v59 = vmax.f32 %v2102_v43, 0.0 }
 0x1a2   : > { %v3027_v55 = vmax.f32 %v2113_v46, 0.0  ;;  %v3176_v61 = vmax.f32 %v2710_v52, 0.0  ;;  %v2713_v62 = vadd.f32 %v7751_v23, %v2712_v58 }
 0x1a3   : > { %v3025_v60 = vmax.f32 %v2105_v51, 0.0  ;;  %v3179_v0 = vmax.f32 %v2721_v57, 0.0 }
 0x1a4   : > { %v5938_v63 = vpack.c.bf16 %v3027_v55, %v3026_v54  ;;  %v3177_v3 = vmax.f32 %v2713_v62, 0.0 }
 0x1a5   : > { %v5933_v1 = vpack.c.bf16 %v3025_v60, %v3024_v59  ;;  %v6853_v2 = vpop.f32.mrb[96].mxu0  ;;  %v6318_v4 = vpack.c.bf16 %v3179_v0, %v3178_v56 }
 0x1a6   : > { %6496 = vst [vmem:[%s7517_s27 + $0x178] sm:$0xff] %v5938_v63   ;;  %v2126_v5 = vadd.f32 %v7751_v23, %v6853_v2  ;;  %v2117_v6 = vpop.f32.mrb[97].mxu0  ;;  %v6313_v7 = vpack.c.bf16 %v3177_v3, %v3176_v61  ;;  %v7005_v10 = vpop.f32.mrb[96].mxu1 }
 0x1a7   : > { %6495 = vst [vmem:[%s7517_s27 + $0x170] sm:$0xff] %v5933_v1   ;;  %v2118_v8 = vadd.f32 %v7751_v23, %v2117_v6  ;;  %v6854_v9 = vpop.f32.mrb[98].mxu0  ;;  %6572 = vst [vmem:[%s7517_s27 + $0x3d8] sm:$0xff] %v6318_v4   ;;  %v2734_v13 = vadd.f32 %v7751_v23, %v7005_v10  ;;  %v2725_v14 = vpop.f32.mrb[97].mxu1 }
 0x1a8   : > { %v2129_v11 = vadd.f32 %v7751_v23, %v6854_v9  ;;  %v2120_v12 = vpop.f32.mrb[99].mxu0  ;;  %6571 = vst [vmem:[%s7517_s27 + $0x3d0] sm:$0xff] %v6313_v7   ;;  %v2726_v16 = vadd.f32 %v7751_v23, %v2725_v14  ;;  %v7006_v17 = vpop.f32.mrb[98].mxu1  ;;  %v3030_v18 = vmax.f32 %v2126_v5, 0.0 }
 0x1a9   : > { %v2121_v15 = vadd.f32 %v7751_v23, %v2120_v12  ;;  %v3182_v20 = vmax.f32 %v2734_v13, 0.0  ;;  %v2737_v21 = vadd.f32 %v7751_v23, %v7006_v17  ;;  %v2728_v22 = vpop.f32.mrb[99].mxu1  ;;  %v3028_v24 = vmax.f32 %v2118_v8, 0.0 }
 0x1aa   : > { %v3031_v19 = vmax.f32 %v2129_v11, 0.0  ;;  %v3180_v26 = vmax.f32 %v2726_v16, 0.0  ;;  %v2729_v27 = vadd.f32 %v7751_v23, %v2728_v22 }
 0x1ab   : > { %v3029_v25 = vmax.f32 %v2121_v15, 0.0  ;;  %v3183_v29 = vmax.f32 %v2737_v21, 0.0 }
 0x1ac   : > { %v5948_v28 = vpack.c.bf16 %v3031_v19, %v3030_v18  ;;  %v3181_v32 = vmax.f32 %v2729_v27, 0.0 }
 0x1ad   : > { %v5943_v30 = vpack.c.bf16 %v3029_v25, %v3028_v24  ;;  %v6857_v31 = vpop.f32.mrb[100].mxu0  ;;  %v6328_v33 = vpack.c.bf16 %v3183_v29, %v3182_v20 }
 0x1ae   : > { %6498 = vst [vmem:[%s7517_s27 + $0x188] sm:$0xff] %v5948_v28   ;;  %v2142_v49 = vadd.f32 %v7751_v23, %v6857_v31  ;;  %v2133_v34 = vpop.f32.mrb[101].mxu0  ;;  %v6323_v35 = vpack.c.bf16 %v3181_v32, %v3180_v26  ;;  %v7009_v38 = vpop.f32.mrb[100].mxu1 }
 0x1af   : > { %6497 = vst [vmem:[%s7517_s27 + $0x180] sm:$0xff] %v5943_v30   ;;  %v2134_v36 = vadd.f32 %v7751_v23, %v2133_v34  ;;  %v6858_v37 = vpop.f32.mrb[102].mxu0  ;;  %6574 = vst [vmem:[%s7517_s27 + $0x3e8] sm:$0xff] %v6328_v33   ;;  %v2750_v41 = vadd.f32 %v7751_v23, %v7009_v38  ;;  %v2741_v42 = vpop.f32.mrb[101].mxu1 }
 0x1b0   : > { %v2145_v39 = vadd.f32 %v7751_v23, %v6858_v37  ;;  %v2136_v40 = vpop.f32.mrb[103].mxu0  ;;  %6573 = vst [vmem:[%s7517_s27 + $0x3e0] sm:$0xff] %v6323_v35   ;;  %v2742_v44 = vadd.f32 %v7751_v23, %v2741_v42  ;;  %v7010_v45 = vpop.f32.mrb[102].mxu1  ;;  %v3034_v46 = vmax.f32 %v2142_v49, 0.0 }
 0x1b1   : > { %v2137_v43 = vadd.f32 %v7751_v23, %v2136_v40  ;;  %v3186_v48 = vmax.f32 %v2750_v41, 0.0  ;;  %v2753_v50 = vadd.f32 %v7751_v23, %v7010_v45  ;;  %v2744_v51 = vpop.f32.mrb[103].mxu1  ;;  %v3032_v52 = vmax.f32 %v2134_v36, 0.0 }
 0x1b2   : > { %v3035_v47 = vmax.f32 %v2145_v39, 0.0  ;;  %v3184_v54 = vmax.f32 %v2742_v44, 0.0  ;;  %v2745_v55 = vadd.f32 %v7751_v23, %v2744_v51 }
 0x1b3   : > { %v3033_v53 = vmax.f32 %v2137_v43, 0.0  ;;  %v3187_v57 = vmax.f32 %v2753_v50, 0.0 }
 0x1b4   : > { %v5958_v56 = vpack.c.bf16 %v3035_v47, %v3034_v46  ;;  %v3185_v60 = vmax.f32 %v2745_v55, 0.0 }
 0x1b5   : > { %v5953_v58 = vpack.c.bf16 %v3033_v53, %v3032_v52  ;;  %v6861_v59 = vpop.f32.mrb[104].mxu0  ;;  %v6338_v61 = vpack.c.bf16 %v3187_v57, %v3186_v48 }
 0x1b6   : > { %6500 = vst [vmem:[%s7517_s27 + $0x198] sm:$0xff] %v5958_v56   ;;  %v2158_v62 = vadd.f32 %v7751_v23, %v6861_v59  ;;  %v2149_v63 = vpop.f32.mrb[105].mxu0  ;;  %v6333_v0 = vpack.c.bf16 %v3185_v60, %v3184_v54  ;;  %v7013_v3 = vpop.f32.mrb[104].mxu1 }
 0x1b7   : > { %6499 = vst [vmem:[%s7517_s27 + $0x190] sm:$0xff] %v5953_v58   ;;  %v2150_v1 = vadd.f32 %v7751_v23, %v2149_v63  ;;  %v6862_v2 = vpop.f32.mrb[106].mxu0  ;;  %6576 = vst [vmem:[%s7517_s27 + $0x3f8] sm:$0xff] %v6338_v61   ;;  %v2766_v6 = vadd.f32 %v7751_v23, %v7013_v3  ;;  %v2757_v7 = vpop.f32.mrb[105].mxu1 }
 0x1b8   : > { %v2161_v4 = vadd.f32 %v7751_v23, %v6862_v2  ;;  %v2152_v5 = vpop.f32.mrb[107].mxu0  ;;  %6575 = vst [vmem:[%s7517_s27 + $0x3f0] sm:$0xff] %v6333_v0   ;;  %v2758_v9 = vadd.f32 %v7751_v23, %v2757_v7  ;;  %v7014_v10 = vpop.f32.mrb[106].mxu1  ;;  %v3038_v11 = vmax.f32 %v2158_v62, 0.0 }
 0x1b9   : > { %v2153_v8 = vadd.f32 %v7751_v23, %v2152_v5  ;;  %v3190_v13 = vmax.f32 %v2766_v6, 0.0  ;;  %v2769_v14 = vadd.f32 %v7751_v23, %v7014_v10  ;;  %v2760_v15 = vpop.f32.mrb[107].mxu1  ;;  %v3036_v16 = vmax.f32 %v2150_v1, 0.0 }
 0x1ba   : > { %v3039_v12 = vmax.f32 %v2161_v4, 0.0  ;;  %v3188_v18 = vmax.f32 %v2758_v9, 0.0  ;;  %v2761_v19 = vadd.f32 %v7751_v23, %v2760_v15 }
 0x1bb   : > { %v3037_v17 = vmax.f32 %v2153_v8, 0.0  ;;  %v3191_v21 = vmax.f32 %v2769_v14, 0.0 }
 0x1bc   : > { %v5968_v20 = vpack.c.bf16 %v3039_v12, %v3038_v11  ;;  %v3189_v25 = vmax.f32 %v2761_v19, 0.0 }
 0x1bd   : > { %v5963_v22 = vpack.c.bf16 %v3037_v17, %v3036_v16  ;;  %v6865_v24 = vpop.f32.mrb[108].mxu0  ;;  %v6348_v26 = vpack.c.bf16 %v3191_v21, %v3190_v13 }
 0x1be   : > { %6502 = vst [vmem:[%s7517_s27 + $0x1a8] sm:$0xff] %v5968_v20   ;;  %v2174_v27 = vadd.f32 %v7751_v23, %v6865_v24  ;;  %v2165_v28 = vpop.f32.mrb[109].mxu0  ;;  %v6343_v29 = vpack.c.bf16 %v3189_v25, %v3188_v18  ;;  %v7017_v32 = vpop.f32.mrb[108].mxu1 }
 0x1bf   : > { %6501 = vst [vmem:[%s7517_s27 + $0x1a0] sm:$0xff] %v5963_v22   ;;  %v2166_v30 = vadd.f32 %v7751_v23, %v2165_v28  ;;  %v6866_v31 = vpop.f32.mrb[110].mxu0  ;;  %6578 = vst [vmem:[%s7517_s27 + $0x408] sm:$0xff] %v6348_v26   ;;  %v2782_v34 = vadd.f32 %v7751_v23, %v7017_v32  ;;  %v2773_v35 = vpop.f32.mrb[109].mxu1 }
 0x1c0   : > { %v2177_v33 = vadd.f32 %v7751_v23, %v6866_v31  ;;  %v2168_v49 = vpop.f32.mrb[111].mxu0  ;;  %6577 = vst [vmem:[%s7517_s27 + $0x400] sm:$0xff] %v6343_v29   ;;  %v2774_v37 = vadd.f32 %v7751_v23, %v2773_v35  ;;  %v7018_v38 = vpop.f32.mrb[110].mxu1  ;;  %v3042_v39 = vmax.f32 %v2174_v27, 0.0  ;;  %v7948_v31 = vld [vmem:[%s8052_s2] ss:$0 sm:$0xff] }
 0x1c1   : > { %v2169_v36 = vadd.f32 %v7751_v23, %v2168_v49  ;;  %v3194_v41 = vmax.f32 %v2782_v34, 0.0  ;;  %v2785_v42 = vadd.f32 %v7751_v23, %v7018_v38  ;;  %v2776_v43 = vpop.f32.mrb[111].mxu1  ;;  %v3040_v44 = vmax.f32 %v2166_v30, 0.0 }
 0x1c2   : > { %v3043_v40 = vmax.f32 %v2177_v33, 0.0  ;;  %v3192_v46 = vmax.f32 %v2774_v37, 0.0  ;;  %v2777_v47 = vadd.f32 %v7751_v23, %v2776_v43 }
 0x1c3   : > { %v3041_v45 = vmax.f32 %v2169_v36, 0.0  ;;  %v3195_v50 = vmax.f32 %v2785_v42, 0.0 }
 0x1c4   : > { %v5978_v48 = vpack.c.bf16 %v3043_v40, %v3042_v39  ;;  %v3193_v53 = vmax.f32 %v2777_v47, 0.0 }
 0x1c5   : > { %v5973_v51 = vpack.c.bf16 %v3041_v45, %v3040_v44  ;;  %v6869_v52 = vpop.f32.mrb[112].mxu0  ;;  %v6358_v54 = vpack.c.bf16 %v3195_v50, %v3194_v41 }
 0x1c6   : > { %6504 = vst [vmem:[%s7517_s27 + $0x1b8] sm:$0xff] %v5978_v48   ;;  %v2190_v55 = vadd.f32 %v7751_v23, %v6869_v52  ;;  %v2181_v56 = vpop.f32.mrb[113].mxu0  ;;  %v6353_v57 = vpack.c.bf16 %v3193_v53, %v3192_v46  ;;  %v7021_v60 = vpop.f32.mrb[112].mxu1 }
 0x1c7   : > { %6503 = vst [vmem:[%s7517_s27 + $0x1b0] sm:$0xff] %v5973_v51   ;;  %v2182_v58 = vadd.f32 %v7751_v23, %v2181_v56  ;;  %v6870_v59 = vpop.f32.mrb[114].mxu0  ;;  %6580 = vst [vmem:[%s7517_s27 + $0x418] sm:$0xff] %v6358_v54   ;;  %v2798_v63 = vadd.f32 %v7751_v23, %v7021_v60  ;;  %v2789_v0 = vpop.f32.mrb[113].mxu1 }
 0x1c8   : > { %v2193_v61 = vadd.f32 %v7751_v23, %v6870_v59  ;;  %v2184_v62 = vpop.f32.mrb[115].mxu0  ;;  %6579 = vst [vmem:[%s7517_s27 + $0x410] sm:$0xff] %v6353_v57   ;;  %v2790_v2 = vadd.f32 %v7751_v23, %v2789_v0  ;;  %v7022_v3 = vpop.f32.mrb[114].mxu1  ;;  %v3046_v4 = vmax.f32 %v2190_v55, 0.0 }
 0x1c9   : > { %v2185_v1 = vadd.f32 %v7751_v23, %v2184_v62  ;;  %v3198_v6 = vmax.f32 %v2798_v63, 0.0  ;;  %v2801_v7 = vadd.f32 %v7751_v23, %v7022_v3  ;;  %v2792_v8 = vpop.f32.mrb[115].mxu1  ;;  %v3044_v9 = vmax.f32 %v2182_v58, 0.0 }
 0x1ca   : > { %v3047_v5 = vmax.f32 %v2193_v61, 0.0  ;;  %v3196_v11 = vmax.f32 %v2790_v2, 0.0  ;;  %v2793_v12 = vadd.f32 %v7751_v23, %v2792_v8 }
 0x1cb   : > { %v3045_v10 = vmax.f32 %v2185_v1, 0.0  ;;  %v3199_v14 = vmax.f32 %v2801_v7, 0.0 }
 0x1cc   : > { %v5988_v13 = vpack.c.bf16 %v3047_v5, %v3046_v4  ;;  %v3197_v17 = vmax.f32 %v2793_v12, 0.0 }
 0x1cd   : > { %v5983_v15 = vpack.c.bf16 %v3045_v10, %v3044_v9  ;;  %v6873_v16 = vpop.f32.mrb[116].mxu0  ;;  %v6368_v18 = vpack.c.bf16 %v3199_v14, %v3198_v6 }
 0x1ce   : > { %6506 = vst [vmem:[%s7517_s27 + $0x1c8] sm:$0xff] %v5988_v13   ;;  %v2206_v19 = vadd.f32 %v7751_v23, %v6873_v16  ;;  %v2197_v20 = vpop.f32.mrb[117].mxu0  ;;  %v6363_v21 = vpack.c.bf16 %v3197_v17, %v3196_v11  ;;  %v7025_v25 = vpop.f32.mrb[116].mxu1 }
 0x1cf   : > { %6505 = vst [vmem:[%s7517_s27 + $0x1c0] sm:$0xff] %v5983_v15   ;;  %v2198_v22 = vadd.f32 %v7751_v23, %v2197_v20  ;;  %v6874_v24 = vpop.f32.mrb[118].mxu0  ;;  %6582 = vst [vmem:[%s7517_s27 + $0x428] sm:$0xff] %v6368_v18   ;;  %v2814_v28 = vadd.f32 %v7751_v23, %v7025_v25  ;;  %v2805_v29 = vpop.f32.mrb[117].mxu1 }
 0x1d0   : > { %v2209_v26 = vadd.f32 %v7751_v23, %v6874_v24  ;;  %v2200_v27 = vpop.f32.mrb[119].mxu0  ;;  %6581 = vst [vmem:[%s7517_s27 + $0x420] sm:$0xff] %v6363_v21   ;;  %v2806_v32 = vadd.f32 %v7948_v31, %v2805_v29  ;;  %v7026_v33 = vpop.f32.mrb[118].mxu1  ;;  %v3050_v49 = vmax.f32 %v2206_v19, 0.0 }
 0x1d1   : > { %v2201_v30 = vadd.f32 %v7751_v23, %v2200_v27  ;;  %v3202_v35 = vmax.f32 %v2814_v28, 0.0  ;;  %v2817_v36 = vadd.f32 %v7948_v31, %v7026_v33  ;;  %v2808_v37 = vpop.f32.mrb[119].mxu1  ;;  %v3048_v38 = vmax.f32 %v2198_v22, 0.0 }
 0x1d2   : > { %v3051_v34 = vmax.f32 %v2209_v26, 0.0  ;;  %v3200_v40 = vmax.f32 %v2806_v32, 0.0  ;;  %v2809_v23 = vadd.f32 %v7948_v31, %v2808_v37 }
 0x1d3   : > { %v3049_v39 = vmax.f32 %v2201_v30, 0.0  ;;  %v3203_v42 = vmax.f32 %v2817_v36, 0.0 }
 0x1d4   : > { %v5998_v41 = vpack.c.bf16 %v3051_v34, %v3050_v49  ;;  %v3201_v45 = vmax.f32 %v2809_v23, 0.0 }
 0x1d5   : > { %v5993_v43 = vpack.c.bf16 %v3049_v39, %v3048_v38  ;;  %v6877_v44 = vpop.f32.mrb[120].mxu0  ;;  %v6378_v46 = vpack.c.bf16 %v3203_v42, %v3202_v35 }
 0x1d6   : > { %6508 = vst [vmem:[%s7517_s27 + $0x1d8] sm:$0xff] %v5998_v41   ;;  %v2222_v47 = vadd.f32 %v7948_v31, %v6877_v44  ;;  %v2213_v48 = vpop.f32.mrb[121].mxu0  ;;  %v6373_v50 = vpack.c.bf16 %v3201_v45, %v3200_v40  ;;  %v7029_v53 = vpop.f32.mrb[120].mxu1 }
 0x1d7   : > { %6507 = vst [vmem:[%s7517_s27 + $0x1d0] sm:$0xff] %v5993_v43   ;;  %v2214_v51 = vadd.f32 %v7948_v31, %v2213_v48  ;;  %v6878_v52 = vpop.f32.mrb[122].mxu0  ;;  %6584 = vst [vmem:[%s7517_s27 + $0x438] sm:$0xff] %v6378_v46   ;;  %v2830_v56 = vadd.f32 %v7948_v31, %v7029_v53  ;;  %v2821_v57 = vpop.f32.mrb[121].mxu1 }
 0x1d8   : > { %v2225_v54 = vadd.f32 %v7948_v31, %v6878_v52  ;;  %v2216_v55 = vpop.f32.mrb[123].mxu0  ;;  %6583 = vst [vmem:[%s7517_s27 + $0x430] sm:$0xff] %v6373_v50   ;;  %v2822_v59 = vadd.f32 %v7948_v31, %v2821_v57  ;;  %v7030_v60 = vpop.f32.mrb[122].mxu1  ;;  %v3054_v61 = vmax.f32 %v2222_v47, 0.0 }
 0x1d9   : > { %v2217_v58 = vadd.f32 %v7948_v31, %v2216_v55  ;;  %v3206_v63 = vmax.f32 %v2830_v56, 0.0  ;;  %v2833_v0 = vadd.f32 %v7948_v31, %v7030_v60  ;;  %v2824_v1 = vpop.f32.mrb[123].mxu1  ;;  %v3052_v2 = vmax.f32 %v2214_v51, 0.0 }
 0x1da   : > { %v3055_v62 = vmax.f32 %v2225_v54, 0.0  ;;  %v3204_v4 = vmax.f32 %v2822_v59, 0.0  ;;  %v2825_v5 = vadd.f32 %v7948_v31, %v2824_v1 }
 0x1db   : > { %v3053_v3 = vmax.f32 %v2217_v58, 0.0  ;;  %v3207_v7 = vmax.f32 %v2833_v0, 0.0 }
 0x1dc   : > { %v6008_v6 = vpack.c.bf16 %v3055_v62, %v3054_v61  ;;  %v3205_v10 = vmax.f32 %v2825_v5, 0.0 }
 0x1dd   : > { %v6003_v8 = vpack.c.bf16 %v3053_v3, %v3052_v2  ;;  %v6881_v9 = vpop.f32.mrb[124].mxu0  ;;  %v6388_v11 = vpack.c.bf16 %v3207_v7, %v3206_v63 }
 0x1de   : > { %6510 = vst [vmem:[%s7517_s27 + $0x1e8] sm:$0xff] %v6008_v6   ;;  %v2238_v12 = vadd.f32 %v7948_v31, %v6881_v9  ;;  %v2229_v13 = vpop.f32.mrb[125].mxu0  ;;  %v6383_v14 = vpack.c.bf16 %v3205_v10, %v3204_v4  ;;  %v7033_v17 = vpop.f32.mrb[124].mxu1 }
 0x1df   : > { %6509 = vst [vmem:[%s7517_s27 + $0x1e0] sm:$0xff] %v6003_v8   ;;  %v2230_v15 = vadd.f32 %v7948_v31, %v2229_v13  ;;  %v6882_v16 = vpop.f32.mrb[126].mxu0  ;;  %6586 = vst [vmem:[%s7517_s27 + $0x448] sm:$0xff] %v6388_v11   ;;  %v2846_v20 = vadd.f32 %v7948_v31, %v7033_v17  ;;  %v2837_v21 = vpop.f32.mrb[125].mxu1 }
 0x1e0   : > { %v2241_v18 = vadd.f32 %v7948_v31, %v6882_v16  ;;  %v2232_v19 = vpop.f32.mrb[127].mxu0  ;;  %6585 = vst [vmem:[%s7517_s27 + $0x440] sm:$0xff] %v6383_v14   ;;  %v2838_v24 = vadd.f32 %v7948_v31, %v2837_v21  ;;  %v7034_v25 = vpop.f32.mrb[126].mxu1  ;;  %v3058_v26 = vmax.f32 %v2238_v12, 0.0 }
 0x1e1   : > { %v2233_v22 = vadd.f32 %v7948_v31, %v2232_v19  ;;  %v3210_v28 = vmax.f32 %v2846_v20, 0.0  ;;  %v2849_v29 = vadd.f32 %v7948_v31, %v7034_v25  ;;  %v2840_v30 = vpop.f32.mrb[127].mxu1  ;;  %v3056_v32 = vmax.f32 %v2230_v15, 0.0 }
 0x1e2   : > { %v3059_v27 = vmax.f32 %v2241_v18, 0.0  ;;  %v3208_v49 = vmax.f32 %v2838_v24, 0.0  ;;  %v2841_v34 = vadd.f32 %v7948_v31, %v2840_v30 }
 0x1e3   : > { %v3057_v33 = vmax.f32 %v2233_v22, 0.0  ;;  %v3211_v36 = vmax.f32 %v2849_v29, 0.0 }
 0x1e4   : > { %v6018_v35 = vpack.c.bf16 %v3059_v27, %v3058_v26  ;;  %v3209_v39 = vmax.f32 %v2841_v34, 0.0 }
 0x1e5   : > { %v6013_v37 = vpack.c.bf16 %v3057_v33, %v3056_v32  ;;  %v6885_v38 = vpop.f32.mrb[128].mxu0  ;;  %v6398_v40 = vpack.c.bf16 %v3211_v36, %v3210_v28 }
 0x1e6   : > { %6512 = vst [vmem:[%s7517_s27 + $0x1f8] sm:$0xff] %v6018_v35   ;;  %v2254_v23 = vadd.f32 %v7948_v31, %v6885_v38  ;;  %v2245_v41 = vpop.f32.mrb[129].mxu0  ;;  %v6393_v42 = vpack.c.bf16 %v3209_v39, %v3208_v49  ;;  %v7037_v45 = vpop.f32.mrb[128].mxu1 }
 0x1e7   : > { %6511 = vst [vmem:[%s7517_s27 + $0x1f0] sm:$0xff] %v6013_v37   ;;  %v2246_v43 = vadd.f32 %v7948_v31, %v2245_v41  ;;  %v6886_v44 = vpop.f32.mrb[130].mxu0  ;;  %6588 = vst [vmem:[%s7517_s27 + $0x458] sm:$0xff] %v6398_v40   ;;  %v2862_v48 = vadd.f32 %v7948_v31, %v7037_v45  ;;  %v2853_v50 = vpop.f32.mrb[129].mxu1 }
 0x1e8   : > { %v2257_v46 = vadd.f32 %v7948_v31, %v6886_v44  ;;  %v2248_v47 = vpop.f32.mrb[131].mxu0  ;;  %6587 = vst [vmem:[%s7517_s27 + $0x450] sm:$0xff] %v6393_v42   ;;  %v2854_v52 = vadd.f32 %v7948_v31, %v2853_v50  ;;  %v7038_v53 = vpop.f32.mrb[130].mxu1  ;;  %v3062_v54 = vmax.f32 %v2254_v23, 0.0 }
 0x1e9   : > { %v2249_v51 = vadd.f32 %v7948_v31, %v2248_v47  ;;  %v3214_v56 = vmax.f32 %v2862_v48, 0.0  ;;  %v2865_v57 = vadd.f32 %v7948_v31, %v7038_v53  ;;  %v2856_v58 = vpop.f32.mrb[131].mxu1  ;;  %v3060_v59 = vmax.f32 %v2246_v43, 0.0 }
 0x1ea   : > { %v3063_v55 = vmax.f32 %v2257_v46, 0.0  ;;  %v3212_v61 = vmax.f32 %v2854_v52, 0.0  ;;  %v2857_v62 = vadd.f32 %v7948_v31, %v2856_v58 }
 0x1eb   : > { %v3061_v60 = vmax.f32 %v2249_v51, 0.0  ;;  %v3215_v0 = vmax.f32 %v2865_v57, 0.0 }
 0x1ec   : > { %v6028_v63 = vpack.c.bf16 %v3063_v55, %v3062_v54  ;;  %v3213_v3 = vmax.f32 %v2857_v62, 0.0 }
 0x1ed   : > { %v6023_v1 = vpack.c.bf16 %v3061_v60, %v3060_v59  ;;  %v6889_v2 = vpop.f32.mrb[132].mxu0  ;;  %v6408_v4 = vpack.c.bf16 %v3215_v0, %v3214_v56 }
 0x1ee   : > { %6514 = vst [vmem:[%s7517_s27 + $0x208] sm:$0xff] %v6028_v63   ;;  %v2270_v5 = vadd.f32 %v7948_v31, %v6889_v2  ;;  %v2261_v6 = vpop.f32.mrb[133].mxu0  ;;  %v6403_v7 = vpack.c.bf16 %v3213_v3, %v3212_v61  ;;  %v7041_v10 = vpop.f32.mrb[132].mxu1 }
 0x1ef   : > { %6513 = vst [vmem:[%s7517_s27 + $0x200] sm:$0xff] %v6023_v1   ;;  %v2262_v8 = vadd.f32 %v7948_v31, %v2261_v6  ;;  %v6890_v9 = vpop.f32.mrb[134].mxu0  ;;  %6590 = vst [vmem:[%s7517_s27 + $0x468] sm:$0xff] %v6408_v4   ;;  %v2878_v13 = vadd.f32 %v7948_v31, %v7041_v10  ;;  %v2869_v14 = vpop.f32.mrb[133].mxu1 }
 0x1f0   : > { %v2273_v11 = vadd.f32 %v7948_v31, %v6890_v9  ;;  %v2264_v12 = vpop.f32.mrb[135].mxu0  ;;  %6589 = vst [vmem:[%s7517_s27 + $0x460] sm:$0xff] %v6403_v7   ;;  %v2870_v16 = vadd.f32 %v7948_v31, %v2869_v14  ;;  %v7042_v17 = vpop.f32.mrb[134].mxu1  ;;  %v3066_v18 = vmax.f32 %v2270_v5, 0.0 }
 0x1f1   : > { %v2265_v15 = vadd.f32 %v7948_v31, %v2264_v12  ;;  %v3218_v20 = vmax.f32 %v2878_v13, 0.0  ;;  %v2881_v21 = vadd.f32 %v7948_v31, %v7042_v17  ;;  %v2872_v22 = vpop.f32.mrb[135].mxu1  ;;  %v3064_v24 = vmax.f32 %v2262_v8, 0.0 }
 0x1f2   : > { %v3067_v19 = vmax.f32 %v2273_v11, 0.0  ;;  %v3216_v26 = vmax.f32 %v2870_v16, 0.0  ;;  %v2873_v27 = vadd.f32 %v7948_v31, %v2872_v22 }
 0x1f3   : > { %v3065_v25 = vmax.f32 %v2265_v15, 0.0  ;;  %v3219_v29 = vmax.f32 %v2881_v21, 0.0 }
 0x1f4   : > { %v6038_v28 = vpack.c.bf16 %v3067_v19, %v3066_v18  ;;  %v3217_v33 = vmax.f32 %v2873_v27, 0.0 }
 0x1f5   : > { %v6033_v30 = vpack.c.bf16 %v3065_v25, %v3064_v24  ;;  %v6893_v32 = vpop.f32.mrb[136].mxu0  ;;  %v6418_v49 = vpack.c.bf16 %v3219_v29, %v3218_v20 }
 0x1f6   : > { %6516 = vst [vmem:[%s7517_s27 + $0x218] sm:$0xff] %v6038_v28   ;;  %v2286_v34 = vadd.f32 %v7948_v31, %v6893_v32  ;;  %v2277_v35 = vpop.f32.mrb[137].mxu0  ;;  %v6413_v36 = vpack.c.bf16 %v3217_v33, %v3216_v26  ;;  %v7045_v39 = vpop.f32.mrb[136].mxu1 }
 0x1f7   : > { %6515 = vst [vmem:[%s7517_s27 + $0x210] sm:$0xff] %v6033_v30   ;;  %v2278_v37 = vadd.f32 %v7948_v31, %v2277_v35  ;;  %v6894_v38 = vpop.f32.mrb[138].mxu0  ;;  %6592 = vst [vmem:[%s7517_s27 + $0x478] sm:$0xff] %v6418_v49   ;;  %v2894_v41 = vadd.f32 %v7948_v31, %v7045_v39  ;;  %v2885_v42 = vpop.f32.mrb[137].mxu1 }
 0x1f8   : > { %v2289_v40 = vadd.f32 %v7948_v31, %v6894_v38  ;;  %v2280_v23 = vpop.f32.mrb[139].mxu0  ;;  %6591 = vst [vmem:[%s7517_s27 + $0x470] sm:$0xff] %v6413_v36   ;;  %v2886_v44 = vadd.f32 %v7948_v31, %v2885_v42  ;;  %v7046_v45 = vpop.f32.mrb[138].mxu1  ;;  %v3070_v46 = vmax.f32 %v2286_v34, 0.0 }
 0x1f9   : > { %v2281_v43 = vadd.f32 %v7948_v31, %v2280_v23  ;;  %v3222_v48 = vmax.f32 %v2894_v41, 0.0  ;;  %v2897_v50 = vadd.f32 %v7948_v31, %v7046_v45  ;;  %v2888_v51 = vpop.f32.mrb[139].mxu1  ;;  %v3068_v52 = vmax.f32 %v2278_v37, 0.0 }
 0x1fa   : > { %v3071_v47 = vmax.f32 %v2289_v40, 0.0  ;;  %v3220_v54 = vmax.f32 %v2886_v44, 0.0  ;;  %v2889_v55 = vadd.f32 %v7948_v31, %v2888_v51 }
 0x1fb   : > { %v3069_v53 = vmax.f32 %v2281_v43, 0.0  ;;  %v3223_v57 = vmax.f32 %v2897_v50, 0.0 }
 0x1fc   : > { %v6048_v56 = vpack.c.bf16 %v3071_v47, %v3070_v46  ;;  %v3221_v60 = vmax.f32 %v2889_v55, 0.0 }
 0x1fd   : > { %v6043_v58 = vpack.c.bf16 %v3069_v53, %v3068_v52  ;;  %v6897_v59 = vpop.f32.mrb[140].mxu0  ;;  %v6428_v61 = vpack.c.bf16 %v3223_v57, %v3222_v48 }
 0x1fe   : > { %6518 = vst [vmem:[%s7517_s27 + $0x228] sm:$0xff] %v6048_v56   ;;  %v2302_v62 = vadd.f32 %v7948_v31, %v6897_v59  ;;  %v2293_v63 = vpop.f32.mrb[141].mxu0  ;;  %v6423_v0 = vpack.c.bf16 %v3221_v60, %v3220_v54  ;;  %v7049_v3 = vpop.f32.mrb[140].mxu1 }
 0x1ff   : > { %6517 = vst [vmem:[%s7517_s27 + $0x220] sm:$0xff] %v6043_v58   ;;  %v2294_v1 = vadd.f32 %v7948_v31, %v2293_v63  ;;  %v6898_v2 = vpop.f32.mrb[142].mxu0  ;;  %6594 = vst [vmem:[%s7517_s27 + $0x488] sm:$0xff] %v6428_v61   ;;  %v2910_v6 = vadd.f32 %v7948_v31, %v7049_v3  ;;  %v2901_v7 = vpop.f32.mrb[141].mxu1 }
 0x200   : > { %v2305_v4 = vadd.f32 %v7948_v31, %v6898_v2  ;;  %v2296_v5 = vpop.f32.mrb[143].mxu0  ;;  %6593 = vst [vmem:[%s7517_s27 + $0x480] sm:$0xff] %v6423_v0   ;;  %v2902_v9 = vadd.f32 %v7948_v31, %v2901_v7  ;;  %v7050_v10 = vpop.f32.mrb[142].mxu1  ;;  %v3074_v11 = vmax.f32 %v2302_v62, 0.0 }
 0x201   : > { %v2297_v8 = vadd.f32 %v7948_v31, %v2296_v5  ;;  %v3226_v13 = vmax.f32 %v2910_v6, 0.0  ;;  %v2913_v14 = vadd.f32 %v7948_v31, %v7050_v10  ;;  %v2904_v15 = vpop.f32.mrb[143].mxu1  ;;  %v3072_v16 = vmax.f32 %v2294_v1, 0.0 }
 0x202   : > { %v3075_v12 = vmax.f32 %v2305_v4, 0.0  ;;  %v3224_v18 = vmax.f32 %v2902_v9, 0.0  ;;  %v2905_v19 = vadd.f32 %v7948_v31, %v2904_v15 }
 0x203   : > { %v3073_v17 = vmax.f32 %v2297_v8, 0.0  ;;  %v3227_v21 = vmax.f32 %v2913_v14, 0.0 }
 0x204   : > { %v6058_v20 = vpack.c.bf16 %v3075_v12, %v3074_v11  ;;  %v3225_v25 = vmax.f32 %v2905_v19, 0.0 }
 0x205   : > { %v6053_v22 = vpack.c.bf16 %v3073_v17, %v3072_v16  ;;  %v6901_v24 = vpop.f32.mrb[144].mxu0  ;;  %v6438_v26 = vpack.c.bf16 %v3227_v21, %v3226_v13 }
 0x206   : > { %6520 = vst [vmem:[%s7517_s27 + $0x238] sm:$0xff] %v6058_v20   ;;  %v2318_v27 = vadd.f32 %v7948_v31, %v6901_v24  ;;  %v2309_v28 = vpop.f32.mrb[145].mxu0  ;;  %v6433_v29 = vpack.c.bf16 %v3225_v25, %v3224_v18  ;;  %v7053_v33 = vpop.f32.mrb[144].mxu1 }
 0x207   : > { %6519 = vst [vmem:[%s7517_s27 + $0x230] sm:$0xff] %v6053_v22   ;;  %v2310_v30 = vadd.f32 %v7948_v31, %v2309_v28  ;;  %v6902_v32 = vpop.f32.mrb[146].mxu0  ;;  %6596 = vst [vmem:[%s7517_s27 + $0x498] sm:$0xff] %v6438_v26   ;;  %v2926_v35 = vadd.f32 %v7948_v31, %v7053_v33  ;;  %v2917_v36 = vpop.f32.mrb[145].mxu1 }
 0x208   : > { %v2321_v49 = vadd.f32 %v7948_v31, %v6902_v32  ;;  %v2312_v34 = vpop.f32.mrb[147].mxu0  ;;  %6595 = vst [vmem:[%s7517_s27 + $0x490] sm:$0xff] %v6433_v29   ;;  %v2918_v38 = vadd.f32 %v7948_v31, %v2917_v36  ;;  %v7054_v39 = vpop.f32.mrb[146].mxu1  ;;  %v3078_v40 = vmax.f32 %v2318_v27, 0.0 }
 0x209   : > { %v2313_v37 = vadd.f32 %v7948_v31, %v2312_v34  ;;  %v3230_v41 = vmax.f32 %v2926_v35, 0.0  ;;  %v2929_v42 = vadd.f32 %v7948_v31, %v7054_v39  ;;  %v2920_v43 = vpop.f32.mrb[147].mxu1  ;;  %v3076_v44 = vmax.f32 %v2310_v30, 0.0 }
 0x20a   : > { %v3079_v23 = vmax.f32 %v2321_v49, 0.0  ;;  %v3228_v46 = vmax.f32 %v2918_v38, 0.0  ;;  %v2921_v47 = vadd.f32 %v7948_v31, %v2920_v43 }
 0x20b   : > { %v3077_v45 = vmax.f32 %v2313_v37, 0.0  ;;  %v3231_v50 = vmax.f32 %v2929_v42, 0.0 }
 0x20c   : > { %v6068_v48 = vpack.c.bf16 %v3079_v23, %v3078_v40  ;;  %v3229_v53 = vmax.f32 %v2921_v47, 0.0 }
 0x20d   : > { %v6063_v51 = vpack.c.bf16 %v3077_v45, %v3076_v44  ;;  %v6905_v52 = vpop.f32.mrb[148].mxu0  ;;  %v6448_v54 = vpack.c.bf16 %v3231_v50, %v3230_v41 }
 0x20e   : > { %6522 = vst [vmem:[%s7517_s27 + $0x248] sm:$0xff] %v6068_v48   ;;  %v2334_v55 = vadd.f32 %v7948_v31, %v6905_v52  ;;  %v2325_v56 = vpop.f32.mrb[149].mxu0  ;;  %v6443_v57 = vpack.c.bf16 %v3229_v53, %v3228_v46 }
 0x20f   : > { %6521 = vst [vmem:[%s7517_s27 + $0x240] sm:$0xff] %v6063_v51   ;;  %v2326_v58 = vadd.f32 %v7948_v31, %v2325_v56  ;;  %v6906_v59 = vpop.f32.mrb[150].mxu0  ;;  %6598 = vst [vmem:[%s7517_s27 + $0x4a8] sm:$0xff] %v6448_v54  }
 0x210   : > { %v2337_v60 = vadd.f32 %v7948_v31, %v6906_v59  ;;  %v2328_v61 = vpop.f32.mrb[151].mxu0  ;;  %6597 = vst [vmem:[%s7517_s27 + $0x4a0] sm:$0xff] %v6443_v57   ;;  %v3082_v63 = vmax.f32 %v2334_v55, 0.0 }
 0x211   : > { %v2329_v62 = vadd.f32 %v7948_v31, %v2328_v61  ;;  %v3080_v1 = vmax.f32 %v2326_v58, 0.0 }
 0x212   : > { %v3083_v0 = vmax.f32 %v2337_v60, 0.0 }
 0x213   : > { %v3081_v2 = vmax.f32 %v2329_v62, 0.0 }
 0x214   : > { %v6078_v3 = vpack.c.bf16 %v3083_v0, %v3082_v63 }
 0x215   : > { %v6073_v4 = vpack.c.bf16 %v3081_v2, %v3080_v1 }
 0x216   : > { %6524 = vst [vmem:[%s7517_s27 + $0x258] sm:$0xff] %v6078_v3  }
 0x217   : > { %6523 = vst [vmem:[%s7517_s27 + $0x250] sm:$0xff] %v6073_v4  }
 0x218 PF: > { %s13_s12 = sadd.s32 1, %s7229_s12  }
 0x219   : > { %p10_p4 = scmp.ge.s32.totalorder %s13_s12, 4  }
 0x21b   :  { %12 = sbr.rel (!%p10_p4) target bundleno = 1 (0x1), region = 62 }

// kernel: encoder_tactile_forward.6
= control target key start
LH: loop header
LB: loop body
LE: loop exit
PB: predicated region body
PF: predicated region fallthrough
CT: control target
= control target key end

     0   :  { %v2681_v0 = vmov 0   ;;  %vm652_vm0 = vcmask 261120   ;;  %s3337_s1 = inlined_call_operand.vmem [shape: bf16[160,128], index: 1, kind: input, shape index: {}]   ;;  %s3338_s0 = inlined_call_operand.vmem [shape: bf16[800,160], index: 0, kind: input, shape index: {}]   ;;  %s3339_s2 = inlined_call_operand.vmem [shape: f32[1,128], index: 2, kind: input, shape index: {}]   ;;  %s3340_s3 = inlined_call_operand.vmem [shape: bf16[800,128], index: 3, kind: output, shape index: {}]  }
   0x1   :  { %803 = vmatprep.subr.bf16.mxu0 %v2681_v0  ;;  %2500 = vmatprep.subr.bf16.mxu1 %v2681_v0  ;;  %v2521_v1 = vld [vmem:[%s3337_s1] sm:$0xff]   ;;  %v2522_v2 = vld [vmem:[%s3337_s1 + $0x8] sm:$0xff]   ;;  %v2523_v3 = vld [vmem:[%s3337_s1 + $0x10] sm:$0xff]  }
   0x2   :  { %804 = vmatpush1.bf16.msra.mxu0 %v2521_v1  ;;  %2510 = vmatpush1.bf16.msra.mxu1 %v2521_v1  ;;  %v2524_v4 = vld [vmem:[%s3337_s1 + $0x18] sm:$0xff]   ;;  %v2533_v5 = vld [vmem:[%s3338_s0 + $0x4] ss:$8 sps:$4 sm:$0xff]   ;;  %v2527_v9 = vld [vmem:[%s3337_s1 + $0x30] sm:$0xff]  }
   0x3   :  { %805 = vmatprep.subr.bf16.mxu0 %v2681_v0  ;;  %2501 = vmatprep.subr.bf16.mxu1 %v2681_v0  ;;  %v2536_v6 = vld [vmem:[%s3338_s0 + $0x194] ss:$8 sps:$4 sm:$0xff]   ;;  %v2525_v7 = vld [vmem:[%s3337_s1 + $0x20] sm:$0xff]   ;;  %v2526_v8 = vld [vmem:[%s3337_s1 + $0x28] sm:$0xff]  }
   0x4   :  { %1951 = vmatprep.mubr.msk.bf16.mxu0 %vm652_vm0, %v2533_v5  ;;  %1976 = vmatprep.mubr.msk.bf16.mxu1 %vm652_vm0, %v2536_v6  ;;  %v2528_v10 = vld [vmem:[%s3337_s1 + $0x38] sm:$0xff]   ;;  %v2529_v11 = vld [vmem:[%s3337_s1 + $0x40] sm:$0xff]   ;;  %v2530_v12 = vld [vmem:[%s3337_s1 + $0x48] sm:$0xff]  }
   0x5   :  { %v2531_v13 = vld [vmem:[%s3338_s0] ss:$8 sps:$4 sm:$0xff]   ;;  %v2534_v14 = vld [vmem:[%s3338_s0 + $0x190] ss:$8 sps:$4 sm:$0xff]   ;;  %v2537_v15 = vld [vmem:[%s3338_s0 + $0x14] ss:$8 sps:$4 sm:$0xff]  }
   0x6   :  { %806 = vmatpush1.bf16.msra.mxu0 %v2522_v2  ;;  %2511 = vmatpush1.bf16.msra.mxu1 %v2522_v2  ;;  %v2539_v16 = vld [vmem:[%s3338_s0 + $0x1a4] ss:$8 sps:$4 sm:$0xff]   ;;  %v2541_v17 = vld [vmem:[%s3338_s0 + $0x10] ss:$8 sps:$4 sm:$0xff]   ;;  %v2542_v18 = vld [vmem:[%s3338_s0 + $0x1a0] ss:$8 sps:$4 sm:$0xff]  }
   0x7   :  { %807 = vmatprep.subr.bf16.mxu0 %v2681_v0  ;;  %2502 = vmatprep.subr.bf16.mxu1 %v2681_v0  ;;  %v2543_v19 = vld [vmem:[%s3338_s0 + $0x24] ss:$8 sps:$4 sm:$0xff]   ;;  %v2545_v20 = vld [vmem:[%s3338_s0 + $0x1b4] ss:$8 sps:$4 sm:$0xff]   ;;  %v2547_v21 = vld [vmem:[%s3338_s0 + $0x20] ss:$8 sps:$4 sm:$0xff]  }
   0x8   :  { %v2548_v22 = vld [vmem:[%s3338_s0 + $0x1b0] ss:$8 sps:$4 sm:$0xff]   ;;  %v2549_v23 = vld [vmem:[%s3338_s0 + $0x34] ss:$8 sps:$4 sm:$0xff]   ;;  %v2551_v24 = vld [vmem:[%s3338_s0 + $0x1c4] ss:$8 sps:$4 sm:$0xff]  }
   0x9   :  { %v2553_v25 = vld [vmem:[%s3338_s0 + $0x30] ss:$8 sps:$4 sm:$0xff]   ;;  %v2554_v26 = vld [vmem:[%s3338_s0 + $0x1c0] ss:$8 sps:$4 sm:$0xff]   ;;  %v2555_v27 = vld [vmem:[%s3338_s0 + $0x44] ss:$8 sps:$4 sm:$0xff]  }
   0xa   :  { %808 = vmatpush1.bf16.msra.mxu0 %v2523_v3  ;;  %2512 = vmatpush1.bf16.msra.mxu1 %v2523_v3  ;;  %v2557_v28 = vld [vmem:[%s3338_s0 + $0x1d4] ss:$8 sps:$4 sm:$0xff]   ;;  %v2559_v29 = vld [vmem:[%s3338_s0 + $0x40] ss:$8 sps:$4 sm:$0xff]   ;;  %v2560_v30 = vld [vmem:[%s3338_s0 + $0x1d0] ss:$8 sps:$4 sm:$0xff]  }
   0xb   :  { %809 = vmatprep.subr.bf16.mxu0 %v2681_v0  ;;  %2503 = vmatprep.subr.bf16.mxu1 %v2681_v0  ;;  %v2561_v31 = vld [vmem:[%s3338_s0 + $0x54] ss:$8 sps:$4 sm:$0xff]   ;;  %v2563_v32 = vld [vmem:[%s3338_s0 + $0x1e4] ss:$8 sps:$4 sm:$0xff]   ;;  %v2565_v33 = vld [vmem:[%s3338_s0 + $0x50] ss:$8 sps:$4 sm:$0xff]  }
   0xc   :  { %v2566_v34 = vld [vmem:[%s3338_s0 + $0x1e0] ss:$8 sps:$4 sm:$0xff]   ;;  %v2567_v35 = vld [vmem:[%s3338_s0 + $0x64] ss:$8 sps:$4 sm:$0xff]   ;;  %v2569_v36 = vld [vmem:[%s3338_s0 + $0x1f4] ss:$8 sps:$4 sm:$0xff]  }
   0xd   :  { %v2571_v37 = vld [vmem:[%s3338_s0 + $0x60] ss:$8 sps:$4 sm:$0xff]   ;;  %v2572_v38 = vld [vmem:[%s3338_s0 + $0x1f0] ss:$8 sps:$4 sm:$0xff]   ;;  %v2573_v39 = vld [vmem:[%s3338_s0 + $0x74] ss:$8 sps:$4 sm:$0xff]  }
   0xe   :  { %810 = vmatpush1.bf16.msra.mxu0 %v2524_v4  ;;  %2513 = vmatpush1.bf16.msra.mxu1 %v2524_v4  ;;  %v2575_v40 = vld [vmem:[%s3338_s0 + $0x204] ss:$8 sps:$4 sm:$0xff]   ;;  %v2577_v41 = vld [vmem:[%s3338_s0 + $0x70] ss:$8 sps:$4 sm:$0xff]   ;;  %v2578_v42 = vld [vmem:[%s3338_s0 + $0x200] ss:$8 sps:$4 sm:$0xff]  }
   0xf   :  { %811 = vmatprep.subr.bf16.mxu0 %v2681_v0  ;;  %2504 = vmatprep.subr.bf16.mxu1 %v2681_v0  ;;  %v2579_v43 = vld [vmem:[%s3338_s0 + $0x84] ss:$8 sps:$4 sm:$0xff]   ;;  %v2581_v44 = vld [vmem:[%s3338_s0 + $0x214] ss:$8 sps:$4 sm:$0xff]   ;;  %v2583_v45 = vld [vmem:[%s3338_s0 + $0x80] ss:$8 sps:$4 sm:$0xff]  }
  0x10   :  { %v2584_v46 = vld [vmem:[%s3338_s0 + $0x210] ss:$8 sps:$4 sm:$0xff]   ;;  %v2585_v47 = vld [vmem:[%s3338_s0 + $0x94] ss:$8 sps:$4 sm:$0xff]   ;;  %v2587_v48 = vld [vmem:[%s3338_s0 + $0x224] ss:$8 sps:$4 sm:$0xff]  }
  0x11   :  { %v2589_v49 = vld [vmem:[%s3338_s0 + $0x90] ss:$8 sps:$4 sm:$0xff]   ;;  %v2590_v50 = vld [vmem:[%s3338_s0 + $0x220] ss:$8 sps:$4 sm:$0xff]   ;;  %v2591_v51 = vld [vmem:[%s3338_s0 + $0xa4] ss:$8 sps:$4 sm:$0xff]  }
  0x12   :  { %812 = vmatpush1.bf16.msra.mxu0 %v2525_v7  ;;  %2514 = vmatpush1.bf16.msra.mxu1 %v2525_v7  ;;  %v2593_v52 = vld [vmem:[%s3338_s0 + $0x234] ss:$8 sps:$4 sm:$0xff]   ;;  %v2595_v53 = vld [vmem:[%s3338_s0 + $0xa0] ss:$8 sps:$4 sm:$0xff]   ;;  %v2596_v54 = vld [vmem:[%s3338_s0 + $0x230] ss:$8 sps:$4 sm:$0xff]  }
  0x13   :  { %813 = vmatprep.subr.bf16.mxu0 %v2681_v0  ;;  %2505 = vmatprep.subr.bf16.mxu1 %v2681_v0  ;;  %v2597_v55 = vld [vmem:[%s3338_s0 + $0xb4] ss:$8 sps:$4 sm:$0xff]   ;;  %v2599_v56 = vld [vmem:[%s3338_s0 + $0x244] ss:$8 sps:$4 sm:$0xff]   ;;  %v2601_v57 = vld [vmem:[%s3338_s0 + $0xb0] ss:$8 sps:$4 sm:$0xff]  }
  0x14   :  { %v2602_v58 = vld [vmem:[%s3338_s0 + $0x240] ss:$8 sps:$4 sm:$0xff]   ;;  %v2603_v59 = vld [vmem:[%s3338_s0 + $0xc4] ss:$8 sps:$4 sm:$0xff]   ;;  %v2605_v60 = vld [vmem:[%s3338_s0 + $0x254] ss:$8 sps:$4 sm:$0xff]  }
  0x15   :  { %v2607_v61 = vld [vmem:[%s3338_s0 + $0xc0] ss:$8 sps:$4 sm:$0xff]   ;;  %v2608_v62 = vld [vmem:[%s3338_s0 + $0x250] ss:$8 sps:$4 sm:$0xff]   ;;  %v2609_v63 = vld [vmem:[%s3338_s0 + $0xd4] ss:$8 sps:$4 sm:$0xff]  }
  0x16   :  { %814 = vmatpush1.bf16.msra.mxu0 %v2526_v8  ;;  %2515 = vmatpush1.bf16.msra.mxu1 %v2526_v8  ;;  %v2613_v1 = vld [vmem:[%s3338_s0 + $0xd0] ss:$8 sps:$4 sm:$0xff]   ;;  %v2614_v2 = vld [vmem:[%s3338_s0 + $0x260] ss:$8 sps:$4 sm:$0xff]   ;;  %v2615_v3 = vld [vmem:[%s3338_s0 + $0xe4] ss:$8 sps:$4 sm:$0xff]  }
  0x17   :  { %815 = vmatprep.subr.bf16.mxu0 %v2681_v0  ;;  %2506 = vmatprep.subr.bf16.mxu1 %v2681_v0  ;;  %v2617_v4 = vld [vmem:[%s3338_s0 + $0x274] ss:$8 sps:$4 sm:$0xff]   ;;  %v2619_v5 = vld [vmem:[%s3338_s0 + $0xe0] ss:$8 sps:$4 sm:$0xff]   ;;  %v2620_v6 = vld [vmem:[%s3338_s0 + $0x270] ss:$8 sps:$4 sm:$0xff]  }
  0x18   :  { %v2621_v7 = vld [vmem:[%s3338_s0 + $0xf4] ss:$8 sps:$4 sm:$0xff]   ;;  %v2623_v8 = vld [vmem:[%s3338_s0 + $0x284] ss:$8 sps:$4 sm:$0xff]  }
  0x1a   :  { %816 = vmatpush1.bf16.msra.mxu0 %v2527_v9  ;;  %2516 = vmatpush1.bf16.msra.mxu1 %v2527_v9  ;;  %v2625_v9 = vld [vmem:[%s3338_s0 + $0xf0] ss:$8 sps:$4 sm:$0xff]  }
  0x1b   :  { %817 = vmatprep.subr.bf16.mxu0 %v2681_v0  ;;  %2507 = vmatprep.subr.bf16.mxu1 %v2681_v0 }
  0x1e   :  { %818 = vmatpush1.bf16.msra.mxu0 %v2528_v10  ;;  %2517 = vmatpush1.bf16.msra.mxu1 %v2528_v10  ;;  %v2626_v10 = vld [vmem:[%s3338_s0 + $0x280] ss:$8 sps:$4 sm:$0xff]  }
  0x1f   :  { %819 = vmatprep.subr.bf16.mxu0 %v2681_v0  ;;  %2508 = vmatprep.subr.bf16.mxu1 %v2681_v0 }
  0x22   :  { %820 = vmatpush1.bf16.msra.mxu0 %v2529_v11  ;;  %2518 = vmatpush1.bf16.msra.mxu1 %v2529_v11  ;;  %v2627_v11 = vld [vmem:[%s3338_s0 + $0x104] ss:$8 sps:$4 sm:$0xff]  }
  0x23   :  { %821 = vmatprep.subr.bf16.mxu0 %v2681_v0  ;;  %2509 = vmatprep.subr.bf16.mxu1 %v2681_v0  ;;  %v2611_v0 = vld [vmem:[%s3338_s0 + $0x264] ss:$8 sps:$4 sm:$0xff]  }
  0x26   :  { %822 = vmatpush1.bf16.msra.mxu0 %v2530_v12  ;;  %2519 = vmatpush1.bf16.msra.mxu1 %v2530_v12  ;;  %v2629_v12 = vld [vmem:[%s3338_s0 + $0x294] ss:$8 sps:$4 sm:$0xff]  }
  0x29   :  { %836 = vmatmul.mubr.bf16.vlgmr.msra.gmra.mrb[0].mxu0 %v2531_v13  ;;  %1036 = vmatmul.mubr.bf16.vlgmr.msra.gmra.mrb[0].mxu1 %v2534_v14  ;;  %v2631_v13 = vld [vmem:[%s3338_s0 + $0x100] ss:$8 sps:$4 sm:$0xff]   ;;  %v2632_v14 = vld [vmem:[%s3338_s0 + $0x290] ss:$8 sps:$4 sm:$0xff]  }
  0x2a   :  { %1952 = vmatprep.mubr.msk.bf16.mxu0 %vm652_vm0, %v2537_v15  ;;  %1977 = vmatprep.mubr.msk.bf16.mxu1 %vm652_vm0, %v2539_v16  ;;  %v2633_v15 = vld [vmem:[%s3338_s0 + $0x114] ss:$8 sps:$4 sm:$0xff]   ;;  %v2635_v16 = vld [vmem:[%s3338_s0 + $0x2a4] ss:$8 sps:$4 sm:$0xff]  }
  0x31   :  { %844 = vmatmul.mubr.bf16.gmra.mrb[4].mxu0 %v2541_v17  ;;  %1044 = vmatmul.mubr.bf16.gmra.mrb[4].mxu1 %v2542_v18  ;;  %v2637_v17 = vld [vmem:[%s3338_s0 + $0x110] ss:$8 sps:$4 sm:$0xff]   ;;  %v2638_v18 = vld [vmem:[%s3338_s0 + $0x2a0] ss:$8 sps:$4 sm:$0xff]  }
  0x32   :  { %1953 = vmatprep.mubr.msk.bf16.mxu0 %vm652_vm0, %v2543_v19  ;;  %1978 = vmatprep.mubr.msk.bf16.mxu1 %vm652_vm0, %v2545_v20  ;;  %v2639_v19 = vld [vmem:[%s3338_s0 + $0x124] ss:$8 sps:$4 sm:$0xff]   ;;  %v2641_v20 = vld [vmem:[%s3338_s0 + $0x2b4] ss:$8 sps:$4 sm:$0xff]  }
  0x39   :  { %852 = vmatmul.mubr.bf16.gmra.mrb[8].mxu0 %v2547_v21  ;;  %1052 = vmatmul.mubr.bf16.gmra.mrb[8].mxu1 %v2548_v22  ;;  %v2643_v21 = vld [vmem:[%s3338_s0 + $0x120] ss:$8 sps:$4 sm:$0xff]   ;;  %v2644_v22 = vld [vmem:[%s3338_s0 + $0x2b0] ss:$8 sps:$4 sm:$0xff]  }
  0x3a   :  { %1954 = vmatprep.mubr.msk.bf16.mxu0 %vm652_vm0, %v2549_v23  ;;  %1979 = vmatprep.mubr.msk.bf16.mxu1 %vm652_vm0, %v2551_v24  ;;  %v2645_v23 = vld [vmem:[%s3338_s0 + $0x134] ss:$8 sps:$4 sm:$0xff]   ;;  %v2647_v24 = vld [vmem:[%s3338_s0 + $0x2c4] ss:$8 sps:$4 sm:$0xff]  }
  0x41   :  { %860 = vmatmul.mubr.bf16.gmra.mrb[12].mxu0 %v2553_v25  ;;  %1060 = vmatmul.mubr.bf16.gmra.mrb[12].mxu1 %v2554_v26  ;;  %v2649_v25 = vld [vmem:[%s3338_s0 + $0x130] ss:$8 sps:$4 sm:$0xff]   ;;  %v2650_v26 = vld [vmem:[%s3338_s0 + $0x2c0] ss:$8 sps:$4 sm:$0xff]  }
  0x42   :  { %1955 = vmatprep.mubr.msk.bf16.mxu0 %vm652_vm0, %v2555_v27  ;;  %1980 = vmatprep.mubr.msk.bf16.mxu1 %vm652_vm0, %v2557_v28  ;;  %v2651_v27 = vld [vmem:[%s3338_s0 + $0x144] ss:$8 sps:$4 sm:$0xff]   ;;  %v2653_v28 = vld [vmem:[%s3338_s0 + $0x2d4] ss:$8 sps:$4 sm:$0xff]  }
  0x49   :  { %868 = vmatmul.mubr.bf16.gmra.mrb[16].mxu0 %v2559_v29  ;;  %1068 = vmatmul.mubr.bf16.gmra.mrb[16].mxu1 %v2560_v30  ;;  %v2655_v29 = vld [vmem:[%s3338_s0 + $0x140] ss:$8 sps:$4 sm:$0xff]   ;;  %v2656_v30 = vld [vmem:[%s3338_s0 + $0x2d0] ss:$8 sps:$4 sm:$0xff]  }
  0x4a   :  { %1956 = vmatprep.mubr.msk.bf16.mxu0 %vm652_vm0, %v2561_v31  ;;  %1981 = vmatprep.mubr.msk.bf16.mxu1 %vm652_vm0, %v2563_v32  ;;  %v2657_v31 = vld [vmem:[%s3338_s0 + $0x154] ss:$8 sps:$4 sm:$0xff]   ;;  %v2659_v32 = vld [vmem:[%s3338_s0 + $0x2e4] ss:$8 sps:$4 sm:$0xff]  }
  0x51   :  { %876 = vmatmul.mubr.bf16.gmra.mrb[20].mxu0 %v2565_v33  ;;  %1076 = vmatmul.mubr.bf16.gmra.mrb[20].mxu1 %v2566_v34  ;;  %v2661_v33 = vld [vmem:[%s3338_s0 + $0x150] ss:$8 sps:$4 sm:$0xff]   ;;  %v2662_v34 = vld [vmem:[%s3338_s0 + $0x2e0] ss:$8 sps:$4 sm:$0xff]  }
  0x52   :  { %1957 = vmatprep.mubr.msk.bf16.mxu0 %vm652_vm0, %v2567_v35  ;;  %1982 = vmatprep.mubr.msk.bf16.mxu1 %vm652_vm0, %v2569_v36  ;;  %v2663_v35 = vld [vmem:[%s3338_s0 + $0x164] ss:$8 sps:$4 sm:$0xff]   ;;  %v2665_v36 = vld [vmem:[%s3338_s0 + $0x2f4] ss:$8 sps:$4 sm:$0xff]  }
  0x59   :  { %884 = vmatmul.mubr.bf16.gmra.mrb[24].mxu0 %v2571_v37  ;;  %1084 = vmatmul.mubr.bf16.gmra.mrb[24].mxu1 %v2572_v38  ;;  %v2667_v37 = vld [vmem:[%s3338_s0 + $0x160] ss:$8 sps:$4 sm:$0xff]   ;;  %v2668_v38 = vld [vmem:[%s3338_s0 + $0x2f0] ss:$8 sps:$4 sm:$0xff]  }
  0x5a   :  { %1958 = vmatprep.mubr.msk.bf16.mxu0 %vm652_vm0, %v2573_v39  ;;  %1983 = vmatprep.mubr.msk.bf16.mxu1 %vm652_vm0, %v2575_v40  ;;  %v2669_v39 = vld [vmem:[%s3338_s0 + $0x174] ss:$8 sps:$4 sm:$0xff]   ;;  %v2671_v40 = vld [vmem:[%s3338_s0 + $0x304] ss:$8 sps:$4 sm:$0xff]  }
  0x61   :  { %892 = vmatmul.mubr.bf16.gmra.mrb[28].mxu0 %v2577_v41  ;;  %1092 = vmatmul.mubr.bf16.gmra.mrb[28].mxu1 %v2578_v42  ;;  %v2673_v41 = vld [vmem:[%s3338_s0 + $0x170] ss:$8 sps:$4 sm:$0xff]   ;;  %v2674_v42 = vld [vmem:[%s3338_s0 + $0x300] ss:$8 sps:$4 sm:$0xff]  }
  0x62   :  { %1959 = vmatprep.mubr.msk.bf16.mxu0 %vm652_vm0, %v2579_v43  ;;  %1984 = vmatprep.mubr.msk.bf16.mxu1 %vm652_vm0, %v2581_v44  ;;  %v2675_v43 = vld [vmem:[%s3338_s0 + $0x184] ss:$8 sps:$4 sm:$0xff]   ;;  %v2677_v44 = vld [vmem:[%s3338_s0 + $0x314] ss:$8 sps:$4 sm:$0xff]  }
  0x69   :  { %900 = vmatmul.mubr.bf16.gmra.mrb[32].mxu0 %v2583_v45  ;;  %1100 = vmatmul.mubr.bf16.gmra.mrb[32].mxu1 %v2584_v46  ;;  %v2679_v45 = vld [vmem:[%s3338_s0 + $0x180] ss:$8 sps:$4 sm:$0xff]   ;;  %v2680_v46 = vld [vmem:[%s3338_s0 + $0x310] ss:$8 sps:$4 sm:$0xff]  }
  0x6a   :  { %1960 = vmatprep.mubr.msk.bf16.mxu0 %vm652_vm0, %v2585_v47  ;;  %1985 = vmatprep.mubr.msk.bf16.mxu1 %vm652_vm0, %v2587_v48  ;;  %v3085_v47 = vld [vmem:[%s3339_s2] ss:$0 sm:$0xff] }
  0x71   :  { %908 = vmatmul.mubr.bf16.gmra.mrb[36].mxu0 %v2589_v49  ;;  %1108 = vmatmul.mubr.bf16.gmra.mrb[36].mxu1 %v2590_v50 }
  0x72   :  { %1961 = vmatprep.mubr.msk.bf16.mxu0 %vm652_vm0, %v2591_v51  ;;  %1986 = vmatprep.mubr.msk.bf16.mxu1 %vm652_vm0, %v2593_v52 }
  0x79   :  { %916 = vmatmul.mubr.bf16.gmra.mrb[40].mxu0 %v2595_v53  ;;  %1116 = vmatmul.mubr.bf16.gmra.mrb[40].mxu1 %v2596_v54 }
  0x7a   :  { %1962 = vmatprep.mubr.msk.bf16.mxu0 %vm652_vm0, %v2597_v55  ;;  %1987 = vmatprep.mubr.msk.bf16.mxu1 %vm652_vm0, %v2599_v56 }
  0x81   :  { %924 = vmatmul.mubr.bf16.gmra.mrb[44].mxu0 %v2601_v57  ;;  %1124 = vmatmul.mubr.bf16.gmra.mrb[44].mxu1 %v2602_v58 }
  0x82   :  { %1963 = vmatprep.mubr.msk.bf16.mxu0 %vm652_vm0, %v2603_v59  ;;  %1988 = vmatprep.mubr.msk.bf16.mxu1 %vm652_vm0, %v2605_v60 }
  0x89   :  { %932 = vmatmul.mubr.bf16.gmra.mrb[48].mxu0 %v2607_v61  ;;  %1132 = vmatmul.mubr.bf16.gmra.mrb[48].mxu1 %v2608_v62 }
  0x8a   :  { %1964 = vmatprep.mubr.msk.bf16.mxu0 %vm652_vm0, %v2609_v63  ;;  %1989 = vmatprep.mubr.msk.bf16.mxu1 %vm652_vm0, %v2611_v0 }
  0x91   :  { %940 = vmatmul.mubr.bf16.gmra.mrb[52].mxu0 %v2613_v1  ;;  %1140 = vmatmul.mubr.bf16.gmra.mrb[52].mxu1 %v2614_v2 }
  0x92   :  { %1965 = vmatprep.mubr.msk.bf16.mxu0 %vm652_vm0, %v2615_v3  ;;  %1990 = vmatprep.mubr.msk.bf16.mxu1 %vm652_vm0, %v2617_v4 }
  0x99   :  { %948 = vmatmul.mubr.bf16.gmra.mrb[56].mxu0 %v2619_v5  ;;  %1148 = vmatmul.mubr.bf16.gmra.mrb[56].mxu1 %v2620_v6 }
  0x9a   :  { %1966 = vmatprep.mubr.msk.bf16.mxu0 %vm652_vm0, %v2621_v7  ;;  %1991 = vmatprep.mubr.msk.bf16.mxu1 %vm652_vm0, %v2623_v8 }
  0xa1   :  { %956 = vmatmul.mubr.bf16.gmra.mrb[60].mxu0 %v2625_v9  ;;  %1156 = vmatmul.mubr.bf16.gmra.mrb[60].mxu1 %v2626_v10 }
  0xa2   :  { %1967 = vmatprep.mubr.msk.bf16.mxu0 %vm652_vm0, %v2627_v11  ;;  %1992 = vmatprep.mubr.msk.bf16.mxu1 %vm652_vm0, %v2629_v12 }
  0xa9   :  { %964 = vmatmul.mubr.bf16.gmra.mrb[64].mxu0 %v2631_v13  ;;  %1164 = vmatmul.mubr.bf16.gmra.mrb[64].mxu1 %v2632_v14 }
  0xaa   :  { %1968 = vmatprep.mubr.msk.bf16.mxu0 %vm652_vm0, %v2633_v15  ;;  %1993 = vmatprep.mubr.msk.bf16.mxu1 %vm652_vm0, %v2635_v16 }
  0xb1   :  { %972 = vmatmul.mubr.bf16.gmra.mrb[68].mxu0 %v2637_v17  ;;  %1172 = vmatmul.mubr.bf16.gmra.mrb[68].mxu1 %v2638_v18 }
  0xb2   :  { %1969 = vmatprep.mubr.msk.bf16.mxu0 %vm652_vm0, %v2639_v19  ;;  %1994 = vmatprep.mubr.msk.bf16.mxu1 %vm652_vm0, %v2641_v20 }
  0xb9   :  { %980 = vmatmul.mubr.bf16.gmra.mrb[72].mxu0 %v2643_v21  ;;  %1180 = vmatmul.mubr.bf16.gmra.mrb[72].mxu1 %v2644_v22 }
  0xba   :  { %1970 = vmatprep.mubr.msk.bf16.mxu0 %vm652_vm0, %v2645_v23  ;;  %1995 = vmatprep.mubr.msk.bf16.mxu1 %vm652_vm0, %v2647_v24 }
  0xc1   :  { %988 = vmatmul.mubr.bf16.gmra.mrb[76].mxu0 %v2649_v25  ;;  %1188 = vmatmul.mubr.bf16.gmra.mrb[76].mxu1 %v2650_v26 }
  0xc2   :  { %1971 = vmatprep.mubr.msk.bf16.mxu0 %vm652_vm0, %v2651_v27  ;;  %1996 = vmatprep.mubr.msk.bf16.mxu1 %vm652_vm0, %v2653_v28 }
  0xc9   :  { %996 = vmatmul.mubr.bf16.gmra.mrb[80].mxu0 %v2655_v29  ;;  %1196 = vmatmul.mubr.bf16.gmra.mrb[80].mxu1 %v2656_v30 }
  0xca   :  { %1972 = vmatprep.mubr.msk.bf16.mxu0 %vm652_vm0, %v2657_v31  ;;  %1997 = vmatprep.mubr.msk.bf16.mxu1 %vm652_vm0, %v2659_v32 }
  0xd1   :  { %1004 = vmatmul.mubr.bf16.gmra.mrb[84].mxu0 %v2661_v33  ;;  %1204 = vmatmul.mubr.bf16.gmra.mrb[84].mxu1 %v2662_v34 }
  0xd2   :  { %1973 = vmatprep.mubr.msk.bf16.mxu0 %vm652_vm0, %v2663_v35  ;;  %1998 = vmatprep.mubr.msk.bf16.mxu1 %vm652_vm0, %v2665_v36 }
  0xd9   :  { %1012 = vmatmul.mubr.bf16.gmra.mrb[88].mxu0 %v2667_v37  ;;  %1212 = vmatmul.mubr.bf16.gmra.mrb[88].mxu1 %v2668_v38 }
  0xda   :  { %1974 = vmatprep.mubr.msk.bf16.mxu0 %vm652_vm0, %v2669_v39  ;;  %1999 = vmatprep.mubr.msk.bf16.mxu1 %vm652_vm0, %v2671_v40 }
  0xe1   :  { %1020 = vmatmul.mubr.bf16.gmra.mrb[92].mxu0 %v2673_v41  ;;  %1220 = vmatmul.mubr.bf16.gmra.mrb[92].mxu1 %v2674_v42 }
  0xe2   :  { %1975 = vmatprep.mubr.msk.bf16.mxu0 %vm652_vm0, %v2675_v43  ;;  %2000 = vmatprep.mubr.msk.bf16.mxu1 %vm652_vm0, %v2677_v44 }
  0xe9   :  { %1028 = vmatmul.mubr.bf16.gmra.mrb[96].mxu0 %v2679_v45  ;;  %1228 = vmatmul.mubr.bf16.gmra.mrb[96].mxu1 %v2680_v46 }
  0xfc   :  { %v837_v48 = vpop.f32.mrb[0].mxu0  ;;  %v1037_v49 = vpop.f32.mrb[0].mxu1 }
  0xfd   :  { %v838_v50 = vadd.f32 %v3085_v47, %v837_v48  ;;  %v1038_v51 = vadd.f32 %v3085_v47, %v1037_v49  ;;  %v839_v52 = vpop.f32.mrb[1].mxu0  ;;  %v1039_v53 = vpop.f32.mrb[1].mxu1 }
  0xfe   :  { %v840_v54 = vpop.f32.mrb[2].mxu0  ;;  %v1040_v55 = vpop.f32.mrb[2].mxu1 }
  0xff   :  { %v841_v56 = vadd.f32 %v3085_v47, %v840_v54  ;;  %v1041_v57 = vadd.f32 %v3085_v47, %v1040_v55  ;;  %v842_v58 = vpop.f32.mrb[3].mxu0  ;;  %v1042_v59 = vpop.f32.mrb[3].mxu1  ;;  %v1236_v60 = vmax.f32 %v838_v50, 0.0  ;;  %v1286_v61 = vmax.f32 %v1038_v51, 0.0 }
 0x101   :  { %v1237_v62 = vmax.f32 %v841_v56, 0.0  ;;  %v1287_v63 = vmax.f32 %v1041_v57, 0.0 }
 0x103   :  { %v2204_v0 = vpack.c.bf16 %v1237_v62, %v1236_v60  ;;  %v2329_v1 = vpack.c.bf16 %v1287_v63, %v1286_v61 }
 0x104   :  { %v845_v2 = vpop.f32.mrb[4].mxu0  ;;  %v1045_v3 = vpop.f32.mrb[4].mxu1 }
 0x105   :  { %2205 = vst [vmem:[%s3340_s3] sm:$0xff] %v2204_v0   ;;  %2475 = vst [vmem:[%s3340_s3 + $0xc8] sm:$0xff] %v2329_v1   ;;  %v846_v4 = vadd.f32 %v3085_v47, %v845_v2  ;;  %v1046_v5 = vadd.f32 %v3085_v47, %v1045_v3  ;;  %v847_v6 = vpop.f32.mrb[5].mxu0  ;;  %v1047_v7 = vpop.f32.mrb[5].mxu1 }
 0x106   :  { %v848_v8 = vpop.f32.mrb[6].mxu0  ;;  %v1048_v9 = vpop.f32.mrb[6].mxu1 }
 0x107   :  { %v849_v10 = vadd.f32 %v3085_v47, %v848_v8  ;;  %v1049_v11 = vadd.f32 %v3085_v47, %v1048_v9  ;;  %v850_v12 = vpop.f32.mrb[7].mxu0  ;;  %v1050_v13 = vpop.f32.mrb[7].mxu1  ;;  %v1238_v14 = vmax.f32 %v846_v4, 0.0  ;;  %v1288_v15 = vmax.f32 %v1046_v5, 0.0 }
 0x109   :  { %v1239_v16 = vmax.f32 %v849_v10, 0.0  ;;  %v1289_v17 = vmax.f32 %v1049_v11, 0.0 }
 0x10b   :  { %v2209_v18 = vpack.c.bf16 %v1239_v16, %v1238_v14  ;;  %v2334_v19 = vpack.c.bf16 %v1289_v17, %v1288_v15 }
 0x10c   :  { %v853_v20 = vpop.f32.mrb[8].mxu0  ;;  %v1053_v21 = vpop.f32.mrb[8].mxu1 }
 0x10d   :  { %2451 = vst [vmem:[%s3340_s3 + $0x8] sm:$0xff] %v2209_v18   ;;  %2476 = vst [vmem:[%s3340_s3 + $0xd0] sm:$0xff] %v2334_v19   ;;  %v854_v22 = vadd.f32 %v3085_v47, %v853_v20  ;;  %v1054_v23 = vadd.f32 %v3085_v47, %v1053_v21  ;;  %v855_v24 = vpop.f32.mrb[9].mxu0  ;;  %v1055_v25 = vpop.f32.mrb[9].mxu1 }
 0x10e   :  { %v856_v26 = vpop.f32.mrb[10].mxu0  ;;  %v1056_v27 = vpop.f32.mrb[10].mxu1 }
 0x10f   :  { %v857_v28 = vadd.f32 %v3085_v47, %v856_v26  ;;  %v1057_v29 = vadd.f32 %v3085_v47, %v1056_v27  ;;  %v858_v30 = vpop.f32.mrb[11].mxu0  ;;  %v1058_v31 = vpop.f32.mrb[11].mxu1  ;;  %v1240_v32 = vmax.f32 %v854_v22, 0.0  ;;  %v1290_v33 = vmax.f32 %v1054_v23, 0.0 }
 0x111   :  { %v1241_v34 = vmax.f32 %v857_v28, 0.0  ;;  %v1291_v35 = vmax.f32 %v1057_v29, 0.0 }
 0x113   :  { %v2214_v36 = vpack.c.bf16 %v1241_v34, %v1240_v32  ;;  %v2339_v37 = vpack.c.bf16 %v1291_v35, %v1290_v33 }
 0x114   :  { %v861_v38 = vpop.f32.mrb[12].mxu0  ;;  %v1061_v39 = vpop.f32.mrb[12].mxu1 }
 0x115   :  { %2452 = vst [vmem:[%s3340_s3 + $0x10] sm:$0xff] %v2214_v36   ;;  %2477 = vst [vmem:[%s3340_s3 + $0xd8] sm:$0xff] %v2339_v37   ;;  %v862_v40 = vadd.f32 %v3085_v47, %v861_v38  ;;  %v1062_v41 = vadd.f32 %v3085_v47, %v1061_v39  ;;  %v863_v42 = vpop.f32.mrb[13].mxu0  ;;  %v1063_v43 = vpop.f32.mrb[13].mxu1 }
 0x116   :  { %v864_v44 = vpop.f32.mrb[14].mxu0  ;;  %v1064_v45 = vpop.f32.mrb[14].mxu1 }
 0x117   :  { %v865_v46 = vadd.f32 %v3085_v47, %v864_v44  ;;  %v1065_v48 = vadd.f32 %v3085_v47, %v1064_v45  ;;  %v866_v49 = vpop.f32.mrb[15].mxu0  ;;  %v1066_v50 = vpop.f32.mrb[15].mxu1  ;;  %v1242_v51 = vmax.f32 %v862_v40, 0.0  ;;  %v1292_v52 = vmax.f32 %v1062_v41, 0.0 }
 0x119   :  { %v1243_v53 = vmax.f32 %v865_v46, 0.0  ;;  %v1293_v54 = vmax.f32 %v1065_v48, 0.0 }
 0x11b   :  { %v2219_v55 = vpack.c.bf16 %v1243_v53, %v1242_v51  ;;  %v2344_v56 = vpack.c.bf16 %v1293_v54, %v1292_v52 }
 0x11c   :  { %v869_v57 = vpop.f32.mrb[16].mxu0  ;;  %v1069_v58 = vpop.f32.mrb[16].mxu1 }
 0x11d   :  { %2453 = vst [vmem:[%s3340_s3 + $0x18] sm:$0xff] %v2219_v55   ;;  %2478 = vst [vmem:[%s3340_s3 + $0xe0] sm:$0xff] %v2344_v56   ;;  %v870_v59 = vadd.f32 %v3085_v47, %v869_v57  ;;  %v1070_v60 = vadd.f32 %v3085_v47, %v1069_v58  ;;  %v871_v61 = vpop.f32.mrb[17].mxu0  ;;  %v1071_v62 = vpop.f32.mrb[17].mxu1 }
 0x11e   :  { %v872_v63 = vpop.f32.mrb[18].mxu0  ;;  %v1072_v0 = vpop.f32.mrb[18].mxu1 }
 0x11f   :  { %v873_v1 = vadd.f32 %v3085_v47, %v872_v63  ;;  %v1073_v2 = vadd.f32 %v3085_v47, %v1072_v0  ;;  %v874_v3 = vpop.f32.mrb[19].mxu0  ;;  %v1074_v4 = vpop.f32.mrb[19].mxu1  ;;  %v1244_v5 = vmax.f32 %v870_v59, 0.0  ;;  %v1294_v6 = vmax.f32 %v1070_v60, 0.0 }
 0x121   :  { %v1245_v7 = vmax.f32 %v873_v1, 0.0  ;;  %v1295_v8 = vmax.f32 %v1073_v2, 0.0 }
 0x123   :  { %v2224_v9 = vpack.c.bf16 %v1245_v7, %v1244_v5  ;;  %v2349_v10 = vpack.c.bf16 %v1295_v8, %v1294_v6 }
 0x124   :  { %v877_v11 = vpop.f32.mrb[20].mxu0  ;;  %v1077_v12 = vpop.f32.mrb[20].mxu1 }
 0x125   :  { %2454 = vst [vmem:[%s3340_s3 + $0x20] sm:$0xff] %v2224_v9   ;;  %2479 = vst [vmem:[%s3340_s3 + $0xe8] sm:$0xff] %v2349_v10   ;;  %v878_v13 = vadd.f32 %v3085_v47, %v877_v11  ;;  %v1078_v14 = vadd.f32 %v3085_v47, %v1077_v12  ;;  %v879_v15 = vpop.f32.mrb[21].mxu0  ;;  %v1079_v16 = vpop.f32.mrb[21].mxu1 }
 0x126   :  { %v880_v17 = vpop.f32.mrb[22].mxu0  ;;  %v1080_v18 = vpop.f32.mrb[22].mxu1 }
 0x127   :  { %v881_v19 = vadd.f32 %v3085_v47, %v880_v17  ;;  %v1081_v20 = vadd.f32 %v3085_v47, %v1080_v18  ;;  %v882_v21 = vpop.f32.mrb[23].mxu0  ;;  %v1082_v22 = vpop.f32.mrb[23].mxu1  ;;  %v1246_v23 = vmax.f32 %v878_v13, 0.0  ;;  %v1296_v24 = vmax.f32 %v1078_v14, 0.0 }
 0x129   :  { %v1247_v25 = vmax.f32 %v881_v19, 0.0  ;;  %v1297_v26 = vmax.f32 %v1081_v20, 0.0 }
 0x12b   :  { %v2229_v27 = vpack.c.bf16 %v1247_v25, %v1246_v23  ;;  %v2354_v28 = vpack.c.bf16 %v1297_v26, %v1296_v24 }
 0x12c   :  { %v885_v29 = vpop.f32.mrb[24].mxu0  ;;  %v1085_v30 = vpop.f32.mrb[24].mxu1 }
 0x12d   :  { %2455 = vst [vmem:[%s3340_s3 + $0x28] sm:$0xff] %v2229_v27   ;;  %2480 = vst [vmem:[%s3340_s3 + $0xf0] sm:$0xff] %v2354_v28   ;;  %v886_v31 = vadd.f32 %v3085_v47, %v885_v29  ;;  %v1086_v32 = vadd.f32 %v3085_v47, %v1085_v30  ;;  %v887_v33 = vpop.f32.mrb[25].mxu0  ;;  %v1087_v34 = vpop.f32.mrb[25].mxu1 }
 0x12e   :  { %v888_v35 = vpop.f32.mrb[26].mxu0  ;;  %v1088_v36 = vpop.f32.mrb[26].mxu1 }
 0x12f   :  { %v889_v37 = vadd.f32 %v3085_v47, %v888_v35  ;;  %v1089_v38 = vadd.f32 %v3085_v47, %v1088_v36  ;;  %v890_v39 = vpop.f32.mrb[27].mxu0  ;;  %v1090_v40 = vpop.f32.mrb[27].mxu1  ;;  %v1248_v41 = vmax.f32 %v886_v31, 0.0  ;;  %v1298_v42 = vmax.f32 %v1086_v32, 0.0 }
 0x131   :  { %v1249_v43 = vmax.f32 %v889_v37, 0.0  ;;  %v1299_v44 = vmax.f32 %v1089_v38, 0.0 }
 0x133   :  { %v2234_v45 = vpack.c.bf16 %v1249_v43, %v1248_v41  ;;  %v2359_v46 = vpack.c.bf16 %v1299_v44, %v1298_v42 }
 0x134   :  { %v893_v48 = vpop.f32.mrb[28].mxu0  ;;  %v1093_v49 = vpop.f32.mrb[28].mxu1 }
 0x135   :  { %2456 = vst [vmem:[%s3340_s3 + $0x30] sm:$0xff] %v2234_v45   ;;  %2481 = vst [vmem:[%s3340_s3 + $0xf8] sm:$0xff] %v2359_v46   ;;  %v894_v50 = vadd.f32 %v3085_v47, %v893_v48  ;;  %v1094_v51 = vadd.f32 %v3085_v47, %v1093_v49  ;;  %v895_v52 = vpop.f32.mrb[29].mxu0  ;;  %v1095_v53 = vpop.f32.mrb[29].mxu1 }
 0x136   :  { %v896_v54 = vpop.f32.mrb[30].mxu0  ;;  %v1096_v55 = vpop.f32.mrb[30].mxu1 }
 0x137   :  { %v897_v56 = vadd.f32 %v3085_v47, %v896_v54  ;;  %v1097_v57 = vadd.f32 %v3085_v47, %v1096_v55  ;;  %v898_v58 = vpop.f32.mrb[31].mxu0  ;;  %v1098_v59 = vpop.f32.mrb[31].mxu1  ;;  %v1250_v60 = vmax.f32 %v894_v50, 0.0  ;;  %v1300_v61 = vmax.f32 %v1094_v51, 0.0 }
 0x139   :  { %v1251_v62 = vmax.f32 %v897_v56, 0.0  ;;  %v1301_v63 = vmax.f32 %v1097_v57, 0.0 }
 0x13b   :  { %v2239_v0 = vpack.c.bf16 %v1251_v62, %v1250_v60  ;;  %v2364_v1 = vpack.c.bf16 %v1301_v63, %v1300_v61 }
 0x13c   :  { %v901_v2 = vpop.f32.mrb[32].mxu0  ;;  %v1101_v3 = vpop.f32.mrb[32].mxu1 }
 0x13d   :  { %2457 = vst [vmem:[%s3340_s3 + $0x38] sm:$0xff] %v2239_v0   ;;  %2482 = vst [vmem:[%s3340_s3 + $0x100] sm:$0xff] %v2364_v1   ;;  %v902_v4 = vadd.f32 %v3085_v47, %v901_v2  ;;  %v1102_v5 = vadd.f32 %v3085_v47, %v1101_v3  ;;  %v903_v6 = vpop.f32.mrb[33].mxu0  ;;  %v1103_v7 = vpop.f32.mrb[33].mxu1 }
 0x13e   :  { %v904_v8 = vpop.f32.mrb[34].mxu0  ;;  %v1104_v9 = vpop.f32.mrb[34].mxu1 }
 0x13f   :  { %v905_v10 = vadd.f32 %v3085_v47, %v904_v8  ;;  %v1105_v11 = vadd.f32 %v3085_v47, %v1104_v9  ;;  %v906_v12 = vpop.f32.mrb[35].mxu0  ;;  %v1106_v13 = vpop.f32.mrb[35].mxu1  ;;  %v1252_v14 = vmax.f32 %v902_v4, 0.0  ;;  %v1302_v15 = vmax.f32 %v1102_v5, 0.0 }
 0x141   :  { %v1253_v16 = vmax.f32 %v905_v10, 0.0  ;;  %v1303_v17 = vmax.f32 %v1105_v11, 0.0 }
 0x143   :  { %v2244_v18 = vpack.c.bf16 %v1253_v16, %v1252_v14  ;;  %v2369_v19 = vpack.c.bf16 %v1303_v17, %v1302_v15 }
 0x144   :  { %v909_v20 = vpop.f32.mrb[36].mxu0  ;;  %v1109_v21 = vpop.f32.mrb[36].mxu1 }
 0x145   :  { %2458 = vst [vmem:[%s3340_s3 + $0x40] sm:$0xff] %v2244_v18   ;;  %2483 = vst [vmem:[%s3340_s3 + $0x108] sm:$0xff] %v2369_v19   ;;  %v910_v22 = vadd.f32 %v3085_v47, %v909_v20  ;;  %v1110_v23 = vadd.f32 %v3085_v47, %v1109_v21  ;;  %v911_v24 = vpop.f32.mrb[37].mxu0  ;;  %v1111_v25 = vpop.f32.mrb[37].mxu1 }
 0x146   :  { %v912_v26 = vpop.f32.mrb[38].mxu0  ;;  %v1112_v27 = vpop.f32.mrb[38].mxu1 }
 0x147   :  { %v913_v28 = vadd.f32 %v3085_v47, %v912_v26  ;;  %v1113_v29 = vadd.f32 %v3085_v47, %v1112_v27  ;;  %v914_v30 = vpop.f32.mrb[39].mxu0  ;;  %v1114_v31 = vpop.f32.mrb[39].mxu1  ;;  %v1254_v32 = vmax.f32 %v910_v22, 0.0  ;;  %v1304_v33 = vmax.f32 %v1110_v23, 0.0 }
 0x149   :  { %v1255_v34 = vmax.f32 %v913_v28, 0.0  ;;  %v1305_v35 = vmax.f32 %v1113_v29, 0.0 }
 0x14b   :  { %v2249_v36 = vpack.c.bf16 %v1255_v34, %v1254_v32  ;;  %v2374_v37 = vpack.c.bf16 %v1305_v35, %v1304_v33 }
 0x14c   :  { %v917_v38 = vpop.f32.mrb[40].mxu0  ;;  %v1117_v39 = vpop.f32.mrb[40].mxu1 }
 0x14d   :  { %2459 = vst [vmem:[%s3340_s3 + $0x48] sm:$0xff] %v2249_v36   ;;  %2484 = vst [vmem:[%s3340_s3 + $0x110] sm:$0xff] %v2374_v37   ;;  %v918_v40 = vadd.f32 %v3085_v47, %v917_v38  ;;  %v1118_v41 = vadd.f32 %v3085_v47, %v1117_v39  ;;  %v919_v42 = vpop.f32.mrb[41].mxu0  ;;  %v1119_v43 = vpop.f32.mrb[41].mxu1 }
 0x14e   :  { %v920_v44 = vpop.f32.mrb[42].mxu0  ;;  %v1120_v45 = vpop.f32.mrb[42].mxu1 }
 0x14f   :  { %v921_v46 = vadd.f32 %v3085_v47, %v920_v44  ;;  %v1121_v48 = vadd.f32 %v3085_v47, %v1120_v45  ;;  %v922_v49 = vpop.f32.mrb[43].mxu0  ;;  %v1122_v50 = vpop.f32.mrb[43].mxu1  ;;  %v1256_v51 = vmax.f32 %v918_v40, 0.0  ;;  %v1306_v52 = vmax.f32 %v1118_v41, 0.0 }
 0x151   :  { %v1257_v53 = vmax.f32 %v921_v46, 0.0  ;;  %v1307_v54 = vmax.f32 %v1121_v48, 0.0 }
 0x153   :  { %v2254_v55 = vpack.c.bf16 %v1257_v53, %v1256_v51  ;;  %v2379_v56 = vpack.c.bf16 %v1307_v54, %v1306_v52 }
 0x154   :  { %v925_v57 = vpop.f32.mrb[44].mxu0  ;;  %v1125_v58 = vpop.f32.mrb[44].mxu1 }
 0x155   :  { %2460 = vst [vmem:[%s3340_s3 + $0x50] sm:$0xff] %v2254_v55   ;;  %2485 = vst [vmem:[%s3340_s3 + $0x118] sm:$0xff] %v2379_v56   ;;  %v926_v59 = vadd.f32 %v3085_v47, %v925_v57  ;;  %v1126_v60 = vadd.f32 %v3085_v47, %v1125_v58  ;;  %v927_v61 = vpop.f32.mrb[45].mxu0  ;;  %v1127_v62 = vpop.f32.mrb[45].mxu1 }
 0x156   :  { %v928_v63 = vpop.f32.mrb[46].mxu0  ;;  %v1128_v0 = vpop.f32.mrb[46].mxu1 }
 0x157   :  { %v929_v1 = vadd.f32 %v3085_v47, %v928_v63  ;;  %v1129_v2 = vadd.f32 %v3085_v47, %v1128_v0  ;;  %v930_v3 = vpop.f32.mrb[47].mxu0  ;;  %v1130_v4 = vpop.f32.mrb[47].mxu1  ;;  %v1258_v5 = vmax.f32 %v926_v59, 0.0  ;;  %v1308_v6 = vmax.f32 %v1126_v60, 0.0 }
 0x159   :  { %v1259_v7 = vmax.f32 %v929_v1, 0.0  ;;  %v1309_v8 = vmax.f32 %v1129_v2, 0.0 }
 0x15b   :  { %v2259_v9 = vpack.c.bf16 %v1259_v7, %v1258_v5  ;;  %v2384_v10 = vpack.c.bf16 %v1309_v8, %v1308_v6 }
 0x15c   :  { %v933_v11 = vpop.f32.mrb[48].mxu0  ;;  %v1133_v12 = vpop.f32.mrb[48].mxu1 }
 0x15d   :  { %2461 = vst [vmem:[%s3340_s3 + $0x58] sm:$0xff] %v2259_v9   ;;  %2486 = vst [vmem:[%s3340_s3 + $0x120] sm:$0xff] %v2384_v10   ;;  %v934_v13 = vadd.f32 %v3085_v47, %v933_v11  ;;  %v1134_v14 = vadd.f32 %v3085_v47, %v1133_v12  ;;  %v935_v15 = vpop.f32.mrb[49].mxu0  ;;  %v1135_v16 = vpop.f32.mrb[49].mxu1 }
 0x15e   :  { %v936_v17 = vpop.f32.mrb[50].mxu0  ;;  %v1136_v18 = vpop.f32.mrb[50].mxu1 }
 0x15f   :  { %v937_v19 = vadd.f32 %v3085_v47, %v936_v17  ;;  %v1137_v20 = vadd.f32 %v3085_v47, %v1136_v18  ;;  %v938_v21 = vpop.f32.mrb[51].mxu0  ;;  %v1138_v22 = vpop.f32.mrb[51].mxu1  ;;  %v1260_v23 = vmax.f32 %v934_v13, 0.0  ;;  %v1310_v24 = vmax.f32 %v1134_v14, 0.0 }
 0x161   :  { %v1261_v25 = vmax.f32 %v937_v19, 0.0  ;;  %v1311_v26 = vmax.f32 %v1137_v20, 0.0 }
 0x163   :  { %v2264_v27 = vpack.c.bf16 %v1261_v25, %v1260_v23  ;;  %v2389_v28 = vpack.c.bf16 %v1311_v26, %v1310_v24 }
 0x164   :  { %v941_v29 = vpop.f32.mrb[52].mxu0  ;;  %v1141_v30 = vpop.f32.mrb[52].mxu1 }
 0x165   :  { %2462 = vst [vmem:[%s3340_s3 + $0x60] sm:$0xff] %v2264_v27   ;;  %2487 = vst [vmem:[%s3340_s3 + $0x128] sm:$0xff] %v2389_v28   ;;  %v942_v31 = vadd.f32 %v3085_v47, %v941_v29  ;;  %v1142_v32 = vadd.f32 %v3085_v47, %v1141_v30  ;;  %v943_v33 = vpop.f32.mrb[53].mxu0  ;;  %v1143_v34 = vpop.f32.mrb[53].mxu1 }
 0x166   :  { %v944_v35 = vpop.f32.mrb[54].mxu0  ;;  %v1144_v36 = vpop.f32.mrb[54].mxu1 }
 0x167   :  { %v945_v37 = vadd.f32 %v3085_v47, %v944_v35  ;;  %v1145_v38 = vadd.f32 %v3085_v47, %v1144_v36  ;;  %v946_v39 = vpop.f32.mrb[55].mxu0  ;;  %v1146_v40 = vpop.f32.mrb[55].mxu1  ;;  %v1262_v41 = vmax.f32 %v942_v31, 0.0  ;;  %v1312_v42 = vmax.f32 %v1142_v32, 0.0 }
 0x169   :  { %v1263_v43 = vmax.f32 %v945_v37, 0.0  ;;  %v1313_v44 = vmax.f32 %v1145_v38, 0.0 }
 0x16b   :  { %v2269_v45 = vpack.c.bf16 %v1263_v43, %v1262_v41  ;;  %v2394_v46 = vpack.c.bf16 %v1313_v44, %v1312_v42 }
 0x16c   :  { %v949_v48 = vpop.f32.mrb[56].mxu0  ;;  %v1149_v49 = vpop.f32.mrb[56].mxu1 }
 0x16d   :  { %2463 = vst [vmem:[%s3340_s3 + $0x68] sm:$0xff] %v2269_v45   ;;  %2488 = vst [vmem:[%s3340_s3 + $0x130] sm:$0xff] %v2394_v46   ;;  %v950_v50 = vadd.f32 %v3085_v47, %v949_v48  ;;  %v1150_v51 = vadd.f32 %v3085_v47, %v1149_v49  ;;  %v951_v52 = vpop.f32.mrb[57].mxu0  ;;  %v1151_v53 = vpop.f32.mrb[57].mxu1 }
 0x16e   :  { %v952_v54 = vpop.f32.mrb[58].mxu0  ;;  %v1152_v55 = vpop.f32.mrb[58].mxu1 }
 0x16f   :  { %v953_v56 = vadd.f32 %v3085_v47, %v952_v54  ;;  %v1153_v57 = vadd.f32 %v3085_v47, %v1152_v55  ;;  %v954_v58 = vpop.f32.mrb[59].mxu0  ;;  %v1154_v59 = vpop.f32.mrb[59].mxu1  ;;  %v1264_v60 = vmax.f32 %v950_v50, 0.0  ;;  %v1314_v61 = vmax.f32 %v1150_v51, 0.0 }
 0x171   :  { %v1265_v62 = vmax.f32 %v953_v56, 0.0  ;;  %v1315_v63 = vmax.f32 %v1153_v57, 0.0 }
 0x173   :  { %v2274_v0 = vpack.c.bf16 %v1265_v62, %v1264_v60  ;;  %v2399_v1 = vpack.c.bf16 %v1315_v63, %v1314_v61 }
 0x174   :  { %v957_v2 = vpop.f32.mrb[60].mxu0  ;;  %v1157_v3 = vpop.f32.mrb[60].mxu1 }
 0x175   :  { %2464 = vst [vmem:[%s3340_s3 + $0x70] sm:$0xff] %v2274_v0   ;;  %2489 = vst [vmem:[%s3340_s3 + $0x138] sm:$0xff] %v2399_v1   ;;  %v958_v4 = vadd.f32 %v3085_v47, %v957_v2  ;;  %v1158_v5 = vadd.f32 %v3085_v47, %v1157_v3  ;;  %v959_v6 = vpop.f32.mrb[61].mxu0  ;;  %v1159_v7 = vpop.f32.mrb[61].mxu1 }
 0x176   :  { %v960_v8 = vpop.f32.mrb[62].mxu0  ;;  %v1160_v9 = vpop.f32.mrb[62].mxu1 }
 0x177   :  { %v961_v10 = vadd.f32 %v3085_v47, %v960_v8  ;;  %v1161_v11 = vadd.f32 %v3085_v47, %v1160_v9  ;;  %v962_v12 = vpop.f32.mrb[63].mxu0  ;;  %v1162_v13 = vpop.f32.mrb[63].mxu1  ;;  %v1266_v14 = vmax.f32 %v958_v4, 0.0  ;;  %v1316_v15 = vmax.f32 %v1158_v5, 0.0 }
 0x179   :  { %v1267_v16 = vmax.f32 %v961_v10, 0.0  ;;  %v1317_v17 = vmax.f32 %v1161_v11, 0.0 }
 0x17b   :  { %v2279_v18 = vpack.c.bf16 %v1267_v16, %v1266_v14  ;;  %v2404_v19 = vpack.c.bf16 %v1317_v17, %v1316_v15 }
 0x17c   :  { %v965_v20 = vpop.f32.mrb[64].mxu0  ;;  %v1165_v21 = vpop.f32.mrb[64].mxu1 }
 0x17d   :  { %2465 = vst [vmem:[%s3340_s3 + $0x78] sm:$0xff] %v2279_v18   ;;  %2490 = vst [vmem:[%s3340_s3 + $0x140] sm:$0xff] %v2404_v19   ;;  %v966_v22 = vadd.f32 %v3085_v47, %v965_v20  ;;  %v1166_v23 = vadd.f32 %v3085_v47, %v1165_v21  ;;  %v967_v24 = vpop.f32.mrb[65].mxu0  ;;  %v1167_v25 = vpop.f32.mrb[65].mxu1 }
 0x17e   :  { %v968_v26 = vpop.f32.mrb[66].mxu0  ;;  %v1168_v27 = vpop.f32.mrb[66].mxu1 }
 0x17f   :  { %v969_v28 = vadd.f32 %v3085_v47, %v968_v26  ;;  %v1169_v29 = vadd.f32 %v3085_v47, %v1168_v27  ;;  %v970_v30 = vpop.f32.mrb[67].mxu0  ;;  %v1170_v31 = vpop.f32.mrb[67].mxu1  ;;  %v1268_v32 = vmax.f32 %v966_v22, 0.0  ;;  %v1318_v33 = vmax.f32 %v1166_v23, 0.0 }
 0x181   :  { %v1269_v34 = vmax.f32 %v969_v28, 0.0  ;;  %v1319_v35 = vmax.f32 %v1169_v29, 0.0 }
 0x183   :  { %v2284_v36 = vpack.c.bf16 %v1269_v34, %v1268_v32  ;;  %v2409_v37 = vpack.c.bf16 %v1319_v35, %v1318_v33 }
 0x184   :  { %v973_v38 = vpop.f32.mrb[68].mxu0  ;;  %v1173_v39 = vpop.f32.mrb[68].mxu1 }
 0x185   :  { %2466 = vst [vmem:[%s3340_s3 + $0x80] sm:$0xff] %v2284_v36   ;;  %2491 = vst [vmem:[%s3340_s3 + $0x148] sm:$0xff] %v2409_v37   ;;  %v974_v40 = vadd.f32 %v3085_v47, %v973_v38  ;;  %v1174_v41 = vadd.f32 %v3085_v47, %v1173_v39  ;;  %v975_v42 = vpop.f32.mrb[69].mxu0  ;;  %v1175_v43 = vpop.f32.mrb[69].mxu1 }
 0x186   :  { %v976_v44 = vpop.f32.mrb[70].mxu0  ;;  %v1176_v45 = vpop.f32.mrb[70].mxu1 }
 0x187   :  { %v977_v46 = vadd.f32 %v3085_v47, %v976_v44  ;;  %v1177_v48 = vadd.f32 %v3085_v47, %v1176_v45  ;;  %v978_v49 = vpop.f32.mrb[71].mxu0  ;;  %v1178_v50 = vpop.f32.mrb[71].mxu1  ;;  %v1270_v51 = vmax.f32 %v974_v40, 0.0  ;;  %v1320_v52 = vmax.f32 %v1174_v41, 0.0 }
 0x189   :  { %v1271_v53 = vmax.f32 %v977_v46, 0.0  ;;  %v1321_v54 = vmax.f32 %v1177_v48, 0.0 }
 0x18b   :  { %v2289_v55 = vpack.c.bf16 %v1271_v53, %v1270_v51  ;;  %v2414_v56 = vpack.c.bf16 %v1321_v54, %v1320_v52 }
 0x18c   :  { %v981_v57 = vpop.f32.mrb[72].mxu0  ;;  %v1181_v58 = vpop.f32.mrb[72].mxu1 }
 0x18d   :  { %2467 = vst [vmem:[%s3340_s3 + $0x88] sm:$0xff] %v2289_v55   ;;  %2492 = vst [vmem:[%s3340_s3 + $0x150] sm:$0xff] %v2414_v56   ;;  %v982_v59 = vadd.f32 %v3085_v47, %v981_v57  ;;  %v1182_v60 = vadd.f32 %v3085_v47, %v1181_v58  ;;  %v983_v61 = vpop.f32.mrb[73].mxu0  ;;  %v1183_v62 = vpop.f32.mrb[73].mxu1 }
 0x18e   :  { %v984_v63 = vpop.f32.mrb[74].mxu0  ;;  %v1184_v0 = vpop.f32.mrb[74].mxu1 }
 0x18f   :  { %v985_v1 = vadd.f32 %v3085_v47, %v984_v63  ;;  %v1185_v2 = vadd.f32 %v3085_v47, %v1184_v0  ;;  %v986_v3 = vpop.f32.mrb[75].mxu0  ;;  %v1186_v4 = vpop.f32.mrb[75].mxu1  ;;  %v1272_v5 = vmax.f32 %v982_v59, 0.0  ;;  %v1322_v6 = vmax.f32 %v1182_v60, 0.0 }
 0x191   :  { %v1273_v7 = vmax.f32 %v985_v1, 0.0  ;;  %v1323_v8 = vmax.f32 %v1185_v2, 0.0 }
 0x193   :  { %v2294_v9 = vpack.c.bf16 %v1273_v7, %v1272_v5  ;;  %v2419_v10 = vpack.c.bf16 %v1323_v8, %v1322_v6 }
 0x194   :  { %v989_v11 = vpop.f32.mrb[76].mxu0  ;;  %v1189_v12 = vpop.f32.mrb[76].mxu1 }
 0x195   :  { %2468 = vst [vmem:[%s3340_s3 + $0x90] sm:$0xff] %v2294_v9   ;;  %2493 = vst [vmem:[%s3340_s3 + $0x158] sm:$0xff] %v2419_v10   ;;  %v990_v13 = vadd.f32 %v3085_v47, %v989_v11  ;;  %v1190_v14 = vadd.f32 %v3085_v47, %v1189_v12  ;;  %v991_v15 = vpop.f32.mrb[77].mxu0  ;;  %v1191_v16 = vpop.f32.mrb[77].mxu1 }
 0x196   :  { %v992_v17 = vpop.f32.mrb[78].mxu0  ;;  %v1192_v18 = vpop.f32.mrb[78].mxu1 }
 0x197   :  { %v993_v19 = vadd.f32 %v3085_v47, %v992_v17  ;;  %v1193_v20 = vadd.f32 %v3085_v47, %v1192_v18  ;;  %v994_v21 = vpop.f32.mrb[79].mxu0  ;;  %v1194_v22 = vpop.f32.mrb[79].mxu1  ;;  %v1274_v23 = vmax.f32 %v990_v13, 0.0  ;;  %v1324_v24 = vmax.f32 %v1190_v14, 0.0 }
 0x199   :  { %v1275_v25 = vmax.f32 %v993_v19, 0.0  ;;  %v1325_v26 = vmax.f32 %v1193_v20, 0.0 }
 0x19b   :  { %v2299_v27 = vpack.c.bf16 %v1275_v25, %v1274_v23  ;;  %v2424_v28 = vpack.c.bf16 %v1325_v26, %v1324_v24 }
 0x19c   :  { %v997_v29 = vpop.f32.mrb[80].mxu0  ;;  %v1197_v30 = vpop.f32.mrb[80].mxu1 }
 0x19d   :  { %2469 = vst [vmem:[%s3340_s3 + $0x98] sm:$0xff] %v2299_v27   ;;  %2494 = vst [vmem:[%s3340_s3 + $0x160] sm:$0xff] %v2424_v28   ;;  %v998_v31 = vadd.f32 %v3085_v47, %v997_v29  ;;  %v1198_v32 = vadd.f32 %v3085_v47, %v1197_v30  ;;  %v999_v33 = vpop.f32.mrb[81].mxu0  ;;  %v1199_v34 = vpop.f32.mrb[81].mxu1 }
 0x19e   :  { %v1000_v35 = vpop.f32.mrb[82].mxu0  ;;  %v1200_v36 = vpop.f32.mrb[82].mxu1 }
 0x19f   :  { %v1001_v37 = vadd.f32 %v3085_v47, %v1000_v35  ;;  %v1201_v38 = vadd.f32 %v3085_v47, %v1200_v36  ;;  %v1002_v39 = vpop.f32.mrb[83].mxu0  ;;  %v1202_v40 = vpop.f32.mrb[83].mxu1  ;;  %v1276_v41 = vmax.f32 %v998_v31, 0.0  ;;  %v1326_v42 = vmax.f32 %v1198_v32, 0.0 }
 0x1a1   :  { %v1277_v43 = vmax.f32 %v1001_v37, 0.0  ;;  %v1327_v44 = vmax.f32 %v1201_v38, 0.0 }
 0x1a3   :  { %v2304_v45 = vpack.c.bf16 %v1277_v43, %v1276_v41  ;;  %v2429_v46 = vpack.c.bf16 %v1327_v44, %v1326_v42 }
 0x1a4   :  { %v1005_v48 = vpop.f32.mrb[84].mxu0  ;;  %v1205_v49 = vpop.f32.mrb[84].mxu1 }
 0x1a5   :  { %2470 = vst [vmem:[%s3340_s3 + $0xa0] sm:$0xff] %v2304_v45   ;;  %2495 = vst [vmem:[%s3340_s3 + $0x168] sm:$0xff] %v2429_v46   ;;  %v1006_v50 = vadd.f32 %v3085_v47, %v1005_v48  ;;  %v1206_v51 = vadd.f32 %v3085_v47, %v1205_v49  ;;  %v1007_v52 = vpop.f32.mrb[85].mxu0  ;;  %v1207_v53 = vpop.f32.mrb[85].mxu1 }
 0x1a6   :  { %v1008_v54 = vpop.f32.mrb[86].mxu0  ;;  %v1208_v55 = vpop.f32.mrb[86].mxu1 }
 0x1a7   :  { %v1009_v56 = vadd.f32 %v3085_v47, %v1008_v54  ;;  %v1209_v57 = vadd.f32 %v3085_v47, %v1208_v55  ;;  %v1010_v58 = vpop.f32.mrb[87].mxu0  ;;  %v1210_v59 = vpop.f32.mrb[87].mxu1  ;;  %v1278_v60 = vmax.f32 %v1006_v50, 0.0  ;;  %v1328_v61 = vmax.f32 %v1206_v51, 0.0 }
 0x1a9   :  { %v1279_v62 = vmax.f32 %v1009_v56, 0.0  ;;  %v1329_v63 = vmax.f32 %v1209_v57, 0.0 }
 0x1ab   :  { %v2309_v0 = vpack.c.bf16 %v1279_v62, %v1278_v60  ;;  %v2434_v1 = vpack.c.bf16 %v1329_v63, %v1328_v61 }
 0x1ac   :  { %v1013_v2 = vpop.f32.mrb[88].mxu0  ;;  %v1213_v3 = vpop.f32.mrb[88].mxu1 }
 0x1ad   :  { %2471 = vst [vmem:[%s3340_s3 + $0xa8] sm:$0xff] %v2309_v0   ;;  %2496 = vst [vmem:[%s3340_s3 + $0x170] sm:$0xff] %v2434_v1   ;;  %v1014_v4 = vadd.f32 %v3085_v47, %v1013_v2  ;;  %v1214_v5 = vadd.f32 %v3085_v47, %v1213_v3  ;;  %v1015_v6 = vpop.f32.mrb[89].mxu0  ;;  %v1215_v7 = vpop.f32.mrb[89].mxu1 }
 0x1ae   :  { %v1016_v8 = vpop.f32.mrb[90].mxu0  ;;  %v1216_v9 = vpop.f32.mrb[90].mxu1 }
 0x1af   :  { %v1017_v10 = vadd.f32 %v3085_v47, %v1016_v8  ;;  %v1217_v11 = vadd.f32 %v3085_v47, %v1216_v9  ;;  %v1018_v12 = vpop.f32.mrb[91].mxu0  ;;  %v1218_v13 = vpop.f32.mrb[91].mxu1  ;;  %v1280_v14 = vmax.f32 %v1014_v4, 0.0  ;;  %v1330_v15 = vmax.f32 %v1214_v5, 0.0 }
 0x1b1   :  { %v1281_v16 = vmax.f32 %v1017_v10, 0.0  ;;  %v1331_v17 = vmax.f32 %v1217_v11, 0.0 }
 0x1b3   :  { %v2314_v18 = vpack.c.bf16 %v1281_v16, %v1280_v14  ;;  %v2439_v19 = vpack.c.bf16 %v1331_v17, %v1330_v15 }
 0x1b4   :  { %v1021_v20 = vpop.f32.mrb[92].mxu0  ;;  %v1221_v21 = vpop.f32.mrb[92].mxu1 }
 0x1b5   :  { %2472 = vst [vmem:[%s3340_s3 + $0xb0] sm:$0xff] %v2314_v18   ;;  %2497 = vst [vmem:[%s3340_s3 + $0x178] sm:$0xff] %v2439_v19   ;;  %v1022_v22 = vadd.f32 %v3085_v47, %v1021_v20  ;;  %v1222_v23 = vadd.f32 %v3085_v47, %v1221_v21  ;;  %v1023_v24 = vpop.f32.mrb[93].mxu0  ;;  %v1223_v25 = vpop.f32.mrb[93].mxu1 }
 0x1b6   :  { %v1024_v26 = vpop.f32.mrb[94].mxu0  ;;  %v1224_v27 = vpop.f32.mrb[94].mxu1 }
 0x1b7   :  { %v1025_v28 = vadd.f32 %v3085_v47, %v1024_v26  ;;  %v1225_v29 = vadd.f32 %v3085_v47, %v1224_v27  ;;  %v1026_v30 = vpop.f32.mrb[95].mxu0  ;;  %v1226_v31 = vpop.f32.mrb[95].mxu1  ;;  %v1282_v32 = vmax.f32 %v1022_v22, 0.0  ;;  %v1332_v33 = vmax.f32 %v1222_v23, 0.0 }
 0x1b9   :  { %v1283_v34 = vmax.f32 %v1025_v28, 0.0  ;;  %v1333_v35 = vmax.f32 %v1225_v29, 0.0 }
 0x1bb   :  { %v2319_v36 = vpack.c.bf16 %v1283_v34, %v1282_v32  ;;  %v2444_v37 = vpack.c.bf16 %v1333_v35, %v1332_v33 }
 0x1bc   :  { %v1029_v38 = vpop.f32.mrb[96].mxu0  ;;  %v1229_v39 = vpop.f32.mrb[96].mxu1 }
 0x1bd   :  { %2473 = vst [vmem:[%s3340_s3 + $0xb8] sm:$0xff] %v2319_v36   ;;  %2498 = vst [vmem:[%s3340_s3 + $0x180] sm:$0xff] %v2444_v37   ;;  %v1030_v40 = vadd.f32 %v3085_v47, %v1029_v38  ;;  %v1230_v41 = vadd.f32 %v3085_v47, %v1229_v39  ;;  %v1031_v42 = vpop.f32.mrb[97].mxu0  ;;  %v1231_v43 = vpop.f32.mrb[97].mxu1 }
 0x1be   :  { %v1032_v44 = vpop.f32.mrb[98].mxu0  ;;  %v1232_v45 = vpop.f32.mrb[98].mxu1 }
 0x1bf   :  { %v1033_v46 = vadd.f32 %v3085_v47, %v1032_v44  ;;  %v1233_v48 = vadd.f32 %v3085_v47, %v1232_v45  ;;  %v1034_v49 = vpop.f32.mrb[99].mxu0  ;;  %v1234_v50 = vpop.f32.mrb[99].mxu1  ;;  %v1284_v51 = vmax.f32 %v1030_v40, 0.0  ;;  %v1334_v52 = vmax.f32 %v1230_v41, 0.0 }
 0x1c1   :  { %v1285_v53 = vmax.f32 %v1033_v46, 0.0  ;;  %v1335_v54 = vmax.f32 %v1233_v48, 0.0 }
 0x1c3   :  { %v2324_v55 = vpack.c.bf16 %v1285_v53, %v1284_v51  ;;  %v2449_v56 = vpack.c.bf16 %v1335_v54, %v1334_v52 }
 0x1c5   :  { %2474 = vst [vmem:[%s3340_s3 + $0xc0] sm:$0xff] %v2324_v55   ;;  %2499 = vst [vmem:[%s3340_s3 + $0x188] sm:$0xff] %v2449_v56  }

// kernel: encoder_tactile_forward.7
= control target key start
LH: loop header
LB: loop body
LE: loop exit
PB: predicated region body
PF: predicated region fallthrough
CT: control target
= control target key end

     0   :  { %s1176_s1 = inlined_call_operand.vmem [shape: bf16[384,128], index: 1, kind: input, shape index: {}]   ;;  %s1177_s0 = inlined_call_operand.vmem [shape: bf16[128,384], index: 0, kind: input, shape index: {}]   ;;  %s1178_s2 = inlined_call_operand.vmem [shape: f32[1,128], index: 2, kind: input, shape index: {}]   ;;  %s1179_s3 = inlined_call_operand.vmem [shape: bf16[128,128], index: 3, kind: output, shape index: {}]  }
   0x1   :  { %v908_v0 = vld [vmem:[%s1176_s1 + $0x40] sm:$0xff]   ;;  %v910_v2 = vld [vmem:[%s1176_s1 + $0x48] sm:$0xff]   ;;  %v913_v5 = vld [vmem:[%s1176_s1 + $0x50] sm:$0xff]  }
   0x2   :  { %v909_v1 = vld [vmem:[%s1176_s1] sm:$0xff]   ;;  %796 = vmatprep.subr.bf16.mxu0 %v908_v0  ;;  %v912_v4 = vld [vmem:[%s1176_s1 + $0x8] sm:$0xff]   ;;  %v915_v7 = vld [vmem:[%s1176_s1 + $0x10] sm:$0xff]  }
   0x3   :  { %797 = vmatpush3.bf16.msra.mxu0 %v909_v1  ;;  %v911_v3 = vld [vmem:[%s1176_s1 + $0x80] sm:$0xff]   ;;  %v914_v6 = vld [vmem:[%s1176_s1 + $0x88] sm:$0xff]   ;;  %v916_v8 = vld [vmem:[%s1176_s1 + $0x58] sm:$0xff]  }
   0x4   :  { %798 = vmatprep.subr.bf16.mxu0 %v910_v2  ;;  %876 = vmatprep.subr.bf16.mxu1 %v911_v3  ;;  %v917_v9 = vld [vmem:[%s1176_s1 + $0x90] sm:$0xff]   ;;  %v918_v10 = vld [vmem:[%s1176_s1 + $0x18] sm:$0xff]   ;;  %v919_v11 = vld [vmem:[%s1176_s1 + $0x60] sm:$0xff]  }
   0x5   :  { %877 = vmatpush3.bf16.msra.mxu1 %v911_v3  ;;  %v920_v12 = vld [vmem:[%s1176_s1 + $0x98] sm:$0xff]   ;;  %v921_v13 = vld [vmem:[%s1176_s1 + $0x20] sm:$0xff]   ;;  %v922_v15 = vld [vmem:[%s1176_s1 + $0x68] sm:$0xff]  }
   0x6   :  { %878 = vmatprep.subr.bf16.mxu1 %v914_v6  ;;  %v923_v14 = vld [vmem:[%s1176_s1 + $0xa0] sm:$0xff]   ;;  %v924_v16 = vld [vmem:[%s1176_s1 + $0x28] sm:$0xff]   ;;  %v925_v18 = vld [vmem:[%s1176_s1 + $0x70] sm:$0xff]  }
   0x7   :  { %799 = vmatpush3.bf16.msra.mxu0 %v912_v4  ;;  %v926_v17 = vld [vmem:[%s1176_s1 + $0xa8] sm:$0xff]   ;;  %v927_v19 = vld [vmem:[%s1176_s1 + $0x30] sm:$0xff]   ;;  %v928_v20 = vld [vmem:[%s1176_s1 + $0x78] sm:$0xff]  }
   0x8   :  { %800 = vmatprep.subr.bf16.mxu0 %v913_v5  ;;  %v929_v21 = vld [vmem:[%s1176_s1 + $0xb0] sm:$0xff]   ;;  %v930_v23 = vld [vmem:[%s1176_s1 + $0x38] sm:$0xff]   ;;  %v931_v26 = vld [vmem:[%s1177_s0] ss:$12 sps:$4 sm:$0xff]  }
   0x9   :  { %879 = vmatpush3.bf16.msra.mxu1 %v914_v6  ;;  %v933_v22 = vld [vmem:[%s1177_s0 + $0x4] ss:$12 sps:$4 sm:$0xff]   ;;  %v935_v24 = vld [vmem:[%s1177_s0 + $0x8] ss:$12 sps:$4 sm:$0xff]   ;;  %v934_v25 = vld [vmem:[%s1176_s1 + $0xb8] sm:$0xff]  }
   0xa   :  { %880 = vmatprep.subr.bf16.mxu1 %v917_v9  ;;  %406 = vmatprep.mubr.bf16.mxu0 %v933_v22  ;;  %v937_v27 = vld [vmem:[%s1177_s0 + $0x1c] ss:$12 sps:$4 sm:$0xff]   ;;  %v936_v28 = vld [vmem:[%s1177_s0 + $0x20] ss:$12 sps:$4 sm:$0xff]   ;;  %v943_v29 = vld [vmem:[%s1177_s0 + $0x38] ss:$12 sps:$4 sm:$0xff]  }
   0xb   :  { %801 = vmatpush3.bf16.msra.mxu0 %v915_v7  ;;  %892 = vmatprep.mubr.bf16.mxu1 %v935_v24  ;;  %v939_v30 = vld [vmem:[%s1177_s0 + $0x18] ss:$12 sps:$4 sm:$0xff]   ;;  %v940_v31 = vld [vmem:[%s1177_s0 + $0x34] ss:$12 sps:$4 sm:$0xff]   ;;  %v944_v32 = vld [vmem:[%s1177_s0 + $0x50] ss:$12 sps:$4 sm:$0xff]  }
   0xc   :  { %802 = vmatprep.subr.bf16.mxu0 %v916_v8  ;;  %v951_v33 = vld [vmem:[%s1177_s0 + $0x68] ss:$12 sps:$4 sm:$0xff]   ;;  %v942_v34 = vld [vmem:[%s1177_s0 + $0x30] ss:$12 sps:$4 sm:$0xff]   ;;  %v945_v35 = vld [vmem:[%s1177_s0 + $0x4c] ss:$12 sps:$4 sm:$0xff]  }
   0xd   :  { %881 = vmatpush3.bf16.msra.mxu1 %v917_v9  ;;  %v952_v36 = vld [vmem:[%s1177_s0 + $0x80] ss:$12 sps:$4 sm:$0xff]   ;;  %v959_v37 = vld [vmem:[%s1177_s0 + $0x98] ss:$12 sps:$4 sm:$0xff]   ;;  %v947_v38 = vld [vmem:[%s1177_s0 + $0x48] ss:$12 sps:$4 sm:$0xff]  }
   0xe   :  { %882 = vmatprep.subr.bf16.mxu1 %v920_v12  ;;  %v948_v39 = vld [vmem:[%s1177_s0 + $0x64] ss:$12 sps:$4 sm:$0xff]   ;;  %v950_v41 = vld [vmem:[%s1177_s0 + $0x60] ss:$12 sps:$4 sm:$0xff]   ;;  %v953_v42 = vld [vmem:[%s1177_s0 + $0x7c] ss:$12 sps:$4 sm:$0xff]  }
   0xf   :  { %803 = vmatpush3.bf16.msra.mxu0 %v918_v10  ;;  %v960_v40 = vld [vmem:[%s1177_s0 + $0xb0] ss:$12 sps:$4 sm:$0xff]   ;;  %v955_v43 = vld [vmem:[%s1177_s0 + $0x78] ss:$12 sps:$4 sm:$0xff]   ;;  %v956_v44 = vld [vmem:[%s1177_s0 + $0x94] ss:$12 sps:$4 sm:$0xff]  }
  0x10   :  { %804 = vmatprep.subr.bf16.mxu0 %v919_v11  ;;  %v958_v45 = vld [vmem:[%s1177_s0 + $0x90] ss:$12 sps:$4 sm:$0xff]   ;;  %v961_v46 = vld [vmem:[%s1177_s0 + $0xac] ss:$12 sps:$4 sm:$0xff]   ;;  %v963_v47 = vld [vmem:[%s1177_s0 + $0xa8] ss:$12 sps:$4 sm:$0xff]  }
  0x11   :  { %883 = vmatpush3.bf16.msra.mxu1 %v920_v12  ;;  %v1131_v50 = vld [vmem:[%s1178_s2] ss:$0 sm:$0xff] }
  0x12   :  { %884 = vmatprep.subr.bf16.mxu1 %v923_v14 }
  0x13   :  { %805 = vmatpush3.bf16.msra.mxu0 %v921_v13 }
  0x14   :  { %806 = vmatprep.subr.bf16.mxu0 %v922_v15 }
  0x15   :  { %885 = vmatpush3.bf16.msra.mxu1 %v923_v14 }
  0x16   :  { %886 = vmatprep.subr.bf16.mxu1 %v926_v17 }
  0x17   :  { %807 = vmatpush3.bf16.msra.mxu0 %v924_v16 }
  0x18   :  { %808 = vmatprep.subr.bf16.mxu0 %v925_v18 }
  0x19   :  { %887 = vmatpush3.bf16.msra.mxu1 %v926_v17 }
  0x1a   :  { %888 = vmatprep.subr.bf16.mxu1 %v929_v21 }
  0x1b   :  { %809 = vmatpush3.bf16.msra.mxu0 %v927_v19 }
  0x1c   :  { %810 = vmatprep.subr.bf16.mxu0 %v928_v20 }
  0x1d   :  { %889 = vmatpush3.bf16.msra.mxu1 %v929_v21 }
  0x1e   :  { %890 = vmatprep.subr.bf16.mxu1 %v934_v25 }
  0x1f   :  { %811 = vmatpush3.bf16.msra.mxu0 %v930_v23 }
  0x21   :  { %891 = vmatpush3.bf16.msra.mxu1 %v934_v25 }
  0x22   :  { %407 = vmatmul.mubr.bf16.vlgmr.msra.gmra.mrb[0].mxu0 %v931_v26 }
  0x23   :  { %414 = vmatprep.mubr.bf16.mxu0 %v937_v27 }
  0x24   :  { %893 = vmatmul.mubr.bf16.vlgmr.msra.gmra.mrb[0].mxu1 %v936_v28 }
  0x25   :  { %896 = vmatprep.mubr.bf16.mxu1 %v943_v29 }
  0x2a   :  { %415 = vmatmul.mubr.bf16.gmra.mrb[4].mxu0 %v939_v30 }
  0x2b   :  { %422 = vmatprep.mubr.bf16.mxu0 %v940_v31 }
  0x2c   :  { %897 = vmatmul.mubr.bf16.gmra.mrb[4].mxu1 %v944_v32 }
  0x2d   :  { %900 = vmatprep.mubr.bf16.mxu1 %v951_v33 }
  0x32   :  { %423 = vmatmul.mubr.bf16.gmra.mrb[8].mxu0 %v942_v34 }
  0x33   :  { %430 = vmatprep.mubr.bf16.mxu0 %v945_v35 }
  0x34   :  { %901 = vmatmul.mubr.bf16.gmra.mrb[8].mxu1 %v952_v36 }
  0x35   :  { %904 = vmatprep.mubr.bf16.mxu1 %v959_v37 }
  0x3a   :  { %431 = vmatmul.mubr.bf16.gmra.mrb[12].mxu0 %v947_v38 }
  0x3b   :  { %438 = vmatprep.mubr.bf16.mxu0 %v948_v39 }
  0x3c   :  { %905 = vmatmul.mubr.bf16.gmra.mrb[12].mxu1 %v960_v40 }
  0x42   :  { %439 = vmatmul.mubr.bf16.gmra.mrb[16].mxu0 %v950_v41 }
  0x43   :  { %446 = vmatprep.mubr.bf16.mxu0 %v953_v42 }
  0x4a   :  { %447 = vmatmul.mubr.bf16.gmra.mrb[20].mxu0 %v955_v43 }
  0x4b   :  { %454 = vmatprep.mubr.bf16.mxu0 %v956_v44 }
  0x52   :  { %455 = vmatmul.mubr.bf16.gmra.mrb[24].mxu0 %v958_v45 }
  0x53   :  { %462 = vmatprep.mubr.bf16.mxu0 %v961_v46 }
  0x5a   :  { %463 = vmatmul.mubr.bf16.gmra.mrb[28].mxu0 %v963_v47 }
  0xf5   :  { %v812_v48 = vpop.f32.mrb[0].mxu0 }
  0xf6   :  { %v813_v49 = vpop.f32.mrb[1].mxu0 }
  0xf7   :  { %v814_v51 = vadd.f32 %v813_v49, %v812_v48  ;;  %v815_v52 = vpop.f32.mrb[2].mxu0  ;;  %v894_v54 = vpop.f32.mrb[0].mxu1 }
  0xf8   :  { %v816_v53 = vpop.f32.mrb[3].mxu0  ;;  %v505_v57 = vpop.f32.mrb[1].mxu1 }
  0xf9   :  { %v817_v55 = vadd.f32 %v816_v53, %v815_v52  ;;  %v409_v56 = vadd.f32 %v814_v51, %v1131_v50  ;;  %v895_v58 = vpop.f32.mrb[2].mxu1 }
  0xfa   :  { %v508_v61 = vpop.f32.mrb[3].mxu1 }
  0xfb   :  { %v506_v59 = vadd.f32 %v505_v57, %v409_v56  ;;  %v412_v60 = vadd.f32 %v817_v55, %v1131_v50 }
  0xfd   :  { %v509_v62 = vadd.f32 %v508_v61, %v412_v60  ;;  %v818_v63 = vpop.f32.mrb[4].mxu0  ;;  %v568_v1 = vmax.f32 %v506_v59, 0.0 }
  0xfe   :  { %v819_v0 = vpop.f32.mrb[5].mxu0 }
  0xff   :  { %v569_v2 = vmax.f32 %v509_v62, 0.0  ;;  %v820_v3 = vadd.f32 %v819_v0, %v818_v63  ;;  %v821_v4 = vpop.f32.mrb[6].mxu0  ;;  %v898_v6 = vpop.f32.mrb[4].mxu1 }
 0x100   :  { %v822_v5 = vpop.f32.mrb[7].mxu0  ;;  %v521_v10 = vpop.f32.mrb[5].mxu1 }
 0x101   :  { %v752_v7 = vpack.c.bf16 %v569_v2, %v568_v1  ;;  %v417_v8 = vadd.f32 %v820_v3, %v1131_v50  ;;  %v823_v9 = vadd.f32 %v822_v5, %v821_v4  ;;  %v899_v11 = vpop.f32.mrb[6].mxu1 }
 0x102   :  { %v524_v14 = vpop.f32.mrb[7].mxu1 }
 0x103   :  { %753 = vst [vmem:[%s1179_s3] sm:$0xff] %v752_v7   ;;  %v514_v12 = vadd.f32 %v894_v54, %v417_v8  ;;  %v420_v13 = vadd.f32 %v823_v9, %v1131_v50 }
 0x105   :  { %v517_v15 = vadd.f32 %v895_v58, %v420_v13  ;;  %v824_v16 = vpop.f32.mrb[8].mxu0  ;;  %v570_v18 = vmax.f32 %v514_v12, 0.0 }
 0x106   :  { %v825_v17 = vpop.f32.mrb[9].mxu0 }
 0x107   :  { %v571_v19 = vmax.f32 %v517_v15, 0.0  ;;  %v826_v20 = vadd.f32 %v825_v17, %v824_v16  ;;  %v827_v21 = vpop.f32.mrb[10].mxu0  ;;  %v902_v23 = vpop.f32.mrb[8].mxu1 }
 0x108   :  { %v828_v22 = vpop.f32.mrb[11].mxu0  ;;  %v537_v27 = vpop.f32.mrb[9].mxu1 }
 0x109   :  { %v757_v24 = vpack.c.bf16 %v571_v19, %v570_v18  ;;  %v829_v25 = vadd.f32 %v828_v22, %v827_v21  ;;  %v425_v26 = vadd.f32 %v826_v20, %v1131_v50  ;;  %v903_v28 = vpop.f32.mrb[10].mxu1 }
 0x10a   :  { %v540_v31 = vpop.f32.mrb[11].mxu1 }
 0x10b   :  { %789 = vst [vmem:[%s1179_s3 + $0x8] sm:$0xff] %v757_v24   ;;  %v522_v29 = vadd.f32 %v521_v10, %v425_v26  ;;  %v428_v30 = vadd.f32 %v829_v25, %v1131_v50 }
 0x10d   :  { %v525_v32 = vadd.f32 %v524_v14, %v428_v30  ;;  %v830_v33 = vpop.f32.mrb[12].mxu0  ;;  %v572_v35 = vmax.f32 %v522_v29, 0.0 }
 0x10e   :  { %v831_v34 = vpop.f32.mrb[13].mxu0 }
 0x10f   :  { %v573_v36 = vmax.f32 %v525_v32, 0.0  ;;  %v832_v37 = vadd.f32 %v831_v34, %v830_v33  ;;  %v833_v38 = vpop.f32.mrb[14].mxu0  ;;  %v1145_v40 = vpop.f32.mrb[12].mxu1 }
 0x110   :  { %v834_v39 = vpop.f32.mrb[15].mxu0  ;;  %v553_v44 = vpop.f32.mrb[13].mxu1 }
 0x111   :  { %v762_v41 = vpack.c.bf16 %v573_v36, %v572_v35  ;;  %v433_v42 = vadd.f32 %v832_v37, %v1131_v50  ;;  %v835_v43 = vadd.f32 %v834_v39, %v833_v38  ;;  %v907_v45 = vpop.f32.mrb[14].mxu1 }
 0x112   :  { %v556_v48 = vpop.f32.mrb[15].mxu1 }
 0x113   :  { %790 = vst [vmem:[%s1179_s3 + $0x10] sm:$0xff] %v762_v41   ;;  %v530_v46 = vadd.f32 %v898_v6, %v433_v42  ;;  %v436_v47 = vadd.f32 %v835_v43, %v1131_v50 }
 0x115   :  { %v533_v49 = vadd.f32 %v899_v11, %v436_v47  ;;  %v836_v51 = vpop.f32.mrb[16].mxu0  ;;  %v574_v53 = vmax.f32 %v530_v46, 0.0 }
 0x116   :  { %v837_v52 = vpop.f32.mrb[17].mxu0 }
 0x117   :  { %v575_v54 = vmax.f32 %v533_v49, 0.0  ;;  %v838_v55 = vadd.f32 %v837_v52, %v836_v51  ;;  %v839_v56 = vpop.f32.mrb[18].mxu0 }
 0x118   :  { %v840_v57 = vpop.f32.mrb[19].mxu0 }
 0x119   :  { %v767_v58 = vpack.c.bf16 %v575_v54, %v574_v53  ;;  %v841_v59 = vadd.f32 %v840_v57, %v839_v56  ;;  %v441_v60 = vadd.f32 %v838_v55, %v1131_v50 }
 0x11b   :  { %791 = vst [vmem:[%s1179_s3 + $0x18] sm:$0xff] %v767_v58   ;;  %v538_v61 = vadd.f32 %v537_v27, %v441_v60  ;;  %v444_v62 = vadd.f32 %v841_v59, %v1131_v50 }
 0x11d   :  { %v541_v63 = vadd.f32 %v540_v31, %v444_v62  ;;  %v842_v0 = vpop.f32.mrb[20].mxu0  ;;  %v576_v2 = vmax.f32 %v538_v61, 0.0 }
 0x11e   :  { %v843_v1 = vpop.f32.mrb[21].mxu0 }
 0x11f   :  { %v577_v3 = vmax.f32 %v541_v63, 0.0  ;;  %v844_v4 = vadd.f32 %v843_v1, %v842_v0  ;;  %v845_v5 = vpop.f32.mrb[22].mxu0 }
 0x120   :  { %v846_v6 = vpop.f32.mrb[23].mxu0 }
 0x121   :  { %v772_v7 = vpack.c.bf16 %v577_v3, %v576_v2  ;;  %v449_v8 = vadd.f32 %v844_v4, %v1131_v50  ;;  %v847_v9 = vadd.f32 %v846_v6, %v845_v5 }
 0x123   :  { %792 = vst [vmem:[%s1179_s3 + $0x20] sm:$0xff] %v772_v7   ;;  %v546_v10 = vadd.f32 %v902_v23, %v449_v8  ;;  %v452_v11 = vadd.f32 %v847_v9, %v1131_v50 }
 0x125   :  { %v549_v12 = vadd.f32 %v903_v28, %v452_v11  ;;  %v848_v13 = vpop.f32.mrb[24].mxu0  ;;  %v578_v15 = vmax.f32 %v546_v10, 0.0 }
 0x126   :  { %v849_v14 = vpop.f32.mrb[25].mxu0 }
 0x127   :  { %v579_v16 = vmax.f32 %v549_v12, 0.0  ;;  %v850_v17 = vadd.f32 %v849_v14, %v848_v13  ;;  %v851_v18 = vpop.f32.mrb[26].mxu0 }
 0x128   :  { %v852_v19 = vpop.f32.mrb[27].mxu0 }
 0x129   :  { %v777_v20 = vpack.c.bf16 %v579_v16, %v578_v15  ;;  %v853_v21 = vadd.f32 %v852_v19, %v851_v18  ;;  %v457_v22 = vadd.f32 %v850_v17, %v1131_v50 }
 0x12b   :  { %793 = vst [vmem:[%s1179_s3 + $0x28] sm:$0xff] %v777_v20   ;;  %v554_v24 = vadd.f32 %v553_v44, %v457_v22  ;;  %v460_v23 = vadd.f32 %v853_v21, %v1131_v50 }
 0x12d   :  { %v557_v25 = vadd.f32 %v556_v48, %v460_v23  ;;  %v854_v26 = vpop.f32.mrb[28].mxu0  ;;  %v580_v28 = vmax.f32 %v554_v24, 0.0 }
 0x12e   :  { %v855_v27 = vpop.f32.mrb[29].mxu0 }
 0x12f   :  { %v581_v29 = vmax.f32 %v557_v25, 0.0  ;;  %v856_v30 = vadd.f32 %v855_v27, %v854_v26  ;;  %v857_v31 = vpop.f32.mrb[30].mxu0 }
 0x130   :  { %v858_v32 = vpop.f32.mrb[31].mxu0 }
 0x131   :  { %v782_v33 = vpack.c.bf16 %v581_v29, %v580_v28  ;;  %v465_v34 = vadd.f32 %v856_v30, %v1131_v50  ;;  %v859_v35 = vadd.f32 %v858_v32, %v857_v31 }
 0x133   :  { %794 = vst [vmem:[%s1179_s3 + $0x30] sm:$0xff] %v782_v33   ;;  %v562_v36 = vadd.f32 %v1145_v40, %v465_v34  ;;  %v468_v37 = vadd.f32 %v859_v35, %v1131_v50 }
 0x135   :  { %v565_v38 = vadd.f32 %v907_v45, %v468_v37  ;;  %v582_v39 = vmax.f32 %v562_v36, 0.0 }
 0x137   :  { %v583_v41 = vmax.f32 %v565_v38, 0.0 }
 0x139   :  { %v787_v42 = vpack.c.bf16 %v583_v41, %v582_v39 }
 0x13b   :  { %795 = vst [vmem:[%s1179_s3 + $0x38] sm:$0xff] %v787_v42  }

// kernel: encoder_tactile_forward.8
= control target key start
LH: loop header
LB: loop body
LE: loop exit
PB: predicated region body
PF: predicated region fallthrough
CT: control target
= control target key end

     0   :  { %s761_s1 = inlined_call_operand.vmem [shape: bf16[512,128], index: 1, kind: input, shape index: {}]   ;;  %s762_s0 = inlined_call_operand.vmem [shape: bf16[32,512], index: 0, kind: input, shape index: {}]   ;;  %s763_s2 = inlined_call_operand.vmem [shape: f32[1,128], index: 2, kind: input, shape index: {}]   ;;  %s764_s3 = inlined_call_operand.vmem [shape: bf16[32,128], index: 3, kind: output, shape index: {}]  }
   0x1   :  { %v568_v0 = vld [vmem:[%s761_s1 + $0x40] sm:$0xff]   ;;  %v572_v4 = vld [vmem:[%s761_s1 + $0x48] sm:$0xff]   ;;  %v576_v8 = vld [vmem:[%s761_s1 + $0x50] sm:$0xff]  }
   0x2   :  { %v569_v1 = vld [vmem:[%s761_s1 + $0xc0] sm:$0xff]   ;;  %512 = vmatprep.subr.bf16.mxu0 %v568_v0  ;;  %v573_v5 = vld [vmem:[%s761_s1 + $0xc8] sm:$0xff]   ;;  %v577_v9 = vld [vmem:[%s761_s1 + $0xd0] sm:$0xff]  }
   0x3   :  { %v570_v2 = vld [vmem:[%s761_s1] sm:$0xff]   ;;  %540 = vmatprep.subr.bf16.mxu1 %v569_v1  ;;  %v574_v6 = vld [vmem:[%s761_s1 + $0x8] sm:$0xff]   ;;  %v578_v10 = vld [vmem:[%s761_s1 + $0x10] sm:$0xff]  }
   0x4   :  { %v571_v3 = vld [vmem:[%s761_s1 + $0x80] sm:$0xff]   ;;  %513 = vmatpush3.bf16.msra.mxu0 %v570_v2  ;;  %v575_v7 = vld [vmem:[%s761_s1 + $0x88] sm:$0xff]   ;;  %v579_v11 = vld [vmem:[%s761_s1 + $0x90] sm:$0xff]  }
   0x5   :  { %541 = vmatpush3.bf16.msra.mxu1 %v571_v3  ;;  %514 = vmatprep.subr.bf16.mxu0 %v572_v4  ;;  %v580_v12 = vld [vmem:[%s761_s1 + $0x58] sm:$0xff]   ;;  %v584_v16 = vld [vmem:[%s761_s1 + $0x60] sm:$0xff]   ;;  %v588_v20 = vld [vmem:[%s761_s1 + $0x68] sm:$0xff]  }
   0x6   :  { %542 = vmatprep.subr.bf16.mxu1 %v573_v5  ;;  %v581_v13 = vld [vmem:[%s761_s1 + $0xd8] sm:$0xff]   ;;  %v585_v17 = vld [vmem:[%s761_s1 + $0xe0] sm:$0xff]   ;;  %v589_v21 = vld [vmem:[%s761_s1 + $0xe8] sm:$0xff]  }
   0x7   :  { %v582_v14 = vld [vmem:[%s761_s1 + $0x18] sm:$0xff]   ;;  %v586_v18 = vld [vmem:[%s761_s1 + $0x20] sm:$0xff]   ;;  %v590_v22 = vld [vmem:[%s761_s1 + $0x28] sm:$0xff]  }
   0x8   :  { %515 = vmatpush3.bf16.msra.mxu0 %v574_v6  ;;  %v583_v15 = vld [vmem:[%s761_s1 + $0x98] sm:$0xff]   ;;  %v587_v19 = vld [vmem:[%s761_s1 + $0xa0] sm:$0xff]   ;;  %v591_v23 = vld [vmem:[%s761_s1 + $0xa8] sm:$0xff]  }
   0x9   :  { %543 = vmatpush3.bf16.msra.mxu1 %v575_v7  ;;  %516 = vmatprep.subr.bf16.mxu0 %v576_v8  ;;  %v592_v24 = vld [vmem:[%s761_s1 + $0x70] sm:$0xff]   ;;  %v596_v28 = vld [vmem:[%s761_s1 + $0x78] sm:$0xff]   ;;  %v452_v42 = vld [vmem:[%s763_s2] ss:$0 sm:$0xff] }
   0xa   :  { %544 = vmatprep.subr.bf16.mxu1 %v577_v9  ;;  %v593_v25 = vld [vmem:[%s761_s1 + $0xf0] sm:$0xff]   ;;  %v597_v29 = vld [vmem:[%s761_s1 + $0xf8] sm:$0xff]  }
   0xb   :  { %v594_v26 = vld [vmem:[%s761_s1 + $0x30] sm:$0xff]   ;;  %v598_v30 = vld [vmem:[%s761_s1 + $0x38] sm:$0xff]  }
   0xc   :  { %517 = vmatpush3.bf16.msra.mxu0 %v578_v10  ;;  %v595_v27 = vld [vmem:[%s761_s1 + $0xb0] sm:$0xff]   ;;  %v599_v31 = vld [vmem:[%s761_s1 + $0xb8] sm:$0xff]  }
   0xd   :  { %545 = vmatpush3.bf16.msra.mxu1 %v579_v11  ;;  %518 = vmatprep.subr.bf16.mxu0 %v580_v12  ;;  %v600_v32 = vld [vmem:[%s762_s0] ss:$16 sps:$4 sm:$0xff]   ;;  %v602_v33 = vld [vmem:[%s762_s0 + $0x4] ss:$16 sps:$4 sm:$0xff]   ;;  %v603_v34 = vld [vmem:[%s762_s0 + $0x8] ss:$16 sps:$4 sm:$0xff]  }
   0xe   :  { %546 = vmatprep.subr.bf16.mxu1 %v581_v13  ;;  %v605_v35 = vld [vmem:[%s762_s0 + $0xc] ss:$16 sps:$4 sm:$0xff]   ;;  %358 = vmatprep.mubr.bf16.mxu0 %v602_v33  ;;  %v606_v36 = vld [vmem:[%s762_s0 + $0x24] ss:$16 sps:$4 sm:$0xff]   ;;  %v610_v38 = vld [vmem:[%s762_s0 + $0x20] ss:$16 sps:$4 sm:$0xff]  }
   0xf   :  { %407 = vmatprep.mubr.bf16.mxu1 %v605_v35  ;;  %v608_v37 = vld [vmem:[%s762_s0 + $0x2c] ss:$16 sps:$4 sm:$0xff]   ;;  %v611_v39 = vld [vmem:[%s762_s0 + $0x28] ss:$16 sps:$4 sm:$0xff]  }
  0x10   :  { %519 = vmatpush3.bf16.msra.mxu0 %v582_v14 }
  0x11   :  { %547 = vmatpush3.bf16.msra.mxu1 %v583_v15  ;;  %520 = vmatprep.subr.bf16.mxu0 %v584_v16 }
  0x12   :  { %548 = vmatprep.subr.bf16.mxu1 %v585_v17 }
  0x14   :  { %521 = vmatpush3.bf16.msra.mxu0 %v586_v18 }
  0x15   :  { %549 = vmatpush3.bf16.msra.mxu1 %v587_v19  ;;  %522 = vmatprep.subr.bf16.mxu0 %v588_v20 }
  0x16   :  { %550 = vmatprep.subr.bf16.mxu1 %v589_v21 }
  0x18   :  { %523 = vmatpush3.bf16.msra.mxu0 %v590_v22 }
  0x19   :  { %551 = vmatpush3.bf16.msra.mxu1 %v591_v23  ;;  %524 = vmatprep.subr.bf16.mxu0 %v592_v24 }
  0x1a   :  { %552 = vmatprep.subr.bf16.mxu1 %v593_v25 }
  0x1c   :  { %525 = vmatpush3.bf16.msra.mxu0 %v594_v26 }
  0x1d   :  { %553 = vmatpush3.bf16.msra.mxu1 %v595_v27  ;;  %526 = vmatprep.subr.bf16.mxu0 %v596_v28 }
  0x1e   :  { %554 = vmatprep.subr.bf16.mxu1 %v597_v29 }
  0x20   :  { %527 = vmatpush3.bf16.msra.mxu0 %v598_v30 }
  0x21   :  { %555 = vmatpush3.bf16.msra.mxu1 %v599_v31 }
  0x23   :  { %359 = vmatmul.mubr.bf16.vlgmr.msra.gmra.mrb[0].mxu0 %v600_v32 }
  0x24   :  { %408 = vmatmul.mubr.bf16.vlgmr.msra.gmra.mrb[0].mxu1 %v603_v34  ;;  %366 = vmatprep.mubr.bf16.mxu0 %v606_v36 }
  0x25   :  { %415 = vmatprep.mubr.bf16.mxu1 %v608_v37 }
  0x2b   :  { %367 = vmatmul.mubr.bf16.gmra.mrb[4].mxu0 %v610_v38 }
  0x2c   :  { %416 = vmatmul.mubr.bf16.gmra.mrb[4].mxu1 %v611_v39 }
  0xf6   :  { %v528_v40 = vpop.f32.mrb[0].mxu0 }
  0xf7   :  { %v556_v41 = vpop.f32.mrb[0].mxu1  ;;  %v529_v43 = vpop.f32.mrb[1].mxu0 }
  0xf8   :  { %v530_v44 = vadd.f32 %v529_v43, %v528_v40  ;;  %v557_v45 = vpop.f32.mrb[1].mxu1  ;;  %v531_v46 = vpop.f32.mrb[2].mxu0 }
  0xf9   :  { %v558_v47 = vadd.f32 %v557_v45, %v556_v41  ;;  %v559_v48 = vpop.f32.mrb[2].mxu1  ;;  %v532_v49 = vpop.f32.mrb[3].mxu0 }
  0xfa   :  { %v361_v50 = vadd.f32 %v530_v44, %v452_v42  ;;  %v533_v51 = vadd.f32 %v532_v49, %v531_v46  ;;  %v560_v52 = vpop.f32.mrb[3].mxu1 }
  0xfb   :  { %v561_v53 = vadd.f32 %v560_v52, %v559_v48 }
  0xfc   :  { %v410_v54 = vadd.f32 %v558_v47, %v361_v50  ;;  %v364_v55 = vadd.f32 %v533_v51, %v452_v42 }
  0xfe   :  { %v413_v56 = vadd.f32 %v561_v53, %v364_v55  ;;  %v534_v57 = vpop.f32.mrb[4].mxu0  ;;  %v424_v60 = vmax.f32 %v410_v54, 0.0 }
  0xff   :  { %v562_v58 = vpop.f32.mrb[4].mxu1  ;;  %v535_v59 = vpop.f32.mrb[5].mxu0 }
 0x100   :  { %v425_v61 = vmax.f32 %v413_v56, 0.0  ;;  %v536_v62 = vadd.f32 %v535_v59, %v534_v57  ;;  %v563_v63 = vpop.f32.mrb[5].mxu1  ;;  %v537_v0 = vpop.f32.mrb[6].mxu0 }
 0x101   :  { %v564_v1 = vadd.f32 %v563_v63, %v562_v58  ;;  %v565_v2 = vpop.f32.mrb[6].mxu1  ;;  %v538_v3 = vpop.f32.mrb[7].mxu0 }
 0x102   :  { %v504_v4 = vpack.c.bf16 %v425_v61, %v424_v60  ;;  %v369_v5 = vadd.f32 %v536_v62, %v452_v42  ;;  %v539_v6 = vadd.f32 %v538_v3, %v537_v0  ;;  %v566_v7 = vpop.f32.mrb[7].mxu1 }
 0x103   :  { %v567_v8 = vadd.f32 %v566_v7, %v565_v2 }
 0x104   :  { %505 = vst [vmem:[%s764_s3] sm:$0xff] %v504_v4   ;;  %v418_v9 = vadd.f32 %v564_v1, %v369_v5  ;;  %v372_v10 = vadd.f32 %v539_v6, %v452_v42 }
 0x106   :  { %v421_v11 = vadd.f32 %v567_v8, %v372_v10  ;;  %v426_v12 = vmax.f32 %v418_v9, 0.0 }
 0x108   :  { %v427_v13 = vmax.f32 %v421_v11, 0.0 }
 0x10a   :  { %v509_v14 = vpack.c.bf16 %v427_v13, %v426_v12 }
 0x10c   :  { %511 = vst [vmem:[%s764_s3 + $0x8] sm:$0xff] %v509_v14  }

// kernel: encoder_tactile_forward.9
= control target key start
LH: loop header
LB: loop body
LE: loop exit
PB: predicated region body
PF: predicated region fallthrough
CT: control target
= control target key end

     0   :  { %v991_v22 = vmov 1966171168   ;;  %v146_v24 = vlaneseq  ;;  %s1220_s1 = inlined_call_operand.vmem [shape: bf16[1024,128], index: 1, kind: input, shape index: {}]   ;;  %s1221_s0 = inlined_call_operand.vmem [shape: bf16[2,1024], index: 0, kind: input, shape index: {}]   ;;  %s1222_s2 = inlined_call_operand.vmem [shape: f32[2,128], index: 2, kind: output, shape index: {}]  }
   0x1   :  { %v922_v0 = vld [vmem:[%s1220_s1 + $0x40] sm:$0xff]   ;;  %v926_v4 = vld [vmem:[%s1220_s1 + $0x48] sm:$0xff]   ;;  %v930_v8 = vld [vmem:[%s1220_s1 + $0x50] sm:$0xff]   ;;  %v144_v23 = vunpack.c.l.s4 %v991_v22 }
   0x2   :  { %v923_v1 = vld [vmem:[%s1220_s1 + $0xc0] sm:$0xff]   ;;  %833 = vmatprep.subr.bf16.mxu0 %v922_v0  ;;  %v927_v5 = vld [vmem:[%s1220_s1 + $0xc8] sm:$0xff]   ;;  %v931_v9 = vld [vmem:[%s1220_s1 + $0xd0] sm:$0xff]   ;;  %v147_v30 = vshrl.u32 %v146_v24, 7 }
   0x3   :  { %v924_v2 = vld [vmem:[%s1220_s1] sm:$0xff]   ;;  %855 = vmatprep.subr.bf16.mxu1 %v923_v1  ;;  %v928_v6 = vld [vmem:[%s1220_s1 + $0x8] sm:$0xff]   ;;  %v932_v10 = vld [vmem:[%s1220_s1 + $0x10] sm:$0xff]   ;;  %v145_v29 = vunpack.c.0.s8 %v144_v23 }
   0x4   :  { %v925_v3 = vld [vmem:[%s1220_s1 + $0x80] sm:$0xff]   ;;  %834 = vmatpush3.bf16.msra.mxu0 %v924_v2  ;;  %v929_v7 = vld [vmem:[%s1220_s1 + $0x88] sm:$0xff]   ;;  %v933_v11 = vld [vmem:[%s1220_s1 + $0x90] sm:$0xff]  }
   0x5   :  { %856 = vmatpush3.bf16.msra.mxu1 %v925_v3  ;;  %835 = vmatprep.subr.bf16.mxu0 %v926_v4  ;;  %v934_v12 = vld [vmem:[%s1220_s1 + $0x58] sm:$0xff]   ;;  %v938_v16 = vld [vmem:[%s1220_s1 + $0x60] sm:$0xff]   ;;  %v942_v20 = vld [vmem:[%s1220_s1 + $0x68] sm:$0xff]   ;;  %v1098_v35 = vsub.s32 %v145_v29, %v147_v30 }
   0x6   :  { %857 = vmatprep.subr.bf16.mxu1 %v927_v5  ;;  %v935_v13 = vld [vmem:[%s1220_s1 + $0xd8] sm:$0xff]   ;;  %v939_v17 = vld [vmem:[%s1220_s1 + $0xe0] sm:$0xff]   ;;  %v943_v21 = vld [vmem:[%s1220_s1 + $0xe8] sm:$0xff]  }
   0x7   :  { %v936_v14 = vld [vmem:[%s1220_s1 + $0x18] sm:$0xff]   ;;  %v940_v18 = vld [vmem:[%s1220_s1 + $0x20] sm:$0xff]   ;;  %v944_v25 = vld [vmem:[%s1220_s1 + $0x28] sm:$0xff]  }
   0x8   :  { %836 = vmatpush3.bf16.msra.mxu0 %v928_v6  ;;  %v937_v15 = vld [vmem:[%s1220_s1 + $0x98] sm:$0xff]   ;;  %v941_v19 = vld [vmem:[%s1220_s1 + $0xa0] sm:$0xff]   ;;  %v945_v26 = vld [vmem:[%s1220_s1 + $0xa8] sm:$0xff]  }
   0x9   :  { %858 = vmatpush3.bf16.msra.mxu1 %v929_v7  ;;  %837 = vmatprep.subr.bf16.mxu0 %v930_v8  ;;  %v946_v27 = vld [vmem:[%s1220_s1 + $0x70] sm:$0xff]   ;;  %v950_v33 = vld [vmem:[%s1220_s1 + $0x78] sm:$0xff]   ;;  %v12_v38 = vld [vmem:[%s1221_s0] sm:$0xff] }
   0xa   :  { %859 = vmatprep.subr.bf16.mxu1 %v931_v9  ;;  %v947_v28 = vld [vmem:[%s1220_s1 + $0xf0] sm:$0xff]   ;;  %v951_v34 = vld [vmem:[%s1220_s1 + $0xf8] sm:$0xff]   ;;  %v142_v39 = vcombine.high %v12_v38, %v12_v38  ;;  %v149_v40 = vrot.slane %v12_v38, %v1098_v35  ;;  %v955_v41 = vld [vmem:[%s1220_s1 + $0x140] sm:$0xff]  }
   0xb   :  { %v948_v31 = vld [vmem:[%s1220_s1 + $0x30] sm:$0xff]   ;;  %v952_v36 = vld [vmem:[%s1220_s1 + $0x38] sm:$0xff]   ;;  %v956_v42 = vld [vmem:[%s1220_s1 + $0x1c0] sm:$0xff]  }
   0xc   :  { %838 = vmatpush3.bf16.msra.mxu0 %v932_v10  ;;  %v949_v32 = vld [vmem:[%s1220_s1 + $0xb0] sm:$0xff]   ;;  %v953_v37 = vld [vmem:[%s1220_s1 + $0xb8] sm:$0xff]   ;;  %v157_v43 = vcombine.high %v149_v40, %v149_v40  ;;  %v165_v44 = vrot.slane %v149_v40, %v1098_v35  ;;  %v1118_v45 = vrot.slane %v142_v39, %v1098_v35  ;;  %v957_v47 = vld [vmem:[%s1220_s1 + $0x100] sm:$0xff]  }
   0xd   :  { %860 = vmatpush3.bf16.msra.mxu1 %v933_v11  ;;  %839 = vmatprep.subr.bf16.mxu0 %v934_v12  ;;  %v959_v50 = vld [vmem:[%s1220_s1 + $0x148] sm:$0xff]   ;;  %v958_v52 = vld [vmem:[%s1220_s1 + $0x180] sm:$0xff]   ;;  %v963_v57 = vld [vmem:[%s1220_s1 + $0x150] sm:$0xff]  }
   0xe   :  { %861 = vmatprep.subr.bf16.mxu1 %v935_v13  ;;  %v179_v46 = vrot.slane %v157_v43, %v1098_v35  ;;  %v158_v48 = vcombine.high %v1118_v45, %v1118_v45  ;;  %v187_v49 = vcombine.high %v165_v44, %v165_v44  ;;  %v960_v54 = vld [vmem:[%s1220_s1 + $0x1c8] sm:$0xff]   ;;  %v964_v59 = vld [vmem:[%s1220_s1 + $0x1d0] sm:$0xff]   ;;  %v967_v61 = vld [vmem:[%s1220_s1 + $0x158] sm:$0xff]  }
   0xf   :  { %v961_v55 = vld [vmem:[%s1220_s1 + $0x108] sm:$0xff]   ;;  %v965_v60 = vld [vmem:[%s1220_s1 + $0x110] sm:$0xff]   ;;  %v968_v63 = vld [vmem:[%s1220_s1 + $0x1d8] sm:$0xff]  }
  0x10   :  { %840 = vmatpush3.bf16.msra.mxu0 %v936_v14  ;;  %615 = vmatprep.mubr.bf16.mxu0 %v179_v46  ;;  %v189_v51 = vcombine.high %v179_v46, %v179_v46  ;;  %v186_v53 = vrot.slane %v158_v48, %v1098_v35  ;;  %v962_v58 = vld [vmem:[%s1220_s1 + $0x188] sm:$0xff]   ;;  %v966_v62 = vld [vmem:[%s1220_s1 + $0x190] sm:$0xff]   ;;  %v969_v0 = vld [vmem:[%s1220_s1 + $0x118] sm:$0xff]  }
  0x11   :  { %862 = vmatpush3.bf16.msra.mxu1 %v937_v15  ;;  %841 = vmatprep.subr.bf16.mxu0 %v938_v16  ;;  %v971_v1 = vld [vmem:[%s1220_s1 + $0x160] sm:$0xff]   ;;  %v970_v2 = vld [vmem:[%s1220_s1 + $0x198] sm:$0xff]   ;;  %v975_v5 = vld [vmem:[%s1220_s1 + $0x168] sm:$0xff]  }
  0x12   :  { %863 = vmatprep.subr.bf16.mxu1 %v939_v17  ;;  %655 = vmatprep.mubr.bf16.mxu1 %v189_v51  ;;  %v190_v56 = vcombine.high %v186_v53, %v186_v53  ;;  %v972_v3 = vld [vmem:[%s1220_s1 + $0x1e0] sm:$0xff]   ;;  %v976_v7 = vld [vmem:[%s1220_s1 + $0x1e8] sm:$0xff]   ;;  %v979_v9 = vld [vmem:[%s1220_s1 + $0x170] sm:$0xff]   ;;  %v172_v17 = vrot.slane %v1118_v45, %v1098_v35 }
  0x13   :  { %v973_v4 = vld [vmem:[%s1220_s1 + $0x120] sm:$0xff]   ;;  %v977_v8 = vld [vmem:[%s1220_s1 + $0x128] sm:$0xff]   ;;  %v980_v11 = vld [vmem:[%s1220_s1 + $0x1f0] sm:$0xff]  }
  0x14   :  { %842 = vmatpush3.bf16.msra.mxu0 %v940_v18  ;;  %v974_v6 = vld [vmem:[%s1220_s1 + $0x1a0] sm:$0xff]   ;;  %v978_v10 = vld [vmem:[%s1220_s1 + $0x1a8] sm:$0xff]   ;;  %v981_v12 = vld [vmem:[%s1220_s1 + $0x130] sm:$0xff]  }
  0x15   :  { %864 = vmatpush3.bf16.msra.mxu1 %v941_v19  ;;  %843 = vmatprep.subr.bf16.mxu0 %v942_v20  ;;  %v983_v13 = vld [vmem:[%s1220_s1 + $0x178] sm:$0xff]   ;;  %v982_v14 = vld [vmem:[%s1220_s1 + $0x1b0] sm:$0xff]   ;;  %v188_v19 = vcombine.high %v172_v17, %v172_v17 }
  0x16   :  { %865 = vmatprep.subr.bf16.mxu1 %v943_v21  ;;  %v984_v15 = vld [vmem:[%s1220_s1 + $0x1f8] sm:$0xff]  }
  0x17   :  { %v985_v16 = vld [vmem:[%s1220_s1 + $0x138] sm:$0xff]  }
  0x18   :  { %844 = vmatpush3.bf16.msra.mxu0 %v944_v25  ;;  %v986_v18 = vld [vmem:[%s1220_s1 + $0x1b8] sm:$0xff]  }
  0x19   :  { %866 = vmatpush3.bf16.msra.mxu1 %v945_v26  ;;  %845 = vmatprep.subr.bf16.mxu0 %v946_v27 }
  0x1a   :  { %867 = vmatprep.subr.bf16.mxu1 %v947_v28 }
  0x1c   :  { %846 = vmatpush3.bf16.msra.mxu0 %v948_v31 }
  0x1d   :  { %868 = vmatpush3.bf16.msra.mxu1 %v949_v32  ;;  %847 = vmatprep.subr.bf16.mxu0 %v950_v33 }
  0x1e   :  { %869 = vmatprep.subr.bf16.mxu1 %v951_v34 }
  0x20   :  { %848 = vmatpush3.bf16.msra.mxu0 %v952_v36 }
  0x21   :  { %870 = vmatpush3.bf16.msra.mxu1 %v953_v37  ;;  %877 = vmatprep.subr.bf16.mxu0 %v955_v41 }
  0x22   :  { %899 = vmatprep.subr.bf16.mxu1 %v956_v42 }
  0x23   :  { %616 = vmatmul.mubr.bf16.vlgmr.msra.gmra.mrb[0].mxu0 %v165_v44 }
  0x24   :  { %878 = vmatpush3.bf16.msra.mxu0 %v957_v47  ;;  %656 = vmatmul.mubr.bf16.vlgmr.msra.gmra.mrb[0].mxu1 %v187_v49 }
  0x25   :  { %879 = vmatprep.subr.bf16.mxu0 %v959_v50  ;;  %900 = vmatpush3.bf16.msra.mxu1 %v958_v52 }
  0x26   :  { %695 = vmatprep.mubr.bf16.mxu0 %v186_v53  ;;  %901 = vmatprep.subr.bf16.mxu1 %v960_v54  ;;  %v744_v53 = vand.u32 127, %v146_v24 }
  0x27   :  { %735 = vmatprep.mubr.bf16.mxu1 %v190_v56 }
  0x28   :  { %880 = vmatpush3.bf16.msra.mxu0 %v961_v55  ;;  %vm762_vm1 = vcmp.lt.s32.totalorder %v744_v53, 16 }
  0x29   :  { %881 = vmatprep.subr.bf16.mxu0 %v963_v57  ;;  %902 = vmatpush3.bf16.msra.mxu1 %v962_v58 }
  0x2a   :  { %903 = vmatprep.subr.bf16.mxu1 %v964_v59 }
  0x2c   :  { %882 = vmatpush3.bf16.msra.mxu0 %v965_v60 }
  0x2d   :  { %883 = vmatprep.subr.bf16.mxu0 %v967_v61  ;;  %904 = vmatpush3.bf16.msra.mxu1 %v966_v62 }
  0x2e   :  { %905 = vmatprep.subr.bf16.mxu1 %v968_v63 }
  0x30   :  { %884 = vmatpush3.bf16.msra.mxu0 %v969_v0 }
  0x31   :  { %885 = vmatprep.subr.bf16.mxu0 %v971_v1  ;;  %906 = vmatpush3.bf16.msra.mxu1 %v970_v2 }
  0x32   :  { %907 = vmatprep.subr.bf16.mxu1 %v972_v3 }
  0x34   :  { %886 = vmatpush3.bf16.msra.mxu0 %v973_v4 }
  0x35   :  { %887 = vmatprep.subr.bf16.mxu0 %v975_v5  ;;  %908 = vmatpush3.bf16.msra.mxu1 %v974_v6 }
  0x36   :  { %909 = vmatprep.subr.bf16.mxu1 %v976_v7 }
  0x38   :  { %888 = vmatpush3.bf16.msra.mxu0 %v977_v8 }
  0x39   :  { %889 = vmatprep.subr.bf16.mxu0 %v979_v9  ;;  %910 = vmatpush3.bf16.msra.mxu1 %v978_v10 }
  0x3a   :  { %911 = vmatprep.subr.bf16.mxu1 %v980_v11 }
  0x3c   :  { %890 = vmatpush3.bf16.msra.mxu0 %v981_v12 }
  0x3d   :  { %891 = vmatprep.subr.bf16.mxu0 %v983_v13  ;;  %912 = vmatpush3.bf16.msra.mxu1 %v982_v14 }
  0x3e   :  { %913 = vmatprep.subr.bf16.mxu1 %v984_v15 }
  0x40   :  { %892 = vmatpush3.bf16.msra.mxu0 %v985_v16 }
  0x41   :  { %914 = vmatpush3.bf16.msra.mxu1 %v986_v18 }
  0x43   :  { %696 = vmatmul.mubr.bf16.vlgmr.msra.gmra.mrb[4].mxu0 %v172_v17 }
  0x44   :  { %736 = vmatmul.mubr.bf16.vlgmr.msra.gmra.mrb[4].mxu1 %v188_v19 }
  0xf6   :  { %v849_v20 = vpop.f32.mrb[0].mxu0 }
  0xf7   :  { %v850_v21 = vpop.f32.mrb[1].mxu0  ;;  %v871_v22 = vpop.f32.mrb[0].mxu1 }
  0xf8   :  { %v851_v23 = vadd.f32 %v850_v21, %v849_v20  ;;  %v852_v25 = vpop.f32.mrb[2].mxu0  ;;  %v872_v26 = vpop.f32.mrb[1].mxu1 }
  0xf9   :  { %v853_v27 = vpop.f32.mrb[3].mxu0  ;;  %v873_v28 = vadd.f32 %v872_v26, %v871_v22  ;;  %v874_v29 = vpop.f32.mrb[2].mxu1 }
  0xfa   :  { %v875_v30 = vpop.f32.mrb[3].mxu1 }
  0xfb   :  { %v658_v31 = vadd.f32 %v873_v28, %v851_v23 }
 0x116   :  { %v893_v32 = vpop.f32.mrb[4].mxu0 }
 0x117   :  { %v894_v33 = vpop.f32.mrb[5].mxu0  ;;  %v915_v34 = vpop.f32.mrb[4].mxu1 }
 0x118   :  { %v895_v35 = vadd.f32 %v894_v33, %v893_v32  ;;  %v896_v36 = vpop.f32.mrb[6].mxu0  ;;  %v916_v37 = vpop.f32.mrb[5].mxu1 }
 0x119   :  { %v897_v38 = vpop.f32.mrb[7].mxu0  ;;  %v917_v40 = vadd.f32 %v916_v37, %v915_v34  ;;  %v918_v41 = vpop.f32.mrb[6].mxu1 }
 0x11a   :  { %v698_v39 = vadd.f32 %v895_v35, %v658_v31  ;;  %v919_v42 = vpop.f32.mrb[7].mxu1 }
 0x11c   :  { %v738_v43 = vadd.f32 %v917_v40, %v698_v39 }
 0x11e   :  { %v747_v44 = vand.u32 2147483647, %v738_v43  ;;  %v746_v56 = vmax.f32 %v738_v43, 0.0  ;;  %v745_v59 = vadd.f32 1e-06, %v738_v43 }
 0x120   :  { %v748_v45 = vsub.f32 0.0, %v747_v44 }
 0x122   :  { %v749_v46 = vmul.f32 1.442695, %v748_v45 }
 0x124   :  { %987 = vpow2.f32 %v749_v46 }
 0x12e   :  { %v988_v47 = vpop.eup %987 }
 0x12f   :  { %v751_v48 = vadd.f32 1.0, %v988_v47  ;;  %v754_v49 = vmul.f32 -0.5, %v988_v47  ;;  %v757_v51 = vand.u32 2147483647, %v988_v47 }
 0x131   :  { %989 = vlog2.f32 %v751_v48  ;;  %v755_v50 = vadd.f32 1.0, %v754_v49  ;;  %vm758_vm0 = vcmp.lt.f32.partialorder %v757_v51, 0.0004427343 }
 0x133   :  { %v756_v55 = vmul.f32 %v988_v47, %v755_v50 }
 0x13b   :  { %v990_v52 = vpop.eup %989 }
 0x13c   :  { %v753_v54 = vmul.f32 0.6931472, %v990_v52 }
 0x13e   :  { %v759_v57 = vsel %vm758_vm0, %v756_v55, %v753_v54 }
 0x13f   :  { %v760_v58 = vadd.f32 %v759_v57, %v746_v56 }
 0x141   :  { %v761_v60 = vadd.f32 1e-06, %v760_v58 }
 0x143   :  { %v763_v61 = vsel %vm762_vm1, %v745_v59, %v761_v60 }
 0x144   :  { %764 = vst [vmem:[%s1222_s2] sm:$0x3] %v763_v61 }

</bundles_post_ra>
